<compile_context>
chip_gen: v7x
topology: tpu7x:2x2x1
jax: 0.10.0
libtpu: 0.0.40
codegen_flags: <defaults>
</compile_context>

<pallas_src>
import functools

import jax
import jax.numpy as jnp
import numpy as np
from jax.experimental import pallas as pl
from jax.experimental.pallas import tpu as pltpu


# ----------------------------- kernel helpers --------------------------------
def _attention(x, w_qkv_t, m, inv_sqrt_d):
    """Single-score self-attention, batch-on-lanes layout.

    x:       (N, D, TB)  attention inputs (batch on the lane axis).
    w_qkv_t: (3D, D)     fused [Wq^T ; Wk^T ; Wv^T].
    m:       (N, TB) 0/1 mask or None.
    returns  (D, TB)     sum_n softmax_n(score) * V_n
    """
    N, D, TB = x.shape
    # One MXU push for all of Q, K, V over all N rows: (3D, D) @ (D, N*TB).
    x_cat = jnp.concatenate([x[n] for n in range(N)], axis=-1)            # (D, N*TB)
    qkv = jnp.dot(w_qkv_t, x_cat, preferred_element_type=jnp.float32)     # (3D, N*TB)
    q = qkv[0 * D:1 * D]
    k = qkv[1 * D:2 * D]
    v = qkv[2 * D:3 * D]
    a = jnp.sum(q * k, axis=0, keepdims=True) * inv_sqrt_d                # (1, N*TB)

    # Lane-tile-aligned per-row columns; softmax over N done as vector ops.
    a_cols = [a[:, n * TB:(n + 1) * TB] for n in range(N)]                # (1, TB)
    if m is not None:
        a_cols = [a_cols[n] - (1.0 - m[n:n + 1, :]) * 1e12 for n in range(N)]
    amax = a_cols[0]
    for n in range(1, N):
        amax = jnp.maximum(amax, a_cols[n])
    es = [jnp.exp(c - amax) for c in a_cols]
    denom = es[0]
    for n in range(1, N):
        denom = denom + es[n]
    inv_denom = pl.reciprocal(denom, approx=True)                         # (1, TB)
    out = (es[0] * inv_denom) * v[:, 0:TB]
    for n in range(1, N):
        out = out + (es[n] * inv_denom) * v[:, n * TB:(n + 1) * TB]
    return out                                                            # (D, TB)


def difm_kernel(embs_ref, vals_ref, mask_ref, time_ref, wide_ref,
                t2v_w_ref, t2v_b_ref, qkv_ref,
                fc1_w_ref, fc1_b_ref, fc2_w_ref, fc2_b_ref,
                fc3_w_ref, fc3_b_ref, lr_bias_ref, out_ref,
                *, sub_seq_num, seq_length):
    embs = embs_ref[...]          # (E, F, D, TB)
    vals = vals_ref[...]          # (E, F, TB)
    mask = mask_ref[...]          # (E, TB)
    t = time_ref[...]             # (E, TB)
    E, F, D, TB = embs.shape
    inv_sqrt_d = 1.0 / float(np.sqrt(float(D)))

    # scale embeddings by feature values (lane-dense: TB on lanes)
    embs = embs * vals[:, :, None, :]                                     # (E,F,D,TB)

    # time2vec: component 0 linear, the rest sin(.)
    arg = (t[:, None, :] * t2v_w_ref[...][None, :, :]
           + t2v_b_ref[...][None, :, :])                                  # (E, D, TB)
    didx = jax.lax.broadcasted_iota(jnp.int32, arg.shape, 1)
    time_emb = jnp.where(didx == 0, arg, jnp.sin(arg))                    # (E, D, TB)

    embs_sq = embs * embs
    time_sq = time_emb * time_emb

    # ---- FM over fields (embeddings + time as an extra field) ----
    s_f = jnp.sum(embs, axis=1) + time_emb                                # (E, D, TB)
    s2_f = jnp.sum(embs_sq, axis=1) + time_sq
    fm1 = 0.5 * (s_f * s_f - s2_f)                                        # (E, D, TB)

    # ---- FM over events ----
    s_e = jnp.sum(embs, axis=0)                                           # (F, D, TB)
    s2_e = jnp.sum(embs_sq, axis=0)
    fm2_fields = 0.5 * (s_e * s_e - s2_e)                                 # (F, D, TB)
    st = jnp.sum(time_emb, axis=0)                                        # (D, TB)
    st2 = jnp.sum(time_sq, axis=0)
    fm2_time = 0.5 * (st * st - st2)                                      # (D, TB)
    fm2 = jnp.concatenate([fm2_fields, fm2_time[None]], axis=0)           # (F+1, D, TB)

    # ---- FM over seq positions within each sub-sequence ----
    fm1_seq = fm1.reshape(sub_seq_num, seq_length, D, TB)
    ss = jnp.sum(fm1_seq, axis=1)
    ss2 = jnp.sum(fm1_seq * fm1_seq, axis=1)
    fm3 = 0.5 * (ss * ss - ss2)                                           # (sub, D, TB)

    seq_mask = jnp.sum(mask.reshape(sub_seq_num, seq_length, TB), axis=1)
    seq_mask = jnp.where(seq_mask >= 1.0, 1.0, 0.0)                       # (sub, TB)

    # ---- three self-attentions (fused QKV, one MXU push each) ----
    emb_his = _attention(fm1, qkv_ref[0], mask, inv_sqrt_d)               # (D, TB)
    emb_f = _attention(fm2, qkv_ref[1], None, inv_sqrt_d)                 # (D, TB)
    emb_seq = _attention(fm3, qkv_ref[2], seq_mask, inv_sqrt_d)           # (D, TB)

    # ---- deep MLP on the lane-concatenated features (single fc1 matmul) ----
    deep_in = jnp.concatenate([emb_his, emb_f, emb_seq], axis=0)          # (3D, TB)
    h1 = jnp.maximum(
        jnp.dot(fc1_w_ref[...], deep_in, preferred_element_type=jnp.float32)
        + fc1_b_ref[...], 0.0)                                            # (H1, TB)
    h2 = jnp.maximum(
        jnp.dot(fc2_w_ref[...], h1, preferred_element_type=jnp.float32)
        + fc2_b_ref[...], 0.0)                                            # (H2, TB)
    deep_out = (jnp.dot(fc3_w_ref[...], h2, preferred_element_type=jnp.float32)
                + fc3_b_ref[...])                                         # (1, TB)

    # ---- wide / LR part ----
    lr_f = jnp.sum(wide_ref[...] * vals, axis=0)                          # (F, TB)
    lr = jnp.sum(lr_f, axis=0, keepdims=True)                             # (1, TB)
    logit = deep_out + lr + lr_bias_ref[...]                              # (1, TB)

    # lane-dense store: fill the whole (8, TB) output slab
    out_ref[...] = jnp.broadcast_to(jax.nn.sigmoid(logit), out_ref.shape)


# --------------------------------- wrapper -----------------------------------
def difm_seq_pallas(ids, values, masks, time_seq, params, *,
                    seq_length, sub_seq_num, batch_tile=128):
    B, E, F = ids.shape
    D = params["emb_table"].shape[1]
    H1 = params["fc1_w"].shape[1]
    H2 = params["fc2_w"].shape[1]

    # Embedding gathers (XLA glue) + layout plumbing to batch-on-lanes.
    embs = jnp.take(params["emb_table"], ids, axis=0)                     # (B,E,F,D)
    wide = jnp.take(params["wide_table"], ids, axis=0)[..., 0]            # (B,E,F)
    t = time_seq[..., 0]                                                  # (B,E)

    embs_t = jnp.transpose(embs, (1, 2, 3, 0))                            # (E,F,D,B)
    vals_t = jnp.transpose(values, (1, 2, 0))                             # (E,F,B)
    wide_t = jnp.transpose(wide, (1, 2, 0))                               # (E,F,B)
    mask_t = jnp.transpose(masks, (1, 0))                                 # (E,B)
    time_t = jnp.transpose(t, (1, 0))                                     # (E,B)

    # Pad batch to a multiple of the tile (padded lanes are independent and
    # are discarded on return).  TB=128 keeps the per-step working set tiny
    # (<< 32 MiB scoped VMEM on every TPU generation, incl. v7x's 64 MiB).
    tb = int(batch_tile)
    B_pad = int(np.ceil(B / tb)) * tb
    pad = B_pad - B
    if pad:
        embs_t = jnp.pad(embs_t, ((0, 0), (0, 0), (0, 0), (0, pad)))
        vals_t = jnp.pad(vals_t, ((0, 0), (0, 0), (0, pad)))
        wide_t = jnp.pad(wide_t, ((0, 0), (0, 0), (0, pad)))
        mask_t = jnp.pad(mask_t, ((0, 0), (0, pad)))
        time_t = jnp.pad(time_t, ((0, 0), (0, pad)))

    # Weight prep: fuse Q/K/V per attention and pre-transpose dense weights so
    # every in-kernel matmul is a plain (out,in)@(in,TB) 2-D dot.
    W = params["attn_w"]                                                  # (9, D, D)
    qkv_t = jnp.stack([
        jnp.concatenate([W[3 * i + 0].T, W[3 * i + 1].T, W[3 * i + 2].T], axis=0)
        for i in range(3)], axis=0)                                       # (3, 3D, D)
    fc1_wt = params["fc1_w"].T                                            # (H1, 3D)
    fc2_wt = params["fc2_w"].T                                            # (H2, H1)
    fc3_wt = params["fc3_w"].T                                            # (1, H2)
    fc1_b = params["fc1_b"].reshape(H1, 1)
    fc2_b = params["fc2_b"].reshape(H2, 1)
    fc3_b = params["fc3_b"].reshape(1, 1)
    t2v_w = params["t2v_w"].reshape(D, 1)
    t2v_b = params["t2v_b"].reshape(D, 1)
    lr_bias = params["lr_bias"].reshape(1, 1)

    nb = B_pad // tb
    kernel = functools.partial(difm_kernel, sub_seq_num=sub_seq_num,
                               seq_length=seq_length)

    def tile_spec(shape):
        # activations: tiled along the trailing (batch / lane) axis
        ndim = len(shape)
        blk = tuple(shape[:-1]) + (tb,)
        return pl.BlockSpec(blk, lambda b, _n=ndim: (0,) * (_n - 1) + (b,))

    def const_spec(shape):
        # weights: single block, resident across the whole grid
        ndim = len(shape)
        return pl.BlockSpec(tuple(shape), lambda b, _n=ndim: (0,) * _n)

    in_specs = [
        tile_spec(embs_t.shape), tile_spec(vals_t.shape), tile_spec(mask_t.shape),
        tile_spec(time_t.shape), tile_spec(wide_t.shape),
        const_spec(t2v_w.shape), const_spec(t2v_b.shape), const_spec(qkv_t.shape),
        const_spec(fc1_wt.shape), const_spec(fc1_b.shape),
        const_spec(fc2_wt.shape), const_spec(fc2_b.shape),
        const_spec(fc3_wt.shape), const_spec(fc3_b.shape),
        const_spec(lr_bias.shape),
    ]
    out_spec = pl.BlockSpec((8, tb), lambda b: (0, b))

    out = pl.pallas_call(
        kernel,
        out_shape=jax.ShapeDtypeStruct((8, B_pad), jnp.float32),
        grid=(nb,),
        in_specs=in_specs,
        out_specs=out_spec,
        compiler_params=pltpu.CompilerParams(
            dimension_semantics=("parallel",),
            vmem_limit_bytes=48 * 1024 * 1024),
    )(embs_t, vals_t, mask_t, time_t, wide_t,
      t2v_w, t2v_b, qkv_t, fc1_wt, fc1_b, fc2_wt, fc2_b, fc3_wt, fc3_b, lr_bias)

    return out[0, :B]                                                     # (B,)


# ------------------------- pure-JAX reference --------------------------------
def difm_seq_ref(ids, values, masks, time_seq, params, *, seq_length, sub_seq_num):
    D = params["emb_table"].shape[1]
    B, E, F = ids.shape
    embs = jnp.take(params["emb_table"], ids, axis=0) * values[..., None]
    t = time_seq[..., 0]
    arg = (t[..., None] * params["t2v_w"].reshape(1, 1, D)
           + params["t2v_b"].reshape(1, 1, D))
    time_emb = jnp.concatenate([arg[..., :1], jnp.sin(arg[..., 1:])], axis=-1)
    embs_full = jnp.concatenate([embs, time_emb[:, :, None, :]], axis=2)

    def FM(x, dim):
        s = jnp.sum(x, axis=dim)
        return 0.5 * (jnp.square(s) - jnp.sum(jnp.square(x), axis=dim))

    def attention(x, num, m):
        i0 = (num - 1) * 3
        W = params["attn_w"]
        Q, K, V = x @ W[i0 + 0], x @ W[i0 + 1], x @ W[i0 + 2]
        a = jnp.sum(Q * K, axis=-1) / jnp.sqrt(float(D))
        if m is not None:
            a = a - (1.0 - m) * 1e12
        a = jax.nn.softmax(a, axis=1)
        return jnp.sum(a[..., None] * V, axis=1)

    fm1 = FM(embs_full, 2)
    emb_his = attention(fm1, 1, masks)
    fm1_out = fm1.reshape(B, sub_seq_num, seq_length, D)
    seq_masks = jnp.where(
        jnp.sum(masks.reshape(B, sub_seq_num, seq_length), axis=2) >= 1.0, 1.0, 0.0)
    fm3 = FM(fm1_out, 2)
    emb_seq = attention(fm3, 3, seq_masks)
    fm2 = FM(embs_full, 1)
    emb_f = attention(fm2, 2, None)

    deep_in = jnp.concatenate([emb_his, emb_f, emb_seq], axis=1)
    h1 = jax.nn.relu(deep_in @ params["fc1_w"] + params["fc1_b"][0])
    h2 = jax.nn.relu(h1 @ params["fc2_w"] + params["fc2_b"][0])
    deep_out = h2 @ params["fc3_w"] + params["fc3_b"][0]

    wide = jnp.take(params["wide_table"], ids.reshape(B, -1), axis=0)[..., 0]
    lr_out = (jnp.sum(wide * values.reshape(B, -1), axis=1, keepdims=True)
              + params["lr_bias"])
    return jax.nn.sigmoid(deep_out + lr_out)[:, 0]


if __name__ == "__main__":
    # small config consistent with the module
    D, H1, H2 = 8, 16, 8
    vocab = 50
    E, F = 8, 4          # num_events, num_fileds
    seq_length = 4
    sub_seq_num = E // seq_length

    key = jax.random.PRNGKey(0)
    ks = jax.random.split(key, 16)

    params = {
        "emb_table": jax.random.normal(ks[0], (vocab + 1, D), jnp.float32),
        "wide_table": jax.random.normal(ks[1], (vocab, 1), jnp.float32),
        "attn_w": 0.01 * jax.random.normal(ks[2], (9, D, D), jnp.float32),
        "t2v_w": jax.random.normal(ks[3], (1, D), jnp.float32),
        "t2v_b": jax.random.normal(ks[4], (1, D), jnp.float32),
        "fc1_w": jax.random.normal(ks[5], (3 * D, H1), jnp.float32) / np.sqrt(3 * D),
        "fc1_b": 0.01 * jax.random.normal(ks[6], (1, H1), jnp.float32),
        "fc2_w": jax.random.normal(ks[7], (H1, H2), jnp.float32) / np.sqrt(H1),
        "fc2_b": 0.01 * jax.random.normal(ks[8], (1, H2), jnp.float32),
        "fc3_w": jax.random.normal(ks[9], (H2, 1), jnp.float32) / np.sqrt(H2),
        "fc3_b": 0.01 * jax.random.normal(ks[10], (1, 1), jnp.float32),
        "lr_bias": 0.01 * jax.random.normal(ks[11], (1, 1), jnp.float32),
    }

    def run_case(B, seed):
        kk = jax.random.split(jax.random.PRNGKey(seed), 4)
        ids = jax.random.randint(kk[0], (B, E, F), 0, vocab, dtype=jnp.int32)
        values = jax.random.uniform(kk[1], (B, E, F), jnp.float32)
        masks = (jax.random.uniform(kk[2], (B, E)) > 0.2).astype(jnp.float32)
        time_seq = 10.0 * jax.random.uniform(kk[3], (B, E, 1), jnp.float32)

        out = difm_seq_pallas(ids, values, masks, time_seq, params,
                              seq_length=seq_length, sub_seq_num=sub_seq_num,
                              batch_tile=128)
        out = jax.block_until_ready(out)
        ref = jax.block_until_ready(
            difm_seq_ref(ids, values, masks, time_seq, params,
                         seq_length=seq_length, sub_seq_num=sub_seq_num))
        assert out.shape == (B,)
        # approx reciprocal in the softmax -> slightly loose tolerance
        assert np.allclose(np.asarray(out), np.asarray(ref),
                           rtol=5e-3, atol=5e-3), (out, ref)

    run_case(B=2, seed=1)      # single-tile grid
    run_case(B=200, seed=2)    # multi-tile grid (2 batch tiles, padded)
    print("KERNEL_OK")
</pallas_src>

<mosaic_0001>
module attributes {stable_mosaic.version = 11 : i64} {
  func.func @difm_kernel(%arg0: i32, %arg1: memref<8x4x8x128xf32, #tpu.memory_space<vmem>>, %arg2: memref<8x4x128xf32, #tpu.memory_space<vmem>>, %arg3: memref<8x128xf32, #tpu.memory_space<vmem>>, %arg4: memref<8x128xf32, #tpu.memory_space<vmem>>, %arg5: memref<8x4x128xf32, #tpu.memory_space<vmem>>, %arg6: memref<8x1xf32, #tpu.memory_space<vmem>>, %arg7: memref<8x1xf32, #tpu.memory_space<vmem>>, %arg8: memref<3x24x8xf32, #tpu.memory_space<vmem>>, %arg9: memref<16x24xf32, #tpu.memory_space<vmem>>, %arg10: memref<16x1xf32, #tpu.memory_space<vmem>>, %arg11: memref<8x16xf32, #tpu.memory_space<vmem>>, %arg12: memref<8x1xf32, #tpu.memory_space<vmem>>, %arg13: memref<1x8xf32, #tpu.memory_space<vmem>>, %arg14: memref<1x1xf32, #tpu.memory_space<vmem>>, %arg15: memref<1x1xf32, #tpu.memory_space<vmem>>, %arg16: memref<8x128xf32, #tpu.memory_space<vmem>>) attributes {dimension_semantics = [#tpu.dimension_semantics<parallel>], iteration_bounds = array<i64: 1>, scalar_prefetch = 0 : i64, scratch_operands = 0 : i64, tpu.core_type = #tpu.core_type<tc>, window_params = [{transform_indices = @transform_0, window_bounds = array<i64: 8, 4, 8, 128>}, {transform_indices = @transform_1, window_bounds = array<i64: 8, 4, 128>}, {transform_indices = @transform_2, window_bounds = array<i64: 8, 128>}, {transform_indices = @transform_3, window_bounds = array<i64: 8, 128>}, {transform_indices = @transform_4, window_bounds = array<i64: 8, 4, 128>}, {pipeline_mode = #tpu.pipeline_mode<synchronous>, transform_indices = @transform_5, window_bounds = array<i64: 8, 1>}, {pipeline_mode = #tpu.pipeline_mode<synchronous>, transform_indices = @transform_6, window_bounds = array<i64: 8, 1>}, {pipeline_mode = #tpu.pipeline_mode<synchronous>, transform_indices = @transform_7, window_bounds = array<i64: 3, 24, 8>}, {pipeline_mode = #tpu.pipeline_mode<synchronous>, transform_indices = @transform_8, window_bounds = array<i64: 16, 24>}, {pipeline_mode = #tpu.pipeline_mode<synchronous>, transform_indices = @transform_9, window_bounds = array<i64: 16, 1>}, {pipeline_mode = #tpu.pipeline_mode<synchronous>, transform_indices = @transform_10, window_bounds = array<i64: 8, 16>}, {pipeline_mode = #tpu.pipeline_mode<synchronous>, transform_indices = @transform_11, window_bounds = array<i64: 8, 1>}, {pipeline_mode = #tpu.pipeline_mode<synchronous>, transform_indices = @transform_12, window_bounds = array<i64: 1, 8>}, {pipeline_mode = #tpu.pipeline_mode<synchronous>, transform_indices = @transform_13, window_bounds = array<i64: 1, 1>}, {pipeline_mode = #tpu.pipeline_mode<synchronous>, transform_indices = @transform_14, window_bounds = array<i64: 1, 1>}, {transform_indices = @transform_15, window_bounds = array<i64: 8, 128>}]} {
    %c0 = arith.constant 0 : index
    %c0_0 = arith.constant 0 : index
    %c0_1 = arith.constant 0 : index
    %c0_2 = arith.constant 0 : index
    %0 = vector.load %arg1[%c0, %c0_0, %c0_1, %c0_2] : memref<8x4x8x128xf32, #tpu.memory_space<vmem>>, vector<8x4x8x128xf32>
    %c0_3 = arith.constant 0 : index
    %c0_4 = arith.constant 0 : index
    %c0_5 = arith.constant 0 : index
    %1 = vector.load %arg2[%c0_3, %c0_4, %c0_5] : memref<8x4x128xf32, #tpu.memory_space<vmem>>, vector<8x4x128xf32>
    %c0_6 = arith.constant 0 : index
    %c0_7 = arith.constant 0 : index
    %2 = vector.load %arg3[%c0_6, %c0_7] : memref<8x128xf32, #tpu.memory_space<vmem>>, vector<8x128xf32>
    %c0_8 = arith.constant 0 : index
    %c0_9 = arith.constant 0 : index
    %3 = vector.load %arg4[%c0_8, %c0_9] : memref<8x128xf32, #tpu.memory_space<vmem>>, vector<8x128xf32>
    %4 = vector.shape_cast %1 : vector<8x4x128xf32> to vector<8x4x1x128xf32>
    %5 = vector.broadcast %4 : vector<8x4x1x128xf32> to vector<8x4x8x128xf32>
    %6 = arith.mulf %0, %5 : vector<8x4x8x128xf32>
    %7 = vector.shape_cast %3 : vector<8x128xf32> to vector<8x1x128xf32>
    %c0_10 = arith.constant 0 : index
    %c0_11 = arith.constant 0 : index
    %8 = vector.load %arg6[%c0_10, %c0_11] : memref<8x1xf32, #tpu.memory_space<vmem>>, vector<8x1xf32>
    %9 = vector.shape_cast %8 : vector<8x1xf32> to vector<1x8x1xf32>
    %10 = vector.broadcast %7 : vector<8x1x128xf32> to vector<8x8x128xf32>
    %11 = vector.broadcast %9 : vector<1x8x1xf32> to vector<8x8x128xf32>
    %12 = arith.mulf %10, %11 : vector<8x8x128xf32>
    %c0_12 = arith.constant 0 : index
    %c0_13 = arith.constant 0 : index
    %13 = vector.load %arg7[%c0_12, %c0_13] : memref<8x1xf32, #tpu.memory_space<vmem>>, vector<8x1xf32>
    %14 = vector.shape_cast %13 : vector<8x1xf32> to vector<1x8x1xf32>
    %15 = vector.broadcast %14 : vector<1x8x1xf32> to vector<8x8x128xf32>
    %16 = arith.addf %12, %15 : vector<8x8x128xf32>
    %17 = tpu.iota {dimensions = array<i32: 1>} : vector<8x8x128xi32>
    %c0_i32 = arith.constant 0 : i32
    %18 = vector.broadcast %c0_i32 : i32 to vector<8x8x128xi32>
    %19 = arith.cmpi eq, %17, %18 : vector<8x8x128xi32>
    %20 = math.sin %16 : vector<8x8x128xf32>
    %21 = arith.select %19, %16, %20 : vector<8x8x128xi1>, vector<8x8x128xf32>
    %22 = arith.mulf %6, %6 : vector<8x4x8x128xf32>
    %23 = arith.mulf %21, %21 : vector<8x8x128xf32>
    %cst = arith.constant dense<0.000000e+00> : vector<8x8x128xf32>
    %24 = vector.multi_reduction <add>, %6, %cst [1] : vector<8x4x8x128xf32> to vector<8x8x128xf32>
    %25 = arith.addf %24, %21 : vector<8x8x128xf32>
    %cst_14 = arith.constant dense<0.000000e+00> : vector<8x8x128xf32>
    %26 = vector.multi_reduction <add>, %22, %cst_14 [1] : vector<8x4x8x128xf32> to vector<8x8x128xf32>
    %27 = arith.addf %26, %23 : vector<8x8x128xf32>
    %28 = arith.mulf %25, %25 : vector<8x8x128xf32>
    %29 = arith.subf %28, %27 : vector<8x8x128xf32>
    %cst_15 = arith.constant 5.000000e-01 : f32
    %30 = vector.broadcast %cst_15 : f32 to vector<8x8x128xf32>
    %31 = arith.mulf %30, %29 : vector<8x8x128xf32>
    %cst_16 = arith.constant dense<0.000000e+00> : vector<4x8x128xf32>
    %32 = vector.multi_reduction <add>, %6, %cst_16 [0] : vector<8x4x8x128xf32> to vector<4x8x128xf32>
    %cst_17 = arith.constant dense<0.000000e+00> : vector<4x8x128xf32>
    %33 = vector.multi_reduction <add>, %22, %cst_17 [0] : vector<8x4x8x128xf32> to vector<4x8x128xf32>
    %34 = arith.mulf %32, %32 : vector<4x8x128xf32>
    %35 = arith.subf %34, %33 : vector<4x8x128xf32>
    %cst_18 = arith.constant 5.000000e-01 : f32
    %36 = vector.broadcast %cst_18 : f32 to vector<4x8x128xf32>
    %37 = arith.mulf %36, %35 : vector<4x8x128xf32>
    %cst_19 = arith.constant dense<0.000000e+00> : vector<8x128xf32>
    %38 = vector.multi_reduction <add>, %21, %cst_19 [0] : vector<8x8x128xf32> to vector<8x128xf32>
    %cst_20 = arith.constant dense<0.000000e+00> : vector<8x128xf32>
    %39 = vector.multi_reduction <add>, %23, %cst_20 [0] : vector<8x8x128xf32> to vector<8x128xf32>
    %40 = arith.mulf %38, %38 : vector<8x128xf32>
    %41 = arith.subf %40, %39 : vector<8x128xf32>
    %cst_21 = arith.constant 5.000000e-01 : f32
    %42 = vector.broadcast %cst_21 : f32 to vector<8x128xf32>
    %43 = arith.mulf %42, %41 : vector<8x128xf32>
    %44 = vector.shape_cast %43 : vector<8x128xf32> to vector<1x8x128xf32>
    %45 = tpu.concatenate %37, %44 in 0 : vector<4x8x128xf32>, vector<1x8x128xf32> -> vector<5x8x128xf32>
    %46 = vector.shape_cast %31 : vector<8x8x128xf32> to vector<2x4x8x128xf32>
    %cst_22 = arith.constant dense<0.000000e+00> : vector<2x8x128xf32>
    %47 = vector.multi_reduction <add>, %46, %cst_22 [1] : vector<2x4x8x128xf32> to vector<2x8x128xf32>
    %48 = arith.mulf %46, %46 : vector<2x4x8x128xf32>
    %cst_23 = arith.constant dense<0.000000e+00> : vector<2x8x128xf32>
    %49 = vector.multi_reduction <add>, %48, %cst_23 [1] : vector<2x4x8x128xf32> to vector<2x8x128xf32>
    %50 = arith.mulf %47, %47 : vector<2x8x128xf32>
    %51 = arith.subf %50, %49 : vector<2x8x128xf32>
    %cst_24 = arith.constant 5.000000e-01 : f32
    %52 = vector.broadcast %cst_24 : f32 to vector<2x8x128xf32>
    %53 = arith.mulf %52, %51 : vector<2x8x128xf32>
    %54 = vector.shape_cast %2 : vector<8x128xf32> to vector<2x4x128xf32>
    %cst_25 = arith.constant dense<0.000000e+00> : vector<2x128xf32>
    %55 = vector.multi_reduction <add>, %54, %cst_25 [1] : vector<2x4x128xf32> to vector<2x128xf32>
    %cst_26 = arith.constant 1.000000e+00 : f32
    %56 = vector.broadcast %cst_26 : f32 to vector<2x128xf32>
    %57 = arith.cmpf oge, %55, %56 : vector<2x128xf32>
    %cst_27 = arith.constant 1.000000e+00 : f32
    %cst_28 = arith.constant 0.000000e+00 : f32
    %58 = vector.broadcast %cst_27 : f32 to vector<2x128xf32>
    %59 = vector.broadcast %cst_28 : f32 to vector<2x128xf32>
    %60 = arith.select %57, %58, %59 : vector<2x128xi1>, vector<2x128xf32>
    %c0_29 = arith.constant 0 : index
    %c0_30 = arith.constant 0 : index
    %c0_31 = arith.constant 0 : index
    %61 = vector.load %arg8[%c0_29, %c0_30, %c0_31] : memref<3x24x8xf32, #tpu.memory_space<vmem>>, vector<1x24x8xf32>
    %62 = vector.shape_cast %61 : vector<1x24x8xf32> to vector<24x8xf32>
    %63 = vector.extract_strided_slice %31 {offsets = [0, 0, 0], sizes = [1, 8, 128], strides = [1, 1, 1]} : vector<8x8x128xf32> to vector<1x8x128xf32>
    %64 = vector.shape_cast %63 : vector<1x8x128xf32> to vector<8x128xf32>
    %65 = vector.extract_strided_slice %31 {offsets = [1, 0, 0], sizes = [1, 8, 128], strides = [1, 1, 1]} : vector<8x8x128xf32> to vector<1x8x128xf32>
    %66 = vector.shape_cast %65 : vector<1x8x128xf32> to vector<8x128xf32>
    %67 = vector.extract_strided_slice %31 {offsets = [2, 0, 0], sizes = [1, 8, 128], strides = [1, 1, 1]} : vector<8x8x128xf32> to vector<1x8x128xf32>
    %68 = vector.shape_cast %67 : vector<1x8x128xf32> to vector<8x128xf32>
    %69 = vector.extract_strided_slice %31 {offsets = [3, 0, 0], sizes = [1, 8, 128], strides = [1, 1, 1]} : vector<8x8x128xf32> to vector<1x8x128xf32>
    %70 = vector.shape_cast %69 : vector<1x8x128xf32> to vector<8x128xf32>
    %71 = vector.extract_strided_slice %31 {offsets = [4, 0, 0], sizes = [1, 8, 128], strides = [1, 1, 1]} : vector<8x8x128xf32> to vector<1x8x128xf32>
    %72 = vector.shape_cast %71 : vector<1x8x128xf32> to vector<8x128xf32>
    %73 = vector.extract_strided_slice %31 {offsets = [5, 0, 0], sizes = [1, 8, 128], strides = [1, 1, 1]} : vector<8x8x128xf32> to vector<1x8x128xf32>
    %74 = vector.shape_cast %73 : vector<1x8x128xf32> to vector<8x128xf32>
    %75 = vector.extract_strided_slice %31 {offsets = [6, 0, 0], sizes = [1, 8, 128], strides = [1, 1, 1]} : vector<8x8x128xf32> to vector<1x8x128xf32>
    %76 = vector.shape_cast %75 : vector<1x8x128xf32> to vector<8x128xf32>
    %77 = vector.extract_strided_slice %31 {offsets = [7, 0, 0], sizes = [1, 8, 128], strides = [1, 1, 1]} : vector<8x8x128xf32> to vector<1x8x128xf32>
    %78 = vector.shape_cast %77 : vector<1x8x128xf32> to vector<8x128xf32>
    %79 = tpu.concatenate %64, %66, %68, %70, %72, %74, %76, %78 in 1 : vector<8x128xf32>, vector<8x128xf32>, vector<8x128xf32>, vector<8x128xf32>, vector<8x128xf32>, vector<8x128xf32>, vector<8x128xf32>, vector<8x128xf32> -> vector<8x1024xf32>
    %cst_32 = arith.constant dense<0.000000e+00> : vector<24x1024xf32>
    %80 = tpu.matmul %62, %79, %cst_32 {dimension_numbers = #tpu.dot_dimension_numbers<[1], [0], [0], [1], [0, 0, 1, 1], [], []>} : vector<24x8xf32>, vector<8x1024xf32>, vector<24x1024xf32> -> vector<24x1024xf32>
    %81 = vector.extract_strided_slice %80 {offsets = [0, 0], sizes = [8, 1024], strides = [1, 1]} : vector<24x1024xf32> to vector<8x1024xf32>
    %82 = vector.extract_strided_slice %80 {offsets = [8, 0], sizes = [8, 1024], strides = [1, 1]} : vector<24x1024xf32> to vector<8x1024xf32>
    %83 = vector.extract_strided_slice %80 {offsets = [16, 0], sizes = [8, 1024], strides = [1, 1]} : vector<24x1024xf32> to vector<8x1024xf32>
    %84 = arith.mulf %81, %82 : vector<8x1024xf32>
    %cst_33 = arith.constant dense<0.000000e+00> : vector<1024xf32>
    %85 = vector.multi_reduction <add>, %84, %cst_33 [0] : vector<8x1024xf32> to vector<1024xf32>
    %86 = vector.shape_cast %85 : vector<1024xf32> to vector<1x1024xf32>
    %cst_34 = arith.constant 0.353553385 : f32
    %87 = vector.broadcast %cst_34 : f32 to vector<1x1024xf32>
    %88 = arith.mulf %86, %87 : vector<1x1024xf32>
    %89 = vector.extract_strided_slice %88 {offsets = [0, 0], sizes = [1, 128], strides = [1, 1]} : vector<1x1024xf32> to vector<1x128xf32>
    %90 = vector.extract_strided_slice %88 {offsets = [0, 128], sizes = [1, 128], strides = [1, 1]} : vector<1x1024xf32> to vector<1x128xf32>
    %91 = vector.extract_strided_slice %88 {offsets = [0, 256], sizes = [1, 128], strides = [1, 1]} : vector<1x1024xf32> to vector<1x128xf32>
    %92 = vector.extract_strided_slice %88 {offsets = [0, 384], sizes = [1, 128], strides = [1, 1]} : vector<1x1024xf32> to vector<1x128xf32>
    %93 = vector.extract_strided_slice %88 {offsets = [0, 512], sizes = [1, 128], strides = [1, 1]} : vector<1x1024xf32> to vector<1x128xf32>
    %94 = vector.extract_strided_slice %88 {offsets = [0, 640], sizes = [1, 128], strides = [1, 1]} : vector<1x1024xf32> to vector<1x128xf32>
    %95 = vector.extract_strided_slice %88 {offsets = [0, 768], sizes = [1, 128], strides = [1, 1]} : vector<1x1024xf32> to vector<1x128xf32>
    %96 = vector.extract_strided_slice %88 {offsets = [0, 896], sizes = [1, 128], strides = [1, 1]} : vector<1x1024xf32> to vector<1x128xf32>
    %97 = vector.extract_strided_slice %2 {offsets = [0, 0], sizes = [1, 128], strides = [1, 1]} : vector<8x128xf32> to vector<1x128xf32>
    %cst_35 = arith.constant 1.000000e+00 : f32
    %98 = vector.broadcast %cst_35 : f32 to vector<1x128xf32>
    %99 = arith.subf %98, %97 : vector<1x128xf32>
    %cst_36 = arith.constant 9.99999995E+11 : f32
    %100 = vector.broadcast %cst_36 : f32 to vector<1x128xf32>
    %101 = arith.mulf %99, %100 : vector<1x128xf32>
    %102 = arith.subf %89, %101 : vector<1x128xf32>
    %103 = vector.extract_strided_slice %2 {offsets = [1, 0], sizes = [1, 128], strides = [1, 1]} : vector<8x128xf32> to vector<1x128xf32>
    %cst_37 = arith.constant 1.000000e+00 : f32
    %104 = vector.broadcast %cst_37 : f32 to vector<1x128xf32>
    %105 = arith.subf %104, %103 : vector<1x128xf32>
    %cst_38 = arith.constant 9.99999995E+11 : f32
    %106 = vector.broadcast %cst_38 : f32 to vector<1x128xf32>
    %107 = arith.mulf %105, %106 : vector<1x128xf32>
    %108 = arith.subf %90, %107 : vector<1x128xf32>
    %109 = vector.extract_strided_slice %2 {offsets = [2, 0], sizes = [1, 128], strides = [1, 1]} : vector<8x128xf32> to vector<1x128xf32>
    %cst_39 = arith.constant 1.000000e+00 : f32
    %110 = vector.broadcast %cst_39 : f32 to vector<1x128xf32>
    %111 = arith.subf %110, %109 : vector<1x128xf32>
    %cst_40 = arith.constant 9.99999995E+11 : f32
    %112 = vector.broadcast %cst_40 : f32 to vector<1x128xf32>
    %113 = arith.mulf %111, %112 : vector<1x128xf32>
    %114 = arith.subf %91, %113 : vector<1x128xf32>
    %115 = vector.extract_strided_slice %2 {offsets = [3, 0], sizes = [1, 128], strides = [1, 1]} : vector<8x128xf32> to vector<1x128xf32>
    %cst_41 = arith.constant 1.000000e+00 : f32
    %116 = vector.broadcast %cst_41 : f32 to vector<1x128xf32>
    %117 = arith.subf %116, %115 : vector<1x128xf32>
    %cst_42 = arith.constant 9.99999995E+11 : f32
    %118 = vector.broadcast %cst_42 : f32 to vector<1x128xf32>
    %119 = arith.mulf %117, %118 : vector<1x128xf32>
    %120 = arith.subf %92, %119 : vector<1x128xf32>
    %121 = vector.extract_strided_slice %2 {offsets = [4, 0], sizes = [1, 128], strides = [1, 1]} : vector<8x128xf32> to vector<1x128xf32>
    %cst_43 = arith.constant 1.000000e+00 : f32
    %122 = vector.broadcast %cst_43 : f32 to vector<1x128xf32>
    %123 = arith.subf %122, %121 : vector<1x128xf32>
    %cst_44 = arith.constant 9.99999995E+11 : f32
    %124 = vector.broadcast %cst_44 : f32 to vector<1x128xf32>
    %125 = arith.mulf %123, %124 : vector<1x128xf32>
    %126 = arith.subf %93, %125 : vector<1x128xf32>
    %127 = vector.extract_strided_slice %2 {offsets = [5, 0], sizes = [1, 128], strides = [1, 1]} : vector<8x128xf32> to vector<1x128xf32>
    %cst_45 = arith.constant 1.000000e+00 : f32
    %128 = vector.broadcast %cst_45 : f32 to vector<1x128xf32>
    %129 = arith.subf %128, %127 : vector<1x128xf32>
    %cst_46 = arith.constant 9.99999995E+11 : f32
    %130 = vector.broadcast %cst_46 : f32 to vector<1x128xf32>
    %131 = arith.mulf %129, %130 : vector<1x128xf32>
    %132 = arith.subf %94, %131 : vector<1x128xf32>
    %133 = vector.extract_strided_slice %2 {offsets = [6, 0], sizes = [1, 128], strides = [1, 1]} : vector<8x128xf32> to vector<1x128xf32>
    %cst_47 = arith.constant 1.000000e+00 : f32
    %134 = vector.broadcast %cst_47 : f32 to vector<1x128xf32>
    %135 = arith.subf %134, %133 : vector<1x128xf32>
    %cst_48 = arith.constant 9.99999995E+11 : f32
    %136 = vector.broadcast %cst_48 : f32 to vector<1x128xf32>
    %137 = arith.mulf %135, %136 : vector<1x128xf32>
    %138 = arith.subf %95, %137 : vector<1x128xf32>
    %139 = vector.extract_strided_slice %2 {offsets = [7, 0], sizes = [1, 128], strides = [1, 1]} : vector<8x128xf32> to vector<1x128xf32>
    %cst_49 = arith.constant 1.000000e+00 : f32
    %140 = vector.broadcast %cst_49 : f32 to vector<1x128xf32>
    %141 = arith.subf %140, %139 : vector<1x128xf32>
    %cst_50 = arith.constant 9.99999995E+11 : f32
    %142 = vector.broadcast %cst_50 : f32 to vector<1x128xf32>
    %143 = arith.mulf %141, %142 : vector<1x128xf32>
    %144 = arith.subf %96, %143 : vector<1x128xf32>
    %145 = arith.maximumf %102, %108 : vector<1x128xf32>
    %146 = arith.maximumf %145, %114 : vector<1x128xf32>
    %147 = arith.maximumf %146, %120 : vector<1x128xf32>
    %148 = arith.maximumf %147, %126 : vector<1x128xf32>
    %149 = arith.maximumf %148, %132 : vector<1x128xf32>
    %150 = arith.maximumf %149, %138 : vector<1x128xf32>
    %151 = arith.maximumf %150, %144 : vector<1x128xf32>
    %152 = arith.subf %102, %151 : vector<1x128xf32>
    %153 = math.exp %152 : vector<1x128xf32>
    %154 = arith.subf %108, %151 : vector<1x128xf32>
    %155 = math.exp %154 : vector<1x128xf32>
    %156 = arith.subf %114, %151 : vector<1x128xf32>
    %157 = math.exp %156 : vector<1x128xf32>
    %158 = arith.subf %120, %151 : vector<1x128xf32>
    %159 = math.exp %158 : vector<1x128xf32>
    %160 = arith.subf %126, %151 : vector<1x128xf32>
    %161 = math.exp %160 : vector<1x128xf32>
    %162 = arith.subf %132, %151 : vector<1x128xf32>
    %163 = math.exp %162 : vector<1x128xf32>
    %164 = arith.subf %138, %151 : vector<1x128xf32>
    %165 = math.exp %164 : vector<1x128xf32>
    %166 = arith.subf %144, %151 : vector<1x128xf32>
    %167 = math.exp %166 : vector<1x128xf32>
    %168 = arith.addf %153, %155 : vector<1x128xf32>
    %169 = arith.addf %168, %157 : vector<1x128xf32>
    %170 = arith.addf %169, %159 : vector<1x128xf32>
    %171 = arith.addf %170, %161 : vector<1x128xf32>
    %172 = arith.addf %171, %163 : vector<1x128xf32>
    %173 = arith.addf %172, %165 : vector<1x128xf32>
    %174 = arith.addf %173, %167 : vector<1x128xf32>
    %175 = tpu.reciprocal %174 {approx = true} : vector<1x128xf32> -> vector<1x128xf32>
    %176 = arith.mulf %153, %175 : vector<1x128xf32>
    %177 = vector.extract_strided_slice %83 {offsets = [0, 0], sizes = [8, 128], strides = [1, 1]} : vector<8x1024xf32> to vector<8x128xf32>
    %178 = vector.broadcast %176 : vector<1x128xf32> to vector<8x128xf32>
    %179 = arith.mulf %178, %177 : vector<8x128xf32>
    %180 = arith.mulf %155, %175 : vector<1x128xf32>
    %181 = vector.extract_strided_slice %83 {offsets = [0, 128], sizes = [8, 128], strides = [1, 1]} : vector<8x1024xf32> to vector<8x128xf32>
    %182 = vector.broadcast %180 : vector<1x128xf32> to vector<8x128xf32>
    %183 = arith.mulf %182, %181 : vector<8x128xf32>
    %184 = arith.addf %179, %183 : vector<8x128xf32>
    %185 = arith.mulf %157, %175 : vector<1x128xf32>
    %186 = vector.extract_strided_slice %83 {offsets = [0, 256], sizes = [8, 128], strides = [1, 1]} : vector<8x1024xf32> to vector<8x128xf32>
    %187 = vector.broadcast %185 : vector<1x128xf32> to vector<8x128xf32>
    %188 = arith.mulf %187, %186 : vector<8x128xf32>
    %189 = arith.addf %184, %188 : vector<8x128xf32>
    %190 = arith.mulf %159, %175 : vector<1x128xf32>
    %191 = vector.extract_strided_slice %83 {offsets = [0, 384], sizes = [8, 128], strides = [1, 1]} : vector<8x1024xf32> to vector<8x128xf32>
    %192 = vector.broadcast %190 : vector<1x128xf32> to vector<8x128xf32>
    %193 = arith.mulf %192, %191 : vector<8x128xf32>
    %194 = arith.addf %189, %193 : vector<8x128xf32>
    %195 = arith.mulf %161, %175 : vector<1x128xf32>
    %196 = vector.extract_strided_slice %83 {offsets = [0, 512], sizes = [8, 128], strides = [1, 1]} : vector<8x1024xf32> to vector<8x128xf32>
    %197 = vector.broadcast %195 : vector<1x128xf32> to vector<8x128xf32>
    %198 = arith.mulf %197, %196 : vector<8x128xf32>
    %199 = arith.addf %194, %198 : vector<8x128xf32>
    %200 = arith.mulf %163, %175 : vector<1x128xf32>
    %201 = vector.extract_strided_slice %83 {offsets = [0, 640], sizes = [8, 128], strides = [1, 1]} : vector<8x1024xf32> to vector<8x128xf32>
    %202 = vector.broadcast %200 : vector<1x128xf32> to vector<8x128xf32>
    %203 = arith.mulf %202, %201 : vector<8x128xf32>
    %204 = arith.addf %199, %203 : vector<8x128xf32>
    %205 = arith.mulf %165, %175 : vector<1x128xf32>
    %206 = vector.extract_strided_slice %83 {offsets = [0, 768], sizes = [8, 128], strides = [1, 1]} : vector<8x1024xf32> to vector<8x128xf32>
    %207 = vector.broadcast %205 : vector<1x128xf32> to vector<8x128xf32>
    %208 = arith.mulf %207, %206 : vector<8x128xf32>
    %209 = arith.addf %204, %208 : vector<8x128xf32>
    %210 = arith.mulf %167, %175 : vector<1x128xf32>
    %211 = vector.extract_strided_slice %83 {offsets = [0, 896], sizes = [8, 128], strides = [1, 1]} : vector<8x1024xf32> to vector<8x128xf32>
    %212 = vector.broadcast %210 : vector<1x128xf32> to vector<8x128xf32>
    %213 = arith.mulf %212, %211 : vector<8x128xf32>
    %214 = arith.addf %209, %213 : vector<8x128xf32>
    %c1 = arith.constant 1 : index
    %c0_51 = arith.constant 0 : index
    %c0_52 = arith.constant 0 : index
    %215 = vector.load %arg8[%c1, %c0_51, %c0_52] : memref<3x24x8xf32, #tpu.memory_space<vmem>>, vector<1x24x8xf32>
    %216 = vector.shape_cast %215 : vector<1x24x8xf32> to vector<24x8xf32>
    %217 = vector.extract_strided_slice %45 {offsets = [0, 0, 0], sizes = [1, 8, 128], strides = [1, 1, 1]} : vector<5x8x128xf32> to vector<1x8x128xf32>
    %218 = vector.shape_cast %217 : vector<1x8x128xf32> to vector<8x128xf32>
    %219 = vector.extract_strided_slice %45 {offsets = [1, 0, 0], sizes = [1, 8, 128], strides = [1, 1, 1]} : vector<5x8x128xf32> to vector<1x8x128xf32>
    %220 = vector.shape_cast %219 : vector<1x8x128xf32> to vector<8x128xf32>
    %221 = vector.extract_strided_slice %45 {offsets = [2, 0, 0], sizes = [1, 8, 128], strides = [1, 1, 1]} : vector<5x8x128xf32> to vector<1x8x128xf32>
    %222 = vector.shape_cast %221 : vector<1x8x128xf32> to vector<8x128xf32>
    %223 = vector.extract_strided_slice %45 {offsets = [3, 0, 0], sizes = [1, 8, 128], strides = [1, 1, 1]} : vector<5x8x128xf32> to vector<1x8x128xf32>
    %224 = vector.shape_cast %223 : vector<1x8x128xf32> to vector<8x128xf32>
    %225 = vector.extract_strided_slice %45 {offsets = [4, 0, 0], sizes = [1, 8, 128], strides = [1, 1, 1]} : vector<5x8x128xf32> to vector<1x8x128xf32>
    %226 = vector.shape_cast %225 : vector<1x8x128xf32> to vector<8x128xf32>
    %227 = tpu.concatenate %218, %220, %222, %224, %226 in 1 : vector<8x128xf32>, vector<8x128xf32>, vector<8x128xf32>, vector<8x128xf32>, vector<8x128xf32> -> vector<8x640xf32>
    %cst_53 = arith.constant dense<0.000000e+00> : vector<24x640xf32>
    %228 = tpu.matmul %216, %227, %cst_53 {dimension_numbers = #tpu.dot_dimension_numbers<[1], [0], [0], [1], [0, 0, 1, 1], [], []>} : vector<24x8xf32>, vector<8x640xf32>, vector<24x640xf32> -> vector<24x640xf32>
    %229 = vector.extract_strided_slice %228 {offsets = [0, 0], sizes = [8, 640], strides = [1, 1]} : vector<24x640xf32> to vector<8x640xf32>
    %230 = vector.extract_strided_slice %228 {offsets = [8, 0], sizes = [8, 640], strides = [1, 1]} : vector<24x640xf32> to vector<8x640xf32>
    %231 = vector.extract_strided_slice %228 {offsets = [16, 0], sizes = [8, 640], strides = [1, 1]} : vector<24x640xf32> to vector<8x640xf32>
    %232 = arith.mulf %229, %230 : vector<8x640xf32>
    %cst_54 = arith.constant dense<0.000000e+00> : vector<640xf32>
    %233 = vector.multi_reduction <add>, %232, %cst_54 [0] : vector<8x640xf32> to vector<640xf32>
    %234 = vector.shape_cast %233 : vector<640xf32> to vector<1x640xf32>
    %cst_55 = arith.constant 0.353553385 : f32
    %235 = vector.broadcast %cst_55 : f32 to vector<1x640xf32>
    %236 = arith.mulf %234, %235 : vector<1x640xf32>
    %237 = vector.extract_strided_slice %236 {offsets = [0, 0], sizes = [1, 128], strides = [1, 1]} : vector<1x640xf32> to vector<1x128xf32>
    %238 = vector.extract_strided_slice %236 {offsets = [0, 128], sizes = [1, 128], strides = [1, 1]} : vector<1x640xf32> to vector<1x128xf32>
    %239 = vector.extract_strided_slice %236 {offsets = [0, 256], sizes = [1, 128], strides = [1, 1]} : vector<1x640xf32> to vector<1x128xf32>
    %240 = vector.extract_strided_slice %236 {offsets = [0, 384], sizes = [1, 128], strides = [1, 1]} : vector<1x640xf32> to vector<1x128xf32>
    %241 = vector.extract_strided_slice %236 {offsets = [0, 512], sizes = [1, 128], strides = [1, 1]} : vector<1x640xf32> to vector<1x128xf32>
    %242 = arith.maximumf %237, %238 : vector<1x128xf32>
    %243 = arith.maximumf %242, %239 : vector<1x128xf32>
    %244 = arith.maximumf %243, %240 : vector<1x128xf32>
    %245 = arith.maximumf %244, %241 : vector<1x128xf32>
    %246 = arith.subf %237, %245 : vector<1x128xf32>
    %247 = math.exp %246 : vector<1x128xf32>
    %248 = arith.subf %238, %245 : vector<1x128xf32>
    %249 = math.exp %248 : vector<1x128xf32>
    %250 = arith.subf %239, %245 : vector<1x128xf32>
    %251 = math.exp %250 : vector<1x128xf32>
    %252 = arith.subf %240, %245 : vector<1x128xf32>
    %253 = math.exp %252 : vector<1x128xf32>
    %254 = arith.subf %241, %245 : vector<1x128xf32>
    %255 = math.exp %254 : vector<1x128xf32>
    %256 = arith.addf %247, %249 : vector<1x128xf32>
    %257 = arith.addf %256, %251 : vector<1x128xf32>
    %258 = arith.addf %257, %253 : vector<1x128xf32>
    %259 = arith.addf %258, %255 : vector<1x128xf32>
    %260 = tpu.reciprocal %259 {approx = true} : vector<1x128xf32> -> vector<1x128xf32>
    %261 = arith.mulf %247, %260 : vector<1x128xf32>
    %262 = vector.extract_strided_slice %231 {offsets = [0, 0], sizes = [8, 128], strides = [1, 1]} : vector<8x640xf32> to vector<8x128xf32>
    %263 = vector.broadcast %261 : vector<1x128xf32> to vector<8x128xf32>
    %264 = arith.mulf %263, %262 : vector<8x128xf32>
    %265 = arith.mulf %249, %260 : vector<1x128xf32>
    %266 = vector.extract_strided_slice %231 {offsets = [0, 128], sizes = [8, 128], strides = [1, 1]} : vector<8x640xf32> to vector<8x128xf32>
    %267 = vector.broadcast %265 : vector<1x128xf32> to vector<8x128xf32>
    %268 = arith.mulf %267, %266 : vector<8x128xf32>
    %269 = arith.addf %264, %268 : vector<8x128xf32>
    %270 = arith.mulf %251, %260 : vector<1x128xf32>
    %271 = vector.extract_strided_slice %231 {offsets = [0, 256], sizes = [8, 128], strides = [1, 1]} : vector<8x640xf32> to vector<8x128xf32>
    %272 = vector.broadcast %270 : vector<1x128xf32> to vector<8x128xf32>
    %273 = arith.mulf %272, %271 : vector<8x128xf32>
    %274 = arith.addf %269, %273 : vector<8x128xf32>
    %275 = arith.mulf %253, %260 : vector<1x128xf32>
    %276 = vector.extract_strided_slice %231 {offsets = [0, 384], sizes = [8, 128], strides = [1, 1]} : vector<8x640xf32> to vector<8x128xf32>
    %277 = vector.broadcast %275 : vector<1x128xf32> to vector<8x128xf32>
    %278 = arith.mulf %277, %276 : vector<8x128xf32>
    %279 = arith.addf %274, %278 : vector<8x128xf32>
    %280 = arith.mulf %255, %260 : vector<1x128xf32>
    %281 = vector.extract_strided_slice %231 {offsets = [0, 512], sizes = [8, 128], strides = [1, 1]} : vector<8x640xf32> to vector<8x128xf32>
    %282 = vector.broadcast %280 : vector<1x128xf32> to vector<8x128xf32>
    %283 = arith.mulf %282, %281 : vector<8x128xf32>
    %284 = arith.addf %279, %283 : vector<8x128xf32>
    %c2 = arith.constant 2 : index
    %c0_56 = arith.constant 0 : index
    %c0_57 = arith.constant 0 : index
    %285 = vector.load %arg8[%c2, %c0_56, %c0_57] : memref<3x24x8xf32, #tpu.memory_space<vmem>>, vector<1x24x8xf32>
    %286 = vector.shape_cast %285 : vector<1x24x8xf32> to vector<24x8xf32>
    %287 = vector.extract_strided_slice %53 {offsets = [0, 0, 0], sizes = [1, 8, 128], strides = [1, 1, 1]} : vector<2x8x128xf32> to vector<1x8x128xf32>
    %288 = vector.shape_cast %287 : vector<1x8x128xf32> to vector<8x128xf32>
    %289 = vector.extract_strided_slice %53 {offsets = [1, 0, 0], sizes = [1, 8, 128], strides = [1, 1, 1]} : vector<2x8x128xf32> to vector<1x8x128xf32>
    %290 = vector.shape_cast %289 : vector<1x8x128xf32> to vector<8x128xf32>
    %291 = tpu.concatenate %288, %290 in 1 : vector<8x128xf32>, vector<8x128xf32> -> vector<8x256xf32>
    %cst_58 = arith.constant dense<0.000000e+00> : vector<24x256xf32>
    %292 = tpu.matmul %286, %291, %cst_58 {dimension_numbers = #tpu.dot_dimension_numbers<[1], [0], [0], [1], [0, 0, 1, 1], [], []>} : vector<24x8xf32>, vector<8x256xf32>, vector<24x256xf32> -> vector<24x256xf32>
    %293 = vector.extract_strided_slice %292 {offsets = [0, 0], sizes = [8, 256], strides = [1, 1]} : vector<24x256xf32> to vector<8x256xf32>
    %294 = vector.extract_strided_slice %292 {offsets = [8, 0], sizes = [8, 256], strides = [1, 1]} : vector<24x256xf32> to vector<8x256xf32>
    %295 = vector.extract_strided_slice %292 {offsets = [16, 0], sizes = [8, 256], strides = [1, 1]} : vector<24x256xf32> to vector<8x256xf32>
    %296 = arith.mulf %293, %294 : vector<8x256xf32>
    %cst_59 = arith.constant dense<0.000000e+00> : vector<256xf32>
    %297 = vector.multi_reduction <add>, %296, %cst_59 [0] : vector<8x256xf32> to vector<256xf32>
    %298 = vector.shape_cast %297 : vector<256xf32> to vector<1x256xf32>
    %cst_60 = arith.constant 0.353553385 : f32
    %299 = vector.broadcast %cst_60 : f32 to vector<1x256xf32>
    %300 = arith.mulf %298, %299 : vector<1x256xf32>
    %301 = vector.extract_strided_slice %300 {offsets = [0, 0], sizes = [1, 128], strides = [1, 1]} : vector<1x256xf32> to vector<1x128xf32>
    %302 = vector.extract_strided_slice %300 {offsets = [0, 128], sizes = [1, 128], strides = [1, 1]} : vector<1x256xf32> to vector<1x128xf32>
    %303 = vector.extract_strided_slice %60 {offsets = [0, 0], sizes = [1, 128], strides = [1, 1]} : vector<2x128xf32> to vector<1x128xf32>
    %cst_61 = arith.constant 1.000000e+00 : f32
    %304 = vector.broadcast %cst_61 : f32 to vector<1x128xf32>
    %305 = arith.subf %304, %303 : vector<1x128xf32>
    %cst_62 = arith.constant 9.99999995E+11 : f32
    %306 = vector.broadcast %cst_62 : f32 to vector<1x128xf32>
    %307 = arith.mulf %305, %306 : vector<1x128xf32>
    %308 = arith.subf %301, %307 : vector<1x128xf32>
    %309 = vector.extract_strided_slice %60 {offsets = [1, 0], sizes = [1, 128], strides = [1, 1]} : vector<2x128xf32> to vector<1x128xf32>
    %cst_63 = arith.constant 1.000000e+00 : f32
    %310 = vector.broadcast %cst_63 : f32 to vector<1x128xf32>
    %311 = arith.subf %310, %309 : vector<1x128xf32>
    %cst_64 = arith.constant 9.99999995E+11 : f32
    %312 = vector.broadcast %cst_64 : f32 to vector<1x128xf32>
    %313 = arith.mulf %311, %312 : vector<1x128xf32>
    %314 = arith.subf %302, %313 : vector<1x128xf32>
    %315 = arith.maximumf %308, %314 : vector<1x128xf32>
    %316 = arith.subf %308, %315 : vector<1x128xf32>
    %317 = math.exp %316 : vector<1x128xf32>
    %318 = arith.subf %314, %315 : vector<1x128xf32>
    %319 = math.exp %318 : vector<1x128xf32>
    %320 = arith.addf %317, %319 : vector<1x128xf32>
    %321 = tpu.reciprocal %320 {approx = true} : vector<1x128xf32> -> vector<1x128xf32>
    %322 = arith.mulf %317, %321 : vector<1x128xf32>
    %323 = vector.extract_strided_slice %295 {offsets = [0, 0], sizes = [8, 128], strides = [1, 1]} : vector<8x256xf32> to vector<8x128xf32>
    %324 = vector.broadcast %322 : vector<1x128xf32> to vector<8x128xf32>
    %325 = arith.mulf %324, %323 : vector<8x128xf32>
    %326 = arith.mulf %319, %321 : vector<1x128xf32>
    %327 = vector.extract_strided_slice %295 {offsets = [0, 128], sizes = [8, 128], strides = [1, 1]} : vector<8x256xf32> to vector<8x128xf32>
    %328 = vector.broadcast %326 : vector<1x128xf32> to vector<8x128xf32>
    %329 = arith.mulf %328, %327 : vector<8x128xf32>
    %330 = arith.addf %325, %329 : vector<8x128xf32>
    %331 = tpu.concatenate %214, %284, %330 in 0 : vector<8x128xf32>, vector<8x128xf32>, vector<8x128xf32> -> vector<24x128xf32>
    %c0_65 = arith.constant 0 : index
    %c0_66 = arith.constant 0 : index
    %332 = vector.load %arg9[%c0_65, %c0_66] : memref<16x24xf32, #tpu.memory_space<vmem>>, vector<16x24xf32>
    %cst_67 = arith.constant dense<0.000000e+00> : vector<16x128xf32>
    %333 = tpu.matmul %332, %331, %cst_67 {dimension_numbers = #tpu.dot_dimension_numbers<[1], [0], [0], [1], [0, 0, 1, 1], [], []>} : vector<16x24xf32>, vector<24x128xf32>, vector<16x128xf32> -> vector<16x128xf32>
    %c0_68 = arith.constant 0 : index
    %c0_69 = arith.constant 0 : index
    %334 = vector.load %arg10[%c0_68, %c0_69] : memref<16x1xf32, #tpu.memory_space<vmem>>, vector<16x1xf32>
    %335 = vector.broadcast %334 : vector<16x1xf32> to vector<16x128xf32>
    %336 = arith.addf %333, %335 : vector<16x128xf32>
    %cst_70 = arith.constant 0.000000e+00 : f32
    %337 = vector.broadcast %cst_70 : f32 to vector<16x128xf32>
    %338 = arith.maximumf %336, %337 : vector<16x128xf32>
    %c0_71 = arith.constant 0 : index
    %c0_72 = arith.constant 0 : index
    %339 = vector.load %arg11[%c0_71, %c0_72] : memref<8x16xf32, #tpu.memory_space<vmem>>, vector<8x16xf32>
    %cst_73 = arith.constant dense<0.000000e+00> : vector<8x128xf32>
    %340 = tpu.matmul %339, %338, %cst_73 {dimension_numbers = #tpu.dot_dimension_numbers<[1], [0], [0], [1], [0, 0, 1, 1], [], []>} : vector<8x16xf32>, vector<16x128xf32>, vector<8x128xf32> -> vector<8x128xf32>
    %c0_74 = arith.constant 0 : index
    %c0_75 = arith.constant 0 : index
    %341 = vector.load %arg12[%c0_74, %c0_75] : memref<8x1xf32, #tpu.memory_space<vmem>>, vector<8x1xf32>
    %342 = vector.broadcast %341 : vector<8x1xf32> to vector<8x128xf32>
    %343 = arith.addf %340, %342 : vector<8x128xf32>
    %cst_76 = arith.constant 0.000000e+00 : f32
    %344 = vector.broadcast %cst_76 : f32 to vector<8x128xf32>
    %345 = arith.maximumf %343, %344 : vector<8x128xf32>
    %c0_77 = arith.constant 0 : index
    %c0_78 = arith.constant 0 : index
    %346 = vector.load %arg13[%c0_77, %c0_78] : memref<1x8xf32, #tpu.memory_space<vmem>>, vector<1x8xf32>
    %cst_79 = arith.constant dense<0.000000e+00> : vector<1x128xf32>
    %347 = tpu.matmul %346, %345, %cst_79 {dimension_numbers = #tpu.dot_dimension_numbers<[1], [0], [0], [1], [0, 0, 1, 1], [], []>} : vector<1x8xf32>, vector<8x128xf32>, vector<1x128xf32> -> vector<1x128xf32>
    %c0_80 = arith.constant 0 : index
    %c0_81 = arith.constant 0 : index
    %348 = vector.load %arg14[%c0_80, %c0_81] : memref<1x1xf32, #tpu.memory_space<vmem>>, vector<1x1xf32>
    %349 = vector.broadcast %348 : vector<1x1xf32> to vector<1x128xf32>
    %350 = arith.addf %347, %349 : vector<1x128xf32>
    %c0_82 = arith.constant 0 : index
    %c0_83 = arith.constant 0 : index
    %c0_84 = arith.constant 0 : index
    %351 = vector.load %arg5[%c0_82, %c0_83, %c0_84] : memref<8x4x128xf32, #tpu.memory_space<vmem>>, vector<8x4x128xf32>
    %352 = arith.mulf %351, %1 : vector<8x4x128xf32>
    %cst_85 = arith.constant dense<0.000000e+00> : vector<4x128xf32>
    %353 = vector.multi_reduction <add>, %352, %cst_85 [0] : vector<8x4x128xf32> to vector<4x128xf32>
    %cst_86 = arith.constant dense<0.000000e+00> : vector<128xf32>
    %354 = vector.multi_reduction <add>, %353, %cst_86 [0] : vector<4x128xf32> to vector<128xf32>
    %355 = vector.shape_cast %354 : vector<128xf32> to vector<1x128xf32>
    %356 = arith.addf %350, %355 : vector<1x128xf32>
    %c0_87 = arith.constant 0 : index
    %c0_88 = arith.constant 0 : index
    %357 = vector.load %arg15[%c0_87, %c0_88] : memref<1x1xf32, #tpu.memory_space<vmem>>, vector<1x1xf32>
    %358 = vector.broadcast %357 : vector<1x1xf32> to vector<1x128xf32>
    %359 = arith.addf %356, %358 : vector<1x128xf32>
    %360 = arith.negf %359 : vector<1x128xf32>
    %361 = math.exp %360 : vector<1x128xf32>
    %cst_89 = arith.constant 1.000000e+00 : f32
    %362 = vector.broadcast %cst_89 : f32 to vector<1x128xf32>
    %363 = arith.addf %362, %361 : vector<1x128xf32>
    %364 = arith.divf %362, %363 : vector<1x128xf32>
    %365 = vector.shape_cast %364 : vector<1x128xf32> to vector<1x128xf32>
    %366 = vector.broadcast %365 : vector<1x128xf32> to vector<8x128xf32>
    %c0_90 = arith.constant 0 : index
    %c0_91 = arith.constant 0 : index
    %367 = vector.load %arg16[%c0_90, %c0_91] : memref<8x128xf32, #tpu.memory_space<vmem>>, vector<8x128xf32>
    tpu.vector_store %arg16[%c0_90, %c0_91], %366 {strides = array<i32>} : memref<8x128xf32, #tpu.memory_space<vmem>>, vector<8x128xf32>,
    return
  }
  func.func @transform_0(%arg0: i32) -> (i32, i32, i32, i32) {
    %c0_i32 = arith.constant 0 : i32
    %c0_i32_0 = arith.constant 0 : i32
    %c0_i32_1 = arith.constant 0 : i32
    %c0_i32_2 = arith.constant 0 : i32
    return %c0_i32, %c0_i32_0, %c0_i32_1, %arg0 : i32, i32, i32, i32
  }
  func.func @transform_1(%arg0: i32) -> (i32, i32, i32) {
    %c0_i32 = arith.constant 0 : i32
    %c0_i32_0 = arith.constant 0 : i32
    %c0_i32_1 = arith.constant 0 : i32
    return %c0_i32, %c0_i32_0, %arg0 : i32, i32, i32
  }
  func.func @transform_2(%arg0: i32) -> (i32, i32) {
    %c0_i32 = arith.constant 0 : i32
    %c0_i32_0 = arith.constant 0 : i32
    return %c0_i32, %arg0 : i32, i32
  }
  func.func @transform_3(%arg0: i32) -> (i32, i32) {
    %c0_i32 = arith.constant 0 : i32
    %c0_i32_0 = arith.constant 0 : i32
    return %c0_i32, %arg0 : i32, i32
  }
  func.func @transform_4(%arg0: i32) -> (i32, i32, i32) {
    %c0_i32 = arith.constant 0 : i32
    %c0_i32_0 = arith.constant 0 : i32
    %c0_i32_1 = arith.constant 0 : i32
    return %c0_i32, %c0_i32_0, %arg0 : i32, i32, i32
  }
  func.func @transform_5(%arg0: i32) -> (i32, i32) {
    %c0_i32 = arith.constant 0 : i32
    %c0_i32_0 = arith.constant 0 : i32
    %c0_i32_1 = arith.constant 0 : i32
    return %c0_i32, %c0_i32_0 : i32, i32
  }
  func.func @transform_6(%arg0: i32) -> (i32, i32) {
    %c0_i32 = arith.constant 0 : i32
    %c0_i32_0 = arith.constant 0 : i32
    %c0_i32_1 = arith.constant 0 : i32
    return %c0_i32, %c0_i32_0 : i32, i32
  }
  func.func @transform_7(%arg0: i32) -> (i32, i32, i32) {
    %c0_i32 = arith.constant 0 : i32
    %c0_i32_0 = arith.constant 0 : i32
    %c0_i32_1 = arith.constant 0 : i32
    %c0_i32_2 = arith.constant 0 : i32
    return %c0_i32, %c0_i32_0, %c0_i32_1 : i32, i32, i32
  }
  func.func @transform_8(%arg0: i32) -> (i32, i32) {
    %c0_i32 = arith.constant 0 : i32
    %c0_i32_0 = arith.constant 0 : i32
    %c0_i32_1 = arith.constant 0 : i32
    return %c0_i32, %c0_i32_0 : i32, i32
  }
  func.func @transform_9(%arg0: i32) -> (i32, i32) {
    %c0_i32 = arith.constant 0 : i32
    %c0_i32_0 = arith.constant 0 : i32
    %c0_i32_1 = arith.constant 0 : i32
    return %c0_i32, %c0_i32_0 : i32, i32
  }
  func.func @transform_10(%arg0: i32) -> (i32, i32) {
    %c0_i32 = arith.constant 0 : i32
    %c0_i32_0 = arith.constant 0 : i32
    %c0_i32_1 = arith.constant 0 : i32
    return %c0_i32, %c0_i32_0 : i32, i32
  }
  func.func @transform_11(%arg0: i32) -> (i32, i32) {
    %c0_i32 = arith.constant 0 : i32
    %c0_i32_0 = arith.constant 0 : i32
    %c0_i32_1 = arith.constant 0 : i32
    return %c0_i32, %c0_i32_0 : i32, i32
  }
  func.func @transform_12(%arg0: i32) -> (i32, i32) {
    %c0_i32 = arith.constant 0 : i32
    %c0_i32_0 = arith.constant 0 : i32
    %c0_i32_1 = arith.constant 0 : i32
    return %c0_i32, %c0_i32_0 : i32, i32
  }
  func.func @transform_13(%arg0: i32) -> (i32, i32) {
    %c0_i32 = arith.constant 0 : i32
    %c0_i32_0 = arith.constant 0 : i32
    %c0_i32_1 = arith.constant 0 : i32
    return %c0_i32, %c0_i32_0 : i32, i32
  }
  func.func @transform_14(%arg0: i32) -> (i32, i32) {
    %c0_i32 = arith.constant 0 : i32
    %c0_i32_0 = arith.constant 0 : i32
    %c0_i32_1 = arith.constant 0 : i32
    return %c0_i32, %c0_i32_0 : i32, i32
  }
  func.func @transform_15(%arg0: i32) -> (i32, i32) {
    %c0_i32 = arith.constant 0 : i32
    %c0_i32_0 = arith.constant 0 : i32
    return %c0_i32, %arg0 : i32, i32
  }
}

</mosaic_0001>

<bundles_post_ra>
// kernel: tpu_custom_call.1
= control target key start
LH: loop header
LB: loop body
LE: loop exit
PB: predicated region body
PF: predicated region fallthrough
CT: control target
= control target key end

     0   :  { %s5367_s0 = inlined_call_operand.hbm [shape: f32[8,4,8,128], index: 0, kind: input, shape index: {}]   ;;  %s5368_s1 = inlined_call_operand.vmem [shape: f32[8,4,128], index: 1, kind: input, shape index: {}]   ;;  %s5369_s2 = inlined_call_operand.vmem [shape: f32[8,128], index: 2, kind: input, shape index: {}]   ;;  %s5370_s3 = inlined_call_operand.vmem [shape: f32[8,128], index: 3, kind: input, shape index: {}]   ;;  %s5371_s4 = inlined_call_operand.vmem [shape: f32[8,4,128], index: 4, kind: input, shape index: {}]   ;;  %s5372_s5 = inlined_call_operand.vmem [shape: f32[8,1], index: 5, kind: input, shape index: {}]   ;;  %s5373_s6 = inlined_call_operand.vmem [shape: f32[8,1], index: 6, kind: input, shape index: {}]   ;;  %s5374_s7 = inlined_call_operand.vmem [shape: f32[3,24,8], index: 7, kind: input, shape index: {}]   ;;  %s5375_s8 = inlined_call_operand.vmem [shape: f32[16,24], index: 8, kind: input, shape index: {}]   ;;  %s5376_s9 = inlined_call_operand.vmem [shape: f32[16,1], index: 9, kind: input, shape index: {}]   ;;  %s5377_s10 = inlined_call_operand.vmem [shape: f32[8,16], index: 10, kind: input, shape index: {}]   ;;  %s5378_s11 = inlined_call_operand.vmem [shape: f32[8,1], index: 11, kind: input, shape index: {}]   ;;  %s5379_s12 = inlined_call_operand.vmem [shape: f32[1,8], index: 12, kind: input, shape index: {}]   ;;  %s5380_s13 = inlined_call_operand.<no memory space> [shape: f32[1,1], index: 13, kind: input, shape index: {}]   ;;  %s5381_s15 = inlined_call_operand.hbm [shape: f32[8,128], index: 15, kind: output, shape index: {}]   ;;  %s5382_s14 = inlined_call_operand.<no memory space> [shape: f32[1,1], index: 14, kind: input, shape index: {}]  }
   0x1   :  { %v20_v0 = vstv %s5380_s13  ;;  %v22_v1 = vstv %s5382_s14 }
   0x2   :  { %21 = vst [vmem:[#allocation2] sm:$0x1] %v20_v0  ;;  %23 = vst [vmem:[#allocation3] sm:$0x1] %v22_v1 }
   0x3   :  { %24 = vsyncpa [#allocation5], 0 }
   0x4   :  { %25 = vsyncpa [#allocation6], 0  ;;  %s3427_s22 = smov [#allocation4]   ;;  %s3379_s26 = scalar_lea.hbm %s5367_s0, 4096 }
   0x5   :  { %s31_s23 = sshll.u32 %s3427_s22, 4  ;;  %p3380_p0 = scmp.ne.s32.totalorder %s5367_s0, %s3379_s26  ;;  %s32_s23 = int_to_ptr.vmem [resolvable:$true] %s31_s23 }
   0x6   :  { %p3383_p1 = scmp.lt.u32.totalorder %s3379_s26, %s5367_s0 }
   0x8   :  { %p3385_p2 = pnand %p3383_p1, %p3380_p0 }
   0xa   :  { %3388 = shalt.err (!%p3385_p2)
}
   0xb   :  { %s3389_s14 = scalar_lea.vmem %s32_s23, 4096  ;;  %p3394_p4 = scmp.lt.s32.totalorder %s32_s23, %s32_s23 }
   0xc   :  { %p3390_p3 = scmp.ne.s32.totalorder %s32_s23, %s3389_s14  ;;  %p3395_p5 = scmp.lt.s32.totalorder %s3389_s14, %s3389_s14 }
   0xe   :  { %p3396_p6 = por %p3395_p5, %p3394_p4 }
  0x10   :  { %p3397_p7 = pnand %p3396_p6, %p3390_p3 }
  0x12   :  { %3400 = shalt.err (!%p3397_p7)
}
  0x13   :  { %s3428_s30 = smov 128   ;;  %s3429_s16 = smov 8  }
  0x14   :  { %37 = dma.hbm_to_vmem [thread:$0]  %s5367_s0, 4096, %s32_s23, [#allocation5], %s3428_s30, %s3428_s30, %s3429_s16  }
  0x15   :  { %3423 = dma.done.wait [#allocation5], 4096  }
  0x16   :  { %3424 = vsyncadd [#allocation5], 4294963200  ;;  %v3430_v2 = vmov 0   ;;  %v553_v3 = vld [vmem:[%s5372_s5] sm:$0xff]  ;;  %v3431_v7 = vmov 1966171168   ;;  %v122_v9 = vlaneseq }
  0x17   :  { %3286 = vset.pattern.permute.xlu0 %v3430_v2  ;;  %3287 = vset.pattern.permute.xlu1 %v3430_v2  ;;  %v607_v4 = vld [vmem:[%s5373_s6] sm:$0xff]  ;;  %v120_v8 = vunpack.c.l.s4 %v3431_v7  ;;  %v3372_v17 = vld.sshfl [vmem:[%s5368_s1 + $0xc] sm:$0x33 pattern:$0x75316420]  ;;  %v75_v56 = vld [vmem:[#allocation4 + $0x30] sm:$0xff] }
  0x18   :  { %596 = vperm.xlu0 %3286, %v553_v3   ;;  %v2878_v5 = vld [vmem:[%s5378_s11] sm:$0xff]  ;;  %v3549_v11 = vshrl.u32 %v122_v9, 7  ;;  %v198_v24 = vcombine.high %v3372_v17, %v3372_v17  ;;  %v74_v38 = vld [vmem:[#allocation4 + $0x28] sm:$0xff] }
  0x19   :  { %v3082_v6 = vld [vmem:[#allocation3] sm:$0x1]  ;;  %v121_v10 = vunpack.c.0.s8 %v120_v8  ;;  %v3371_v15 = vld.sshfl [vmem:[%s5368_s1 + $0x4] sm:$0x33 pattern:$0x75316420] }
  0x1a   :  { %v110_v12 = vld [vmem:[%s5370_s3] sm:$0xff]  ;;  %v150_v19 = vcombine.high %v3371_v15, %v3371_v15  ;;  %v3570_v27 = vsub.s32 0, %v3549_v11  ;;  %v82_v57 = vld [vmem:[#allocation4 + $0x68] sm:$0xff] }
  0x1b   :  { %v3555_v13 = vsub.s32 %v121_v10, %v3549_v11  ;;  %v504_v14 = vcombine.high %v110_v12, %v110_v12  ;;  %v73_v37 = vld [vmem:[#allocation4 + $0x20] sm:$0xff] }
  0x1c   :  { %610 = vperm.xlu0 %3286, %v607_v4   ;;  %v81_v49 = vld [vmem:[#allocation4 + $0x60] sm:$0xff]  ;;  %v83_v4 = vld [vmem:[#allocation4 + $0x70] sm:$0xff] }
  0x1d   :  { %v518_v16 = vrot.slane %v504_v14, %v3555_v13  ;;  %v511_v18 = vrot.slane %v110_v12, %v3555_v13  ;;  %v157_v22 = vrot.slane %v3371_v15, %v3555_v13  ;;  %v164_v23 = vrot.slane %v150_v19, %v3555_v13  ;;  %v3373_v51 = vld.sshfl [vmem:[%s5368_s1] sm:$0x33 pattern:$0x75316420] }
  0x1e   :  { %v205_v30 = vrot.slane %v3372_v17, %v3555_v13  ;;  %v212_v34 = vrot.slane %v198_v24, %v3555_v13 }
  0x1f   :  { %v520_v20 = vcombine.high %v518_v16, %v518_v16  ;;  %v519_v21 = vcombine.high %v511_v18, %v511_v18  ;;  %v534_v25 = vrot.slane %v518_v16, %v3555_v13  ;;  %v527_v28 = vrot.slane %v511_v18, %v3555_v13 }
  0x20   :  { %2881 = vperm.xlu0 %3286, %v2878_v5   ;;  %v165_v31 = vcombine.high %v157_v22, %v157_v22  ;;  %v330_v32 = vrot.slane %v157_v22, %v3570_v27  ;;  %v334_v33 = vrot.slane %v164_v23, %v3570_v27  ;;  %v166_v41 = vcombine.high %v164_v23, %v164_v23 }
  0x21   :  { %v548_v26 = vrot.slane %v520_v20, %v3555_v13  ;;  %v541_v29 = vrot.slane %v519_v21, %v3555_v13  ;;  %v550_v35 = vcombine.high %v534_v25, %v534_v25  ;;  %v549_v39 = vcombine.high %v527_v28, %v527_v28 }
  0x22   :  { %v557_v42 = vrot.slane %v527_v28, %v3570_v27  ;;  %v213_v44 = vcombine.high %v205_v30, %v205_v30  ;;  %v362_v45 = vrot.slane %v205_v30, %v3570_v27  ;;  %v338_v46 = vrot.slane %v165_v31, %v3570_v27  ;;  %v84_v31 = vld [vmem:[#allocation4 + $0x78] sm:$0xff] }
  0x23   :  { %v552_v36 = vcombine.high %v548_v26, %v548_v26  ;;  %v551_v40 = vcombine.high %v541_v29, %v541_v29  ;;  %v561_v43 = vrot.slane %v541_v29, %v3570_v27  ;;  %v3582_v47 = vmul.f32 %v330_v32, %v73_v37 }
  0x24   :  { %3085 = vperm.xlu0 %3286, %v3082_v6   ;;  %v3584_v48 = vmul.f32 %v334_v33, %v74_v38  ;;  %v366_v50 = vrot.slane %v212_v34, %v3570_v27  ;;  %v573_v52 = vrot.slane %v534_v25, %v3570_v27  ;;  %v577_v53 = vrot.slane %v548_v26, %v3570_v27  ;;  %v76_v25 = vld [vmem:[#allocation4 + $0x38] sm:$0xff] }
  0x25   :  { %5448 = vst [vmem:[#allocation10_spill] sm:$0xff] %v3582_v47  ;;  %v581_v54 = vrot.slane %v550_v35, %v3570_v27  ;;  %v585_v55 = vrot.slane %v552_v36, %v3570_v27  ;;  %v565_v58 = vrot.slane %v549_v39, %v3570_v27  ;;  %v569_v59 = vrot.slane %v551_v40, %v3570_v27 }
  0x26   :  { %5449 = vst [vmem:[#allocation11_spill] sm:$0xff] %v3584_v48  ;;  %v342_v60 = vrot.slane %v166_v41, %v3570_v27  ;;  %v214_v62 = vcombine.high %v212_v34, %v212_v34  ;;  %v370_v63 = vrot.slane %v213_v44, %v3570_v27  ;;  %v3598_v0 = vmul.f32 %v362_v45, %v81_v49 }
  0x27   :  { %v3600_v1 = vmul.f32 %v338_v46, %v75_v56  ;;  %v3604_v2 = vmul.f32 %v3582_v47, %v3582_v47  ;;  %v3608_v3 = vmul.f32 %v3584_v48, %v3584_v48  ;;  %v3610_v5 = vmul.f32 %v366_v50, %v82_v57 }
  0x28   :  { %5450 = vst [vmem:[#allocation12_spill] sm:$0xff] %v3598_v0  ;;  %v374_v17 = vrot.slane %v214_v62, %v3570_v27  ;;  %v3613_v18 = vmul.f32 %v370_v63, %v83_v4  ;;  %v3617_v19 = vmul.f32 %v3598_v0, %v3598_v0  ;;  %v126_v20 = vcombine.high %v3373_v51, %v3373_v51 }
  0x29   :  { %5451 = vst [vmem:[#allocation13_spill] sm:$0xff] %v3600_v1  ;;  %5452 = vst [vmem:[#allocation14_spill] sm:$0xff] %v3608_v3  ;;  %v3639_v34 = vmul.f32 %v3610_v5, %v3610_v5  ;;  %v133_v35 = vrot.slane %v3373_v51, %v3555_v13  ;;  %v3642_v36 = vmul.f32 %v342_v60, %v76_v25 }
  0x2a   :  { %5453 = vst [vmem:[#allocation15_spill] sm:$0xff] %v3610_v5  ;;  %5454 = vst [vmem:[#allocation16_spill] sm:$0xff] %v3613_v18  ;;  %v3646_v37 = vmul.f32 %v3600_v1, %v3600_v1  ;;  %v1507_v38 = vadd.f32 %v3584_v48, %v3582_v47  ;;  %v1539_v41 = vadd.f32 %v3608_v3, %v3604_v2 }
  0x2b   :  { %5455 = vst [vmem:[#allocation17_spill] sm:$0xff] %v3617_v19  ;;  %5460 = vst [vmem:[#allocation22_spill] sm:$0xff] %v3639_v34  ;;  %v3657_v44 = vmul.f32 %v3613_v18, %v3613_v18  ;;  %v1513_v45 = vadd.f32 %v3610_v5, %v3598_v0  ;;  %v140_v46 = vrot.slane %v126_v20, %v3555_v13 }
  0x2c   :  { %5461 = vst [vmem:[#allocation23_spill] sm:$0xff] %v3642_v36  ;;  %v1545_v51 = vadd.f32 %v3639_v34, %v3617_v19  ;;  %v3667_v57 = vmul.f32 %v3642_v36, %v3642_v36 }
  0x2d   :  { %5463 = vst [vmem:[#allocation25_spill] sm:$0xff] %v3657_v44  ;;  %v1514_v63 = vadd.f32 %v1513_v45, %v3613_v18 }
  0x2e   :  { %5464 = vst [vmem:[#allocation26_spill] sm:$0xff] %v3667_v57  ;;  %v1546_v4 = vadd.f32 %v1545_v51, %v3657_v44 }
  0x97   :  { %v597_v61 = vpop.permute.xlu0 %596 }
  0x98   :  { %v603_v6 = vmul.f32 %v597_v61, %v573_v52  ;;  %v604_v7 = vmul.f32 %v597_v61, %v577_v53  ;;  %v605_v8 = vmul.f32 %v597_v61, %v581_v54  ;;  %v606_v9 = vmul.f32 %v597_v61, %v585_v55 }
  0x99   :  { %v599_v10 = vmul.f32 %v597_v61, %v557_v42  ;;  %v600_v12 = vmul.f32 %v597_v61, %v561_v43  ;;  %v601_v14 = vmul.f32 %v597_v61, %v565_v58  ;;  %v602_v15 = vmul.f32 %v597_v61, %v569_v59  ;;  %v69_v59 = vld [vmem:[#allocation4] sm:$0xff] }
  0x9a   :  { %v3652_v42 = vmul.f32 %v374_v17, %v84_v31  ;;  %v141_v52 = vcombine.high %v133_v35, %v133_v35  ;;  %v142_v53 = vcombine.high %v140_v46, %v140_v46  ;;  %v314_v54 = vrot.slane %v133_v35, %v3570_v27 }
  0x9b   :  { %v611_v16 = vpop.permute.xlu0 %610  ;;  %v1508_v58 = vadd.f32 %v1507_v38, %v3600_v1  ;;  %v1540_v61 = vadd.f32 %v1539_v41, %v3646_v37 }
  0x9c   :  { %v3619_v21 = vadd.f32 %v611_v16, %v599_v10  ;;  %v3621_v22 = vadd.f32 %v611_v16, %v600_v12  ;;  %v3623_v23 = vadd.f32 %v611_v16, %v601_v14  ;;  %v3625_v24 = vadd.f32 %v611_v16, %v602_v15  ;;  %5462 = vst [vmem:[#allocation24_spill] sm:$0xff] %v3652_v42  ;;  %v70_v12 = vld [vmem:[#allocation4 + $0x8] sm:$0xff]  ;;  %v71_v14 = vld [vmem:[#allocation4 + $0x10] sm:$0xff]  ;;  %v72_v15 = vld [vmem:[#allocation4 + $0x18] sm:$0xff] }
  0x9d   :  { %v3627_v26 = vadd.f32 %v611_v16, %v603_v6  ;;  %v3629_v28 = vadd.f32 %v611_v16, %v604_v7  ;;  %v3631_v29 = vadd.f32 %v611_v16, %v605_v8  ;;  %v3633_v30 = vadd.f32 %v611_v16, %v606_v9 }
  0x9e   :  { %v731_v32 = vand.u32 2139095040, %v3621_v22  ;;  %v939_v33 = vand.u32 2139095040, %v3625_v24  ;;  %v627_v43 = vand.u32 2139095040, %v3619_v21  ;;  %v3673_v62 = vmul.f32 %v3652_v42, %v3652_v42 }
  0x9f   :  { %5456 = vst [vmem:[#allocation18_spill] sm:$0xff] %v3627_v26  ;;  %5457 = vst [vmem:[#allocation19_spill] sm:$0xff] %v3629_v28  ;;  %v318_v6 = vrot.slane %v140_v46, %v3570_v27  ;;  %v322_v7 = vrot.slane %v141_v52, %v3570_v27  ;;  %v326_v9 = vrot.slane %v142_v53, %v3570_v27  ;;  %v835_v41 = vand.u32 2139095040, %v3623_v23 }
  0xa0   :  { %5458 = vst [vmem:[#allocation20_spill] sm:$0xff] %v3631_v29  ;;  %5459 = vst [vmem:[#allocation21_spill] sm:$0xff] %v3633_v30  ;;  %v732_v39 = vshrl.u32 %v731_v32, 23  ;;  %v940_v40 = vshrl.u32 %v939_v33, 23  ;;  %v628_v60 = vshrl.u32 %v627_v43, 23  ;;  %v3680_v10 = vmul.f32 %v314_v54, %v69_v59 }
  0xa1   :  { %5465 = vst [vmem:[#allocation27_spill] sm:$0xff] %v3673_v62  ;;  %v3683_v20 = vadd.f32 %v1508_v58, %v3642_v36  ;;  %v3688_v31 = vadd.f32 %v1540_v61, %v3667_v57  ;;  %v3691_v32 = vadd.f32 %v1514_v63, %v3652_v42  ;;  %v3694_v33 = vadd.f32 %v1546_v4, %v3673_v62 }
  0xa2   :  { %v3123_v49 = vadd.s32 4294967169, %v732_v39  ;;  %v3131_v50 = vadd.s32 4294967169, %v940_v40  ;;  %v3119_v16 = vadd.s32 4294967169, %v628_v60  ;;  %v3696_v35 = vmul.f32 %v318_v6, %v70_v12 }
  0xa3   :  { %5466 = vst [vmem:[#allocation28_spill] sm:$0xff] %v3694_v33  ;;  %v3698_v38 = vmul.f32 %v322_v7, %v71_v14  ;;  %v3700_v39 = vmul.f32 %v326_v9, %v72_v15  ;;  %v3704_v40 = vmul.f32 %v3680_v10, %v3680_v10  ;;  %v1043_v43 = vand.u32 2139095040, %v3627_v26 }
  0xa4   :  { %v738_v55 = vadd.s32 1, %v3123_v49  ;;  %v946_v56 = vadd.s32 1, %v3131_v50  ;;  %5467 = vst [vmem:[#allocation29_spill] sm:$0xff] %v3696_v35  ;;  %v1147_v45 = vand.u32 2139095040, %v3629_v28  ;;  %v5383_v46 = vand.u32 2147483647, %v3621_v22 }
  0xa5   :  { %5468 = vst [vmem:[#allocation30_spill] sm:$0xff] %v3698_v38  ;;  %5469 = vst [vmem:[#allocation31_spill] sm:$0xff] %v3700_v39  ;;  %v634_v49 = vadd.s32 1, %v3119_v16  ;;  %v5386_v58 = vmov 2475754826   ;;  %vm730_vm13 = vcmp.lt.s32.totalorder %v3621_v22, 0 }
  0xa6   :  { %vm739_vm0 = vcmp.gt.s32.totalorder %v738_v55, 0  ;;  %vm947_vm1 = vcmp.gt.s32.totalorder %v946_v56, 0  ;;  %v735_v53 = vand.u32 8388607, %v5383_v46  ;;  %v5390_v63 = vmov 2131351028  }
  0xa7   :  { %v740_v8 = vsel %vm739_vm0, %v738_v55, 0  ;;  %v3685_v25 = vsel %vm947_vm1, %v946_v56, 0  ;;  %v5384_v55 = vmov 683565275   ;;  %v5393_v9 = vmov 2102212464  }
  0xa8   :  { %v742_v17 = vand.u32 31, %v740_v8  ;;  %v3711_v50 = vand.u32 31, %v3685_v25  ;;  %v741_v54 = vshrl.u32 %v740_v8, 5  ;;  %v736_v7 = vor.u32 8388608, %v735_v53 }
  0xa9   :  { %v5426_v14 = vmov 920167782   ;;  %vm635_vm6 = vcmp.gt.s32.totalorder %v634_v49, 0 }
  0xaa   :  { %v743_v52 = vsub.s32 32, %v742_v17  ;;  %v745_v56 = vshll.u32 %v5384_v55, %v742_v17  ;;  %v748_v59 = vshll.u32 %v5386_v58, %v742_v17  ;;  %v751_v6 = vshll.u32 %v5390_v63, %v742_v17 }
  0xab   :  { %v754_v8 = vshll.u32 %v5393_v9, %v742_v17  ;;  %v757_v51 = vshll.u32 %v5426_v14, %v742_v17  ;;  %vm760_vm2 = vcmp.lt.s32.totalorder %v741_v54, 1  ;;  %vm761_vm3 = vcmp.lt.s32.totalorder %v741_v54, 2 }
  0xac   :  { %v744_v60 = vshrl.u32 %v5384_v55, %v743_v52  ;;  %v746_v61 = vshrl.u32 %v5386_v58, %v743_v52  ;;  %v749_v4 = vshrl.u32 %v5390_v63, %v743_v52  ;;  %v752_v12 = vshrl.u32 %v5393_v9, %v743_v52 }
  0xad   :  { %v755_v15 = vshrl.u32 %v5426_v14, %v743_v52  ;;  %v5420_v55 = vmov 1326507024   ;;  %vm762_vm4 = vcmp.lt.s32.totalorder %v741_v54, 3  ;;  %vm763_vm5 = vcmp.lt.s32.totalorder %v741_v54, 4 }
  0xae   :  { %v747_v16 = vor.u32 %v746_v61, %v745_v56  ;;  %v750_v46 = vor.u32 %v749_v4, %v748_v59  ;;  %v758_v58 = vshrl.u32 %v5420_v55, %v743_v52  ;;  %v753_v19 = vor.u32 %v752_v12, %v751_v6 }
  0xaf   :  { %v756_v0 = vor.u32 %v755_v15, %v754_v8  ;;  %v776_v61 = vshll.u32 %v736_v7, 8  ;;  %v1355_v17 = vand.u32 2139095040, %v3633_v30  ;;  %v836_v12 = vshrl.u32 %v835_v41, 23 }
  0xb0   :  { %v759_v53 = vor.u32 %v758_v58, %v757_v51  ;;  %v764_v63 = vsel %vm760_vm2, %v744_v60, %v747_v16  ;;  %v765_v5 = vsel %vm763_vm5, %v753_v19, 2102212464  ;;  %v768_v9 = vsel %vm760_vm2, %v747_v16, %v750_v46 }
  0xb1   :  { %v769_v34 = vsel %vm763_vm5, %v756_v0, 920167782  ;;  %v772_v48 = vsel %vm760_vm2, %v750_v46, %v753_v19  ;;  %v766_v42 = vsel %vm762_vm4, %v750_v46, %v765_v5  ;;  %v1044_v46 = vshrl.u32 %v1043_v43, 23 }
  0xb2   :  { %v770_v56 = vsel %vm762_vm4, %v753_v19, %v769_v34  ;;  %v773_v59 = vsel %vm763_vm5, %v759_v53, 1326507024  ;;  %v767_v6 = vsel %vm761_vm3, %v764_v63, %v766_v42  ;;  %v5398_v19 = vand.u32 2147483647, %v3625_v24 }
  0xb3   :  { %v771_v52 = vsel %vm761_vm3, %v768_v9, %v770_v56  ;;  %v774_v4 = vsel %vm762_vm4, %v756_v0, %v773_v59  ;;  %v3739_v34 = vsel %vm635_vm6, %v634_v49, 0  ;;  %v1148_v7 = vshrl.u32 %v1147_v45, 23 }
  0xb4   :  { %v775_v51 = vsel %vm761_vm3, %v772_v48, %v774_v4  ;;  %v3731_v58 = vmul.u32.u64.low %v776_v61, %v771_v52  ;;  %v3732_v60 = vmul.u32.u64.high %v776_v61, %v771_v52, %v3731_v58  ;;  %v951_v0 = vsub.s32 32, %v3711_v50 }
  0xb5   :  { %v3735_v8 = vmul.u32.u64.low %v776_v61, %v775_v51  ;;  %v3736_v5 = vmul.u32.u64.high %v776_v61, %v775_v51, %v3735_v8  ;;  %v783_v9 = vmul.u32 %v776_v61, %v767_v6  ;;  %v949_v42 = vshrl.u32 %v3685_v25, 5 }
  0xb6   :  { %v5470_v48 = vmov 683565275   ;;  %v5471_v63 = vmov 2475754826   ;;  %v786_v15 = vadd.s32 1, %v3732_v60  ;;  %v963_v6 = vshrl.u32 %v5426_v14, %v951_v0 }
  0xb7   :  { %v953_v54 = vshll.u32 %v5470_v48, %v3711_v50  ;;  %v956_v41 = vshll.u32 %v5471_v63, %v3711_v50  ;;  %v943_v16 = vand.u32 8388607, %v5398_v19  ;;  %v954_v49 = vshrl.u32 %v5471_v63, %v951_v0 }
  0xb8   :  { %v5472_v43 = vmov 2131351028   ;;  %vm785_vm7 = vc.u32 %v3736_v5, %v3731_v58  ;;  %v5473_v53 = vmov 2102212464   ;;  %v965_v19 = vshll.u32 %v5426_v14, %v3711_v50 }
  0xb9   :  { %v957_v45 = vshrl.u32 %v5472_v43, %v951_v0  ;;  %v959_v25 = vshll.u32 %v5472_v43, %v3711_v50  ;;  %v960_v56 = vshrl.u32 %v5473_v53, %v951_v0  ;;  %v962_v59 = vshll.u32 %v5473_v53, %v3711_v50 }
  0xba   :  { %v787_v61 = vsel %vm785_vm7, %v786_v15, %v3732_v60  ;;  %v955_v52 = vor.u32 %v954_v49, %v953_v54  ;;  %v966_v18 = vshrl.u32 %v5420_v55, %v951_v0  ;;  %v944_v62 = vor.u32 8388608, %v943_v16 }
  0xbb   :  { %v958_v4 = vor.u32 %v957_v45, %v956_v41  ;;  %v788_v51 = vadd.s32 %v787_v61, %v783_v9  ;;  %v961_v8 = vor.u32 %v960_v56, %v959_v25  ;;  %v952_v44 = vshrl.u32 %v5470_v48, %v951_v0 }
  0xbc   :  { %v964_v30 = vor.u32 %v963_v6, %v962_v59  ;;  %vm968_vm8 = vcmp.lt.s32.totalorder %v949_v42, 1  ;;  %v967_v3 = vor.u32 %v966_v18, %v965_v19  ;;  %vm970_vm9 = vcmp.lt.s32.totalorder %v949_v42, 3 }
  0xbd   :  { %v789_v28 = vadd.s32 536870912, %v788_v51  ;;  %vm971_vm10 = vcmp.lt.s32.totalorder %v949_v42, 4  ;;  %v976_v54 = vsel %vm968_vm8, %v955_v52, %v958_v4  ;;  %v980_v9 = vsel %vm968_vm8, %v958_v4, %v961_v8 }
  0xbe   :  { %v973_v60 = vsel %vm971_vm10, %v961_v8, 2102212464  ;;  %v977_v41 = vsel %vm971_vm10, %v964_v30, 920167782  ;;  %vm969_vm11 = vcmp.lt.s32.totalorder %v949_v42, 2  ;;  %v638_v0 = vand.u32 31, %v3739_v34 }
  0xbf   :  { %v3767_v15 = vshrl.u32 %v789_v28, 30  ;;  %v978_v50 = vsel %vm970_vm9, %v961_v8, %v977_v41  ;;  %v981_v16 = vsel %vm971_vm10, %v967_v3, 1326507024  ;;  %v984_v19 = vshll.u32 %v944_v62, 8 }
  0xc0   :  { %v979_v49 = vsel %vm969_vm11, %v976_v54, %v978_v50  ;;  %v982_v18 = vsel %vm970_vm9, %v964_v30, %v981_v16  ;;  %v972_v25 = vsel %vm968_vm8, %v952_v44, %v955_v52  ;;  %v974_v56 = vsel %vm970_vm9, %v958_v4, %v973_v60  ;;  %v3791_v44 = vld.sshfl [vmem:[%s5368_s1 + $0x8] sm:$0x33 pattern:$0x75316420] }
  0xc1   :  { %v791_v45 = vshll.u32 %v3767_v15, 30  ;;  %v983_v28 = vsel %vm969_vm11, %v980_v9, %v982_v18  ;;  %v3780_v6 = vmul.u32.u64.low %v984_v19, %v979_v49  ;;  %v3781_v3 = vmul.u32.u64.high %v984_v19, %v979_v49, %v3780_v6 }
  0xc2   :  { %v3777_v59 = vmul.u32.u64.low %v984_v19, %v983_v28  ;;  %v3778_v61 = vmul.u32.u64.high %v984_v19, %v983_v28, %v3777_v59  ;;  %v3127_v8 = vadd.s32 4294967169, %v836_v12  ;;  %v5474_v54 = vand.u32 2139095040, %v3631_v29 }
  0xc3   :  { %v1356_v62 = vshrl.u32 %v1355_v17, 23  ;;  %v3786_v41 = vsub.s32 %v788_v51, %v791_v45  ;;  %v3135_v52 = vadd.s32 4294967169, %v1044_v46  ;;  %v3139_v4 = vadd.s32 4294967169, %v1148_v7 }
  0xc4   :  { %v1252_v30 = vshrl.u32 %v5474_v54, 23  ;;  %v3795_v60 = vmul.f32 %v3696_v35, %v3696_v35  ;;  %v3799_v12 = vmul.f32 %v3698_v38, %v3698_v38  ;;  %v975_v17 = vsel %vm969_vm11, %v972_v25, %v974_v56 }
  0xc5   :  { %v794_v9 = vsub.s32 0, %v3786_v41  ;;  %v3803_v51 = vsub.s32 32, %v638_v0  ;;  %v3807_v50 = vmul.f32 %v3700_v39, %v3700_v39  ;;  %vm993_vm12 = vc.u32 %v3778_v61, %v3780_v6 }
  0xc6   :  { %v994_v46 = vadd.s32 1, %v3781_v3  ;;  %v5407_v7 = vand.u32 2147483647, %v3619_v21  ;;  %v3813_v16 = vadd.s32 1, %v3127_v8  ;;  %v3815_v49 = vadd.s32 4294967169, %v1252_v30 }
  0xc7   :  { %v3817_v18 = vadd.s32 4294967169, %v1356_v62  ;;  %v3124_v42 = vmin.u32 %v794_v9, %v3786_v41  ;;  %v3820_v45 = vadd.s32 1, %v3135_v52  ;;  %v3822_v25 = vadd.s32 1, %v3139_v4 }
  0xc8   :  { %v991_v56 = vmul.u32 %v984_v19, %v975_v17  ;;  %v995_v28 = vsel %vm993_vm12, %v994_v46, %v3781_v3  ;;  %v784_v59 = vadd.s32 %v3731_v58, %v3736_v5  ;;  %v642_v8 = vshrl.u32 %v5471_v63, %v3803_v51 }
  0xc9   :  { %v796_v54 = vclz %v3124_v42  ;;  %v645_v30 = vshrl.u32 %v5472_v43, %v3803_v51  ;;  %v814_v62 = vsub.s32 4, %v3767_v15  ;;  %v631_v52 = vand.u32 8388607, %v5407_v7 }
  0xca   :  { %v996_v9 = vadd.s32 %v995_v28, %v991_v56  ;;  %v641_v19 = vshll.u32 %v5470_v48, %v638_v0  ;;  %v644_v3 = vshll.u32 %v5471_v63, %v638_v0  ;;  %v648_v58 = vshrl.u32 %v5473_v53, %v3803_v51 }
  0xcb   :  { %v3125_v4 = vadd.s32 4294967294, %v796_v54  ;;  %v651_v5 = vshrl.u32 %v5426_v14, %v3803_v51  ;;  %v3842_v46 = vshrl.u32 %v3739_v34, 5  ;;  %v650_v42 = vshll.u32 %v5473_v53, %v638_v0 }
  0xcc   :  { %v997_v17 = vadd.s32 536870912, %v996_v9  ;;  %v654_v56 = vshrl.u32 %v5420_v55, %v3803_v51  ;;  %v643_v28 = vor.u32 %v642_v8, %v641_v19  ;;  %v646_v54 = vor.u32 %v645_v30, %v644_v3 }
  0xcd   :  { %vm3126_vm14 = vcmp.lt.s32.totalorder %v3125_v4, 0  ;;  %v647_v7 = vshll.u32 %v5472_v43, %v638_v0  ;;  %v652_v39 = vor.u32 %v651_v5, %v650_v42  ;;  %v653_v26 = vshll.u32 %v5426_v14, %v638_v0 }
  0xce   :  { %v799_v29 = vsel %vm3126_vm14, 0, %v3125_v4  ;;  %v998_v36 = vshrl.u32 %v997_v17, 30  ;;  %vm843_vm15 = vcmp.gt.s32.totalorder %v3813_v16, 0  ;;  %v632_v47 = vor.u32 8388608, %v631_v52 }
  0xcf   :  { %v800_v1 = vsub.s32 32, %v799_v29  ;;  %v804_v34 = vsub.s32 4294967266, %v799_v29  ;;  %v649_v38 = vor.u32 %v648_v58, %v647_v7  ;;  %v801_v33 = vshll.u32 %v3786_v41, %v799_v29 }
  0xd0   :  { %v999_v57 = vshll.u32 %v998_v36, 30  ;;  %v655_v55 = vor.u32 %v654_v56, %v653_v26  ;;  %vm656_vm0 = vcmp.lt.s32.totalorder %v3842_v46, 1  ;;  %vm659_vm1 = vcmp.lt.s32.totalorder %v3842_v46, 4 }
  0xd1   :  { %v802_v8 = vshrl.u32 %v784_v59, %v800_v1  ;;  %v805_v30 = vadd.s32 127, %v804_v34  ;;  %v664_v19 = vsel %vm656_vm0, %v643_v28, %v646_v54  ;;  %v5475_v0 = vand.u32 2147483647, %v3621_v22 }
  0xd2   :  { %v3861_v7 = vsub.s32 %v996_v9, %v999_v57  ;;  %vm658_vm3 = vcmp.lt.s32.totalorder %v3842_v46, 3  ;;  %v665_v26 = vsel %vm659_vm1, %v652_v39, 920167782  ;;  %vm657_vm4 = vcmp.lt.s32.totalorder %v3842_v46, 2 }
  0xd3   :  { %vm3857_vm2 = vcmp.le.f32.partialorder %v5475_v0, 0.7853982  ;;  %v803_v1 = vor.u32 %v802_v8, %v801_v33  ;;  %v806_v29 = vshll.u32 %v805_v30, 23  ;;  %v666_v41 = vsel %vm658_vm3, %v649_v38, %v665_v26 }
  0xd4   :  { %v1002_v59 = vsub.s32 0, %v3861_v7  ;;  %v661_v52 = vsel %vm659_vm1, %v649_v38, 2102212464  ;;  %v667_v57 = vsel %vm657_vm4, %v664_v19, %v666_v41  ;;  %v668_v9 = vsel %vm656_vm0, %v646_v54, %v649_v38 }
  0xd5   :  { %v807_v3 = vor.u32 4788187, %v806_v29  ;;  %v815_v33 = vsel %vm730_vm13, %v814_v62, %v3767_v15  ;;  %v669_v58 = vsel %vm659_vm1, %v655_v55, 1326507024  ;;  %v672_v5 = vshll.u32 %v632_v47, 8 }
  0xd6   :  { %v810_v17 = vcvt.s32.f32 %v803_v1  ;;  %v3132_v42 = vmin.u32 %v1002_v59, %v3861_v7  ;;  %v640_v56 = vshrl.u32 %v5470_v48, %v3803_v51  ;;  %v670_v34 = vsel %vm658_vm3, %v652_v39, %v669_v58 }
  0xd7   :  { %v808_v8 = vand.u32 2147483647, %v807_v3  ;;  %v671_v38 = vsel %vm657_vm4, %v668_v9, %v670_v34  ;;  %v3888_v30 = vmul.u32.u64.low %v672_v5, %v667_v57  ;;  %v3889_v19 = vmul.u32.u64.high %v672_v5, %v667_v57, %v3888_v30 }
  0xd8   :  { %v1004_v15 = vclz %v3132_v42  ;;  %v1022_v55 = vsub.s32 4, %v998_v36  ;;  %v660_v47 = vsel %vm656_vm0, %v640_v56, %v643_v28  ;;  %v662_v62 = vsel %vm658_vm3, %v646_v54, %v661_v52 }
  0xd9   :  { %v811_v51 = vmul.f32 %v810_v17, %v808_v8  ;;  %v817_v39 = vsel %vm3857_vm2, 0, %v815_v33  ;;  %v3898_v0 = vmul.u32.u64.low %v672_v5, %v671_v38  ;;  %v3899_v26 = vmul.u32.u64.high %v672_v5, %v671_v38, %v3898_v0 }
  0xda   :  { %v3904_v1 = vsel %vm843_vm15, %v3813_v16, 0  ;;  %vm1051_vm5 = vcmp.gt.s32.totalorder %v3820_v45, 0  ;;  %v1258_v29 = vadd.s32 1, %v3815_v49  ;;  %v3133_v28 = vadd.s32 4294967294, %v1004_v15 }
  0xdb   :  { %v812_v41 = vxor.u32 2147483648, %v811_v51  ;;  %vm938_vm6 = vcmp.lt.s32.totalorder %v3625_v24, 0  ;;  %v663_v54 = vsel %vm657_vm4, %v660_v47, %v662_v62  ;;  %v682_v59 = vadd.s32 1, %v3889_v19 }
  0xdc   :  { %v821_v52 = vadd.s32 3, %v817_v39  ;;  %v5478_v57 = vand.u32 2147483647, %v3625_v24  ;;  %vm3134_vm8 = vcmp.lt.s32.totalorder %v3133_v28, 0  ;;  %v1023_v16 = vsel %vm938_vm6, %v1022_v55, %v998_v36 }
  0xdd   :  { %v813_v49 = vsel %vm730_vm13, %v812_v41, %v811_v51  ;;  %v992_v46 = vadd.s32 %v3780_v6, %v3778_v61  ;;  %v1007_v3 = vsel %vm3134_vm8, 0, %v3133_v28  ;;  %vm681_vm9 = vc.u32 %v3899_v26, %v3888_v30 }
  0xde   :  { %vm3914_vm7 = vcmp.le.f32.partialorder %v5478_v57, 0.7853982  ;;  %v816_v33 = vsel %vm3857_vm2, %v3621_v22, %v813_v49  ;;  %v1008_v58 = vsub.s32 32, %v1007_v3  ;;  %v1012_v17 = vsub.s32 4294967266, %v1007_v3 }
  0xdf   :  { %v679_v42 = vmul.u32 %v672_v5, %v663_v54  ;;  %3290 = vcosq.f32 %v816_v33  ;;  %v1009_v36 = vshll.u32 %v3861_v7, %v1007_v3  ;;  %v1025_v56 = vsel %vm3914_vm7, 0, %v1023_v16 }
  0xe0   :  { %v683_v34 = vsel %vm681_vm9, %v682_v59, %v3889_v19  ;;  %3292 = vsinq.f32 %v816_v33  ;;  %v1010_v61 = vshrl.u32 %v992_v46, %v1008_v58  ;;  %v1013_v6 = vadd.s32 127, %v1012_v17 }
  0xe1   :  { %v684_v8 = vadd.s32 %v683_v34, %v679_v42  ;;  %vm1155_vm10 = vcmp.gt.s32.totalorder %v3822_v25, 0  ;;  %vm1259_vm11 = vcmp.gt.s32.totalorder %v1258_v29, 0  ;;  %v822_v4 = vand.u32 3, %v821_v52 }
  0xe2   :  { %v3937_v5 = vsel %vm1051_vm5, %v3820_v45, 0  ;;  %v1011_v38 = vor.u32 %v1010_v61, %v1009_v36  ;;  %v1014_v7 = vshll.u32 %v1013_v6, 23  ;;  %v5422_v55 = vmov 0.0   ;;  %v77_v6 = vld [vmem:[#allocation4 + $0x40] sm:$0xff] }
  0xe3   :  { %v685_v15 = vadd.s32 536870912, %v684_v8  ;;  %1802 = vmatprep.mubr.f32.mxu0 %v5422_v55  ;;  %1885 = vmatprep.mubr.f32.mxu1 %v5422_v55  ;;  %v3942_v19 = vand.u32 31, %v3904_v1  ;;  %v3945_v47 = vadd.s32 1, %v3817_v18  ;;  %v1029_v62 = vadd.s32 3, %v1025_v56 }
  0xe4   :  { %v3949_v51 = vadd.f32 %v3696_v35, %v3680_v10  ;;  %v3952_v45 = vsel %vm1155_vm10, %v3822_v25, 0  ;;  %v3954_v39 = vsel %vm1259_vm11, %v1258_v29, 0  ;;  %v1015_v0 = vor.u32 4788187, %v1014_v7 }
  0xe5   :  { %v686_v28 = vshrl.u32 %v685_v15, 30  ;;  %v3957_v41 = vand.u32 31, %v3937_v5  ;;  %vm623_vm12 = vcmp.eq.s32.totalorder %v3549_v11, 0  ;;  %vm823_vm13 = vcmp.lt.s32.totalorder %v822_v4, 2 }
  0xe6   :  { %v174_v18 = vcombine.high %v3791_v44, %v3791_v44  ;;  %v181_v54 = vrot.slane %v3791_v44, %v3555_v13  ;;  %vm820_vm14 = vweird.f32 %v3621_v22  ;;  %vm824_vm15 = vcmp.eq.s32.totalorder %v822_v4, 0 }
  0xe7   :  { %v1016_v25 = vand.u32 2147483647, %v1015_v0  ;;  %v1018_v29 = vcvt.s32.f32 %v1011_v38  ;;  %vm626_vm0 = vcmp.lt.s32.totalorder %v3619_v21, 0  ;;  %v687_v59 = vshll.u32 %v686_v28, 30 }
  0xe8   :  { %vm827_vm1 = vcmp.eq.s32.totalorder %v822_v4, 2  ;;  %v3966_v52 = vand.u32 3, %v1029_v62  ;;  %v3970_v57 = vadd.f32 %v3795_v60, %v3704_v40  ;;  %v5424_v16 = vand.u32 2147483647, %v3623_v23 }
  0xe9   :  { %v1019_v49 = vmul.f32 %v1018_v29, %v1016_v25  ;;  %v3975_v44 = vadd.s32 %v3888_v30, %v3899_v26  ;;  %v3977_v46 = vsub.s32 %v684_v8, %v687_v59  ;;  %v3981_v3 = vadd.f32 %v3604_v2, %v3704_v40  ;;  %v3291_v33 = vpop.eup %3290 }
  0xea   :  { %v3985_v58 = vadd.f32 %v3646_v37, %v3799_v12  ;;  %v3988_v17 = vrot.slane %v174_v18, %v3555_v13  ;;  %v189_v42 = vcombine.high %v181_v54, %v181_v54  ;;  %v3991_v36 = vshrl.u32 %v3904_v1, 5  ;;  %v3293_v30 = vpop.eup %3292 }
  0xeb   :  { %v828_v26 = vxor.u32 2147483648, %v3291_v33  ;;  %v1020_v56 = vxor.u32 2147483648, %v1019_v49  ;;  %v690_v34 = vsub.s32 0, %v3977_v46  ;;  %v346_v2 = vrot.slane %v181_v54, %v3570_v27 }
  0xec   :  { %v825_v40 = vxor.u32 2147483648, %v3293_v30  ;;  %v710_v61 = vsub.s32 4, %v686_v28  ;;  %v190_v37 = vcombine.high %v3988_v17, %v3988_v17  ;;  %v3999_v8 = vand.u32 8388607, %v5424_v16 }
  0xed   :  { %v829_v1 = vsel %vm827_vm1, %v828_v26, %v3293_v30  ;;  %v1021_v38 = vsel %vm938_vm6, %v1020_v56, %v1019_v49  ;;  %v3120_v7 = vmin.u32 %v690_v34, %v3977_v46  ;;  %v847_v15 = vsub.s32 32, %v3942_v19 }
  0xee   :  { %v826_v62 = vsel %vm824_vm15, %v3291_v33, %v825_v40  ;;  %v1024_v0 = vsel %vm3914_vm7, %v3625_v24, %v1021_v38  ;;  %v354_v54 = vrot.slane %v189_v42, %v3570_v27  ;;  %v4014_v59 = vmul.f32 %v346_v2, %v77_v6 }
  0xef   :  { %v830_v25 = vsel %vm823_vm13, %v826_v62, %v829_v1  ;;  %3294 = vcosq.f32 %v1024_v0  ;;  %v692_v29 = vclz %v3120_v7  ;;  %v4020_v33 = vsel %vm626_vm0, %v710_v61, %v686_v28  ;;  %v79_v62 = vld [vmem:[#allocation4 + $0x50] sm:$0xff] }
  0xf0   :  { %5481 = vst [vmem:[#allocation32_spill] sm:$0xff] %v4014_v59  ;;  %v831_v49 = vsel %vm820_vm14, nan, %v830_v25  ;;  %3296 = vsinq.f32 %v1024_v0  ;;  %v4029_v30 = vrot.slane %v190_v37, %v3570_v27  ;;  %v850_v26 = vshrl.u32 %v5471_v63, %v847_v15 }
  0xf1   :  { %v4026_v42 = vsel %vm623_vm12, %v3621_v22, %v831_v49  ;;  %v3121_v4 = vadd.s32 4294967294, %v692_v29  ;;  %v849_v34 = vshll.u32 %v5470_v48, %v3942_v19  ;;  %v852_v22 = vshll.u32 %v5471_v63, %v3942_v19 }
  0xf2   :  { %v4034_v56 = vmul.f32 %v4026_v42, %v4026_v42  ;;  %v1529_v28 = vadd.f32 %v3683_v20, %v4026_v42  ;;  %vm1035_vm2 = vcmp.eq.s32.totalorder %v3966_v52, 2  ;;  %v853_v2 = vshrl.u32 %v5472_v43, %v847_v15 }
  0xf3   :  { %vm3122_vm3 = vcmp.lt.s32.totalorder %v3121_v4, 0  ;;  %v856_v40 = vshrl.u32 %v5473_v53, %v847_v15  ;;  %v859_v61 = vshrl.u32 %v5426_v14, %v847_v15  ;;  %vm1032_vm4 = vcmp.eq.s32.totalorder %v3966_v52, 0 }
  0xf4   :  { %v1561_v6 = vadd.f32 %v3688_v31, %v4034_v56  ;;  %v1569_v37 = vmul.f32 %v1529_v28, %v1529_v28  ;;  %v695_v20 = vsel %vm3122_vm3, 0, %v3121_v4  ;;  %v858_v1 = vshll.u32 %v5473_v53, %v3942_v19 }
  0xf5   :  { %vm1031_vm5 = vcmp.lt.s32.totalorder %v3966_v52, 2  ;;  %v696_v38 = vsub.s32 32, %v695_v20  ;;  %v700_v7 = vsub.s32 4294967266, %v695_v20  ;;  %v851_v0 = vor.u32 %v850_v26, %v849_v34 }
  0xf6   :  { %v855_v25 = vshll.u32 %v5472_v43, %v3942_v19  ;;  %v1577_v29 = vsub.f32 %v1569_v37, %v1561_v6  ;;  %vm1028_vm6 = vweird.f32 %v3625_v24  ;;  %v860_v31 = vor.u32 %v859_v61, %v858_v1 }
  0xf7   :  { %v861_v49 = vshll.u32 %v5426_v14, %v3942_v19  ;;  %v5482_v4 = vmov 1326507024   ;;  %v697_v55 = vshll.u32 %v3977_v46, %v695_v20  ;;  %v698_v16 = vshrl.u32 %v3975_v44, %v696_v38 }
  0xf8   :  { %v862_v28 = vshrl.u32 %v5482_v4, %v847_v15  ;;  %v701_v18 = vadd.s32 127, %v700_v7  ;;  %v854_v9 = vor.u32 %v853_v2, %v852_v22  ;;  %v4060_v35 = vmul.f32 0.5, %v1577_v29 }
  0xf9   :  { %v4062_v26 = vmul.f32 %v354_v54, %v79_v62  ;;  %v857_v34 = vor.u32 %v856_v40, %v855_v25  ;;  %v3295_v37 = vpop.eup %3294  ;;  %v5483_v61 = vand.u32 2147483647, %v3619_v21  ;;  %v699_v19 = vor.u32 %v698_v16, %v697_v55 }
  0xfa   :  { %v863_v6 = vor.u32 %v862_v28, %v861_v49  ;;  %v702_v14 = vshll.u32 %v701_v18, 23  ;;  %v848_v46 = vshrl.u32 %v5470_v48, %v847_v15  ;;  %vm867_vm8 = vcmp.lt.s32.totalorder %v3991_v36, 4  ;;  %v3297_v44 = vpop.eup %3296  ;;  %1738 = vmatprep.subr.mxu0 %v4060_v35  ;;  %v80_v15 = vld [vmem:[#allocation4 + $0x58] sm:$0xff] }
  0xfb   :  { %vm4066_vm7 = vcmp.le.f32.partialorder %v5483_v61, 0.7853982  ;;  %v1036_v54 = vxor.u32 2147483648, %v3295_v37  ;;  %vm864_vm9 = vcmp.lt.s32.totalorder %v3991_v36, 1  ;;  %vm865_vm10 = vcmp.lt.s32.totalorder %v3991_v36, 2 }
  0xfc   :  { %v873_v22 = vsel %vm867_vm8, %v860_v31, 920167782  ;;  %v1033_v2 = vxor.u32 2147483648, %v3297_v44  ;;  %v703_v40 = vor.u32 4788187, %v702_v14  ;;  %vm866_vm11 = vcmp.lt.s32.totalorder %v3991_v36, 3 }
  0xfd   :  { %v872_v55 = vsel %vm864_vm9, %v851_v0, %v854_v9  ;;  %v1037_v16 = vsel %vm1035_vm2, %v1036_v54, %v3297_v44  ;;  %v874_v18 = vsel %vm866_vm11, %v857_v34, %v873_v22  ;;  %v876_v20 = vsel %vm864_vm9, %v854_v9, %v857_v34 }
  0xfe   :  { %v877_v38 = vsel %vm867_vm8, %v863_v6, 1326507024  ;;  %vm1363_vm13 = vcmp.gt.s32.totalorder %v3945_v47, 0  ;;  %v1034_v14 = vsel %vm1032_vm4, %v3295_v37, %v1033_v2  ;;  %v704_v7 = vand.u32 2147483647, %v703_v40 }
  0xff   :  { %v706_v62 = vcvt.s32.f32 %v699_v19  ;;  %v878_v25 = vsel %vm866_vm11, %v860_v31, %v877_v38  ;;  %v1038_v29 = vsel %vm1031_vm5, %v1034_v14, %v1037_v16  ;;  %v869_v49 = vsel %vm867_vm8, %v857_v34, 2102212464  ;;  %v78_v34 = vld [vmem:[#allocation4 + $0x48] sm:$0xff] }
 0x100   :  { %v879_v28 = vsel %vm865_vm10, %v876_v20, %v878_v25  ;;  %v5486_v6 = vor.u32 8388608, %v3999_v8  ;;  %v1039_v37 = vsel %vm1028_vm6, nan, %v1038_v29  ;;  %v4104_v19 = vmul.f32 %v4029_v30, %v80_v15 }
 0x101   :  { %v707_v44 = vmul.f32 %v706_v62, %v704_v7  ;;  %v875_v52 = vsel %vm865_vm10, %v872_v55, %v874_v18  ;;  %v4111_v31 = vsel %vm623_vm12, %v3625_v24, %v1039_v37  ;;  %v868_v8 = vsel %vm864_vm9, %v848_v46, %v851_v0  ;;  %v5487_v0 = vld [vmem:[#allocation26_spill] sm:$0xff]  ;;  %v5488_v18 = vld [vmem:[#allocation28_spill] sm:$0xff] }
 0x102   :  { %v880_v61 = vshll.u32 %v5486_v6, 8  ;;  %v4120_v2 = vmul.f32 %v4111_v31, %v4111_v31  ;;  %v1531_v30 = vadd.f32 %v3691_v32, %v4111_v31  ;;  %v870_v55 = vsel %vm866_vm11, %v854_v9, %v869_v49 }
 0x103   :  { %v708_v40 = vxor.u32 2147483648, %v707_v44  ;;  %v713_v24 = vsel %vm4066_vm7, 0, %v4020_v33  ;;  %v1641_v46 = vadd.f32 %v5487_v0, %v3807_v50  ;;  %v5489_v9 = vrot.slane %v3988_v17, %v3570_v27 }
 0x104   :  { %v4115_v54 = vmul.u32.u64.low %v880_v61, %v879_v28  ;;  %v4116_v22 = vmul.u32.u64.high %v880_v61, %v879_v28, %v4115_v54  ;;  %v4131_v16 = vmul.u32.u64.low %v880_v61, %v875_v52  ;;  %v4132_v15 = vmul.u32.u64.high %v880_v61, %v875_v52, %v4131_v16 }
 0x105   :  { %v1563_v20 = vadd.f32 %v5488_v18, %v4120_v2  ;;  %v1571_v38 = vmul.f32 %v1531_v30, %v1531_v30  ;;  %v709_v32 = vsel %vm626_vm0, %v708_v40, %v707_v44  ;;  %v4141_v14 = vmul.f32 %v5489_v9, %v78_v34  ;;  %v5502_v9 = vld [vmem:[#allocation23_spill] sm:$0xff] }
 0x106   :  { %v712_v33 = vsel %vm4066_vm7, %v3619_v21, %v709_v32  ;;  %v871_v7 = vsel %vm865_vm10, %v868_v8, %v870_v55  ;;  %v1472_v62 = vmul.f32 %v4014_v59, %v4014_v59  ;;  %v4152_v25 = vmul.f32 %v4062_v26, %v4062_v26 }
 0x107   :  { %5490 = vst [vmem:[#allocation26_spill] sm:$0xff] %v4141_v14  ;;  %v1579_v29 = vsub.f32 %v1571_v38, %v1563_v20  ;;  %3298 = vcosq.f32 %v712_v33  ;;  %vm889_vm14 = vc.u32 %v4116_v22, %v4131_v16  ;;  %v4157_v17 = vmul.f32 %v4104_v19, %v4104_v19  ;;  %v5501_v20 = vld [vmem:[#allocation31_spill] sm:$0xff] }
 0x108   :  { %3300 = vsinq.f32 %v712_v33  ;;  %v717_v1 = vadd.s32 3, %v713_v24  ;;  %v890_v36 = vadd.s32 1, %v4132_v15  ;;  %v4161_v49 = vadd.f32 %v3981_v3, %v1472_v62 }
 0x109   :  { %v4163_v28 = vmul.f32 0.5, %v1579_v29  ;;  %v887_v6 = vmul.u32 %v880_v61, %v871_v7  ;;  %v4167_v37 = vadd.f32 %v3985_v58, %v4152_v25  ;;  %v4170_v44 = vadd.f32 %v1641_v46, %v4157_v17  ;;  %v5494_v61 = vld [vmem:[#allocation30_spill] sm:$0xff] }
 0x10a   :  { %5491 = vst [vmem:[#allocation28_spill] sm:$0xff] %v4161_v49  ;;  %v4175_v52 = vsel %vm1363_vm13, %v3945_v47, 0  ;;  %v891_v34 = vsel %vm889_vm14, %v890_v36, %v4132_v15  ;;  %v4179_v3 = vshrl.u32 %v3937_v5, 5  ;;  %v1505_v8 = vadd.f32 %v3949_v51, %v5494_v61  ;;  %v5500_v15 = vld [vmem:[#allocation18_spill] sm:$0xff] }
 0x10b   :  { %5492 = vst [vmem:[#allocation33_spill] sm:$0xff] %v4163_v28  ;;  %5493 = vst [vmem:[#allocation34_spill] sm:$0xff] %v4170_v44  ;;  %1821 = vmatprep.subr.mxu1 %v4163_v28  ;;  %v1537_v58 = vadd.f32 %v3970_v57, %v3799_v12  ;;  %v892_v54 = vadd.s32 %v891_v34, %v887_v6  ;;  %v4187_v30 = vand.u32 31, %v3952_v45  ;;  %v4190_v47 = vshrl.u32 %v3954_v39, 5  ;;  %v5497_v57 = vld [vmem:[#allocation10_spill] sm:$0xff] }
 0x10c   :  { %v4193_v40 = vand.u32 31, %v3954_v39  ;;  %v718_v5 = vand.u32 3, %v717_v1  ;;  %v1055_v55 = vsub.s32 32, %v3957_v41  ;;  %v4197_v24 = vand.u32 31, %v4175_v52  ;;  %v5499_v39 = vld [vmem:[#allocation13_spill] sm:$0xff]  ;;  %v5504_v29 = vld [vmem:[#allocation14_spill] sm:$0xff] }
 0x10d   :  { %5495 = vst [vmem:[#allocation30_spill] sm:$0xff] %v4190_v47  ;;  %v893_v51 = vadd.s32 536870912, %v892_v54  ;;  %v4201_v12 = vmul.f32 %v4141_v14, %v4141_v14  ;;  %vm716_vm15 = vweird.f32 %v3619_v21  ;;  %v4206_v0 = vadd.f32 %v5497_v57, %v3680_v10  ;;  %v4224_v10 = vld.sshfl [vmem:[%s5368_s1 + $0x14] sm:$0x33 pattern:$0x75316420] }
 0x10e   :  { %v4210_v46 = vadd.f32 %v5499_v39, %v5494_v61  ;;  %v5430_v18 = vand.u32 2147483647, %v5500_v15  ;;  %v1506_v38 = vadd.f32 %v1505_v8, %v5501_v20  ;;  %v1538_v32 = vadd.f32 %v1537_v58, %v3807_v50 }
 0x10f   :  { %5496 = vst [vmem:[#allocation35_spill] sm:$0xff] %v4201_v12  ;;  %5498 = vst [vmem:[#allocation10_spill] sm:$0xff] %v4206_v0  ;;  %v4217_v33 = vadd.f32 %v5502_v9, %v5501_v20  ;;  %v4219_v7 = vshrl.u32 %v893_v51, 30  ;;  %vm719_vm0 = vcmp.lt.s32.totalorder %v718_v5, 2  ;;  %vm720_vm1 = vcmp.eq.s32.totalorder %v718_v5, 0 }
 0x110   :  { %vm723_vm2 = vcmp.eq.s32.totalorder %v718_v5, 2  ;;  %v4228_v1 = vadd.f32 %v5504_v29, %v3795_v60  ;;  %v4232_v50 = vmul.f32 %v4060_v35, %v4060_v35  ;;  %v4237_v34 = vadd.f32 %v4141_v14, %v4014_v59 }
 0x111   :  { %5503 = vst [vmem:[#allocation13_spill] sm:$0xff] %v4217_v33  ;;  %v3299_v36 = vpop.eup %3298  ;;  %v895_v6 = vshll.u32 %v4219_v7, 30  ;;  %v4240_v61 = vadd.f32 %v4201_v12, %v1472_v62  ;;  %v4243_v51 = vadd.s32 %v4131_v16, %v4116_v22  ;;  %v1047_v60 = vand.u32 8388607, %v5430_v18 }
 0x112   :  { %5505 = vst [vmem:[#allocation18_spill] sm:$0xff] %v4228_v1  ;;  %v3301_v8 = vpop.eup %3300  ;;  %v724_v58 = vxor.u32 2147483648, %v3299_v36  ;;  %v1058_v20 = vshrl.u32 %v5471_v63, %v1055_v55  ;;  %v1061_v9 = vshrl.u32 %v5472_v43, %v1055_v55  ;;  %v1056_v49 = vshrl.u32 %v5470_v48, %v1055_v55 }
 0x113   :  { %v721_v57 = vxor.u32 2147483648, %v3301_v8  ;;  %v4247_v39 = vsub.s32 %v892_v54, %v895_v6  ;;  %v1057_v62 = vshll.u32 %v5470_v48, %v3957_v41  ;;  %v1064_v28 = vshrl.u32 %v5473_v53, %v1055_v55 }
 0x114   :  { %v725_v29 = vsel %vm723_vm2, %v724_v58, %v3301_v8  ;;  %v1060_v54 = vshll.u32 %v5471_v63, %v3957_v41  ;;  %v1063_v6 = vshll.u32 %v5472_v43, %v3957_v41  ;;  %v1066_v8 = vshll.u32 %v5473_v53, %v3957_v41 }
 0x115   :  { %v722_v22 = vsel %vm720_vm1, %v3299_v36, %v721_v57  ;;  %v898_v16 = vsub.s32 0, %v4247_v39  ;;  %v5506_v58 = vmov 920167782   ;;  %v1070_v59 = vshrl.u32 %v5482_v4, %v1055_v55 }
 0x116   :  { %v726_v18 = vsel %vm719_vm0, %v722_v22, %v725_v29  ;;  %v1067_v0 = vshrl.u32 %v5506_v58, %v1055_v55  ;;  %vm1728_vm3 = vcmask 64512   ;;  %v1059_v14 = vor.u32 %v1058_v20, %v1057_v62 }
 0x117   :  { %v727_v36 = vsel %vm716_vm15, nan, %v726_v18  ;;  %v3128_v57 = vmin.u32 %v898_v16, %v4247_v39  ;;  %v1062_v1 = vor.u32 %v1061_v9, %v1060_v54  ;;  %v1065_v29 = vor.u32 %v1064_v28, %v1063_v6 }
 0x118   :  { %v1456_v5 = vsel %vm623_vm12, %v3619_v21, %v727_v36  ;;  %v1068_v22 = vor.u32 %v1067_v0, %v1066_v8  ;;  %v1069_v12 = vshll.u32 %v5506_v58, %v3957_v41  ;;  %v1048_v47 = vor.u32 8388608, %v1047_v60 }
 0x119   :  { %v1496_v44 = vmul.f32 %v1456_v5, %v1456_v5  ;;  %v1528_v33 = vadd.f32 %v1506_v38, %v1456_v5  ;;  %v4275_v55 = vadd.f32 %v4026_v42, %v1456_v5  ;;  %v900_v18 = vclz %v3128_v57 }
 0x11a   :  { %v1071_v16 = vor.u32 %v1070_v59, %v1069_v12  ;;  %vm1072_vm4 = vcmp.lt.s32.totalorder %v4179_v3, 1  ;;  %vm1073_vm5 = vcmp.lt.s32.totalorder %v4179_v3, 2  ;;  %vm1074_vm6 = vcmp.lt.s32.totalorder %v4179_v3, 3 }
 0x11b   :  { %v1560_v20 = vadd.f32 %v1538_v32, %v1496_v44  ;;  %v1568_v9 = vmul.f32 %v1528_v33, %v1528_v33  ;;  %v4280_v21 = vadd.f32 %v4034_v56, %v1496_v44  ;;  %v3129_v28 = vadd.s32 4294967294, %v900_v18 }
 0x11c   :  { %vm1075_vm7 = vcmp.lt.s32.totalorder %v4179_v3, 4  ;;  %v1076_v41 = vsel %vm1072_vm4, %v1056_v49, %v1059_v14  ;;  %v1080_v59 = vsel %vm1072_vm4, %v1059_v14, %v1062_v1  ;;  %vm834_vm8 = vcmp.lt.s32.totalorder %v3623_v23, 0  ;;  %v4296_v14 = vld [vmem:[%s5374_s7] sm:$0xff] }
 0x11d   :  { %v1576_v42 = vsub.f32 %v1568_v9, %v1560_v20  ;;  %vm3130_vm9 = vcmp.lt.s32.totalorder %v3129_v28, 0  ;;  %v1077_v12 = vsel %vm1075_vm7, %v1065_v29, 2102212464  ;;  %v1081_v0 = vsel %vm1075_vm7, %v1068_v22, 920167782 }
 0x11e   :  { %v903_v38 = vsel %vm3130_vm9, 0, %v3129_v28  ;;  %v1082_v56 = vsel %vm1074_vm6, %v1065_v29, %v1081_v0  ;;  %v1084_v44 = vsel %vm1072_vm4, %v1062_v1, %v1065_v29  ;;  %v1085_v32 = vsel %vm1075_vm7, %v1071_v16, 1326507024  ;;  %v5511_v0 = vld [vmem:[#allocation19_spill] sm:$0xff] }
 0x11f   :  { %v1584_v33 = vmul.f32 0.5, %v1576_v42  ;;  %v904_v60 = vsub.s32 32, %v903_v38  ;;  %v908_v49 = vsub.s32 4294967266, %v903_v38  ;;  %v1078_v62 = vsel %vm1074_vm6, %v1062_v1, %v1077_v12 }
 0x120   :  { %v905_v54 = vshll.u32 %v4247_v39, %v903_v38  ;;  %v1083_v6 = vsel %vm1073_vm5, %v1080_v59, %v1082_v56  ;;  %v1086_v8 = vsel %vm1074_vm6, %v1068_v22, %v1085_v32  ;;  %v1088_v36 = vshll.u32 %v1048_v47, 8 }
 0x121   :  { %v4306_v57 = vadd.f32 %v4060_v35, %v1584_v33  ;;  %v1683_v5 = vmul.f32 %v1584_v33, %v1584_v33  ;;  %1739 = vmatpush1.msra.mxu0 %v1584_v33  ;;  %v906_v29 = vshrl.u32 %v4243_v51, %v904_v60  ;;  %v909_v18 = vadd.s32 127, %v908_v49 }
 0x122   :  { %v918_v16 = vsub.s32 4, %v4219_v7  ;;  %3151 = vmatmul.mubr.msk.f32.vlgmr.msra.gmra.mrb[0].mxu0 %vm1728_vm3, %v4296_v14  ;;  %v1087_v1 = vsel %vm1073_vm5, %v1084_v44, %v1086_v8  ;;  %v4314_v39 = vmul.u32.u64.low %v1088_v36, %v1083_v6  ;;  %v4315_v20 = vmul.u32.u64.high %v1088_v36, %v1083_v6, %v4314_v39 }
 0x123   :  { %v4319_v35 = vadd.f32 %v4232_v50, %v1683_v5  ;;  %v5507_v47 = vand.u32 2147483647, %v3623_v23  ;;  %v907_v22 = vor.u32 %v906_v29, %v905_v54  ;;  %v910_v9 = vshll.u32 %v909_v18, 23 }
 0x124   :  { %v1079_v28 = vsel %vm1073_vm5, %v1076_v41, %v1078_v62  ;;  %v5510_v59 = vmov 0.0   ;;  %v4332_v42 = vadd.f32 %v4237_v34, %v4062_v26  ;;  %v1144_v38 = vand.u32 2147483647, %v5511_v0 }
 0x125   :  { %vm4323_vm10 = vcmp.le.f32.partialorder %v5507_v47, 0.7853982  ;;  %1808 = vmatprep.mubr.f32.mxu0 %v5510_v59  ;;  %v4334_v12 = vmul.u32.u64.low %v1088_v36, %v1087_v1  ;;  %v4335_v50 = vmul.u32.u64.high %v1088_v36, %v1087_v1, %v4334_v12  ;;  %v911_v56 = vor.u32 4788187, %v910_v9 }
 0x126   :  { %v4340_v44 = vadd.f32 %v4240_v61, %v4152_v25  ;;  %v246_v3 = vcombine.high %v4224_v10, %v4224_v10  ;;  %v1159_v41 = vsub.s32 32, %v4187_v30  ;;  %v914_v32 = vcvt.s32.f32 %v907_v22 }
 0x127   :  { %v919_v34 = vsel %vm834_vm8, %v918_v16, %v4219_v7  ;;  %v1095_v33 = vmul.u32 %v1088_v36, %v1079_v28  ;;  %v1098_v60 = vadd.s32 1, %v4315_v20  ;;  %v912_v49 = vand.u32 2147483647, %v911_v56 }
 0x128   :  { %v4350_v62 = vshrl.u32 %v3952_v45, 5  ;;  %v1161_v25 = vshll.u32 %v5470_v48, %v4187_v30  ;;  %v1162_v61 = vshrl.u32 %v5471_v63, %v1159_v41  ;;  %vm1097_vm11 = vc.u32 %v4335_v50, %v4314_v39 }
 0x129   :  { %v1151_v54 = vand.u32 8388607, %v1144_v38  ;;  %v1164_v7 = vshll.u32 %v5471_v63, %v4187_v30  ;;  %v1165_v6 = vshrl.u32 %v5472_v43, %v1159_v41  ;;  %v915_v8 = vmul.f32 %v914_v32, %v912_v49 }
 0x12a   :  { %v1099_v45 = vsel %vm1097_vm11, %v1098_v60, %v4315_v20  ;;  %v1163_v36 = vor.u32 %v1162_v61, %v1161_v25  ;;  %v1167_v5 = vshll.u32 %v5472_v43, %v4187_v30  ;;  %v1168_v16 = vshrl.u32 %v5473_v53, %v1159_v41 }
 0x12b   :  { %v1100_v29 = vadd.s32 %v1099_v45, %v1095_v33  ;;  %v1166_v18 = vor.u32 %v1165_v6, %v1164_v7  ;;  %v1170_v1 = vshll.u32 %v5473_v53, %v4187_v30  ;;  %v916_v47 = vxor.u32 2147483648, %v915_v8 }
 0x12c   :  { %v1171_v22 = vshrl.u32 %v5506_v58, %v1159_v41  ;;  %v1173_v9 = vshll.u32 %v5506_v58, %v4187_v30  ;;  %v1174_v28 = vshrl.u32 %v5482_v4, %v1159_v41  ;;  %v921_v20 = vsel %vm4323_vm10, 0, %v919_v34 }
 0x12d   :  { %v253_v12 = vrot.slane %v4224_v10, %v3555_v13  ;;  %v4377_v56 = vrot.slane %v246_v3, %v3555_v13  ;;  %v1101_v32 = vadd.s32 536870912, %v1100_v29  ;;  %v917_v33 = vsel %vm834_vm8, %v916_v47, %v915_v8 }
 0x12e   :  { %v1169_v60 = vor.u32 %v1168_v16, %v1167_v5  ;;  %v1172_v49 = vor.u32 %v1171_v22, %v1170_v1  ;;  %v1175_v25 = vor.u32 %v1174_v28, %v1173_v9  ;;  %v920_v30 = vsel %vm4323_vm10, %v3623_v23, %v917_v33 }
 0x12f   :  { %v4384_v61 = vshrl.u32 %v1101_v32, 30  ;;  %vm1176_vm13 = vcmp.lt.s32.totalorder %v4350_v62, 1  ;;  %vm1179_vm14 = vcmp.lt.s32.totalorder %v4350_v62, 4  ;;  %3302 = vcosq.f32 %v920_v30 }
 0x130   :  { %v1152_v10 = vor.u32 8388608, %v1151_v54  ;;  %v1184_v3 = vsel %vm1176_vm13, %v1163_v36, %v1166_v18  ;;  %v1185_v34 = vsel %vm1179_vm14, %v1172_v49, 920167782  ;;  %3304 = vsinq.f32 %v920_v30 }
 0x131   :  { %v1103_v7 = vshll.u32 %v4384_v61, 30  ;;  %vm1177_vm15 = vcmp.lt.s32.totalorder %v4350_v62, 2  ;;  %vm1178_vm0 = vcmp.lt.s32.totalorder %v4350_v62, 3  ;;  %v1181_v51 = vsel %vm1179_vm14, %v1169_v60, 2102212464 }
 0x132   :  { %v1186_v6 = vsel %vm1178_vm0, %v1169_v60, %v1185_v34  ;;  %v1188_v8 = vsel %vm1176_vm13, %v1166_v18, %v1169_v60  ;;  %v1189_v45 = vsel %vm1179_vm14, %v1175_v25, 1326507024  ;;  %v1160_v5 = vshrl.u32 %v5470_v48, %v1159_v41 }
 0x133   :  { %v4397_v54 = vsub.s32 %v1100_v29, %v1103_v7  ;;  %v1187_v16 = vsel %vm1177_vm15, %v1184_v3, %v1186_v6  ;;  %v1190_v1 = vsel %vm1178_vm0, %v1172_v49, %v1189_v45  ;;  %v925_v47 = vadd.s32 3, %v921_v20 }
 0x134   :  { %v261_v22 = vcombine.high %v253_v12, %v253_v12  ;;  %v1191_v9 = vsel %vm1177_vm15, %v1188_v8, %v1190_v1  ;;  %v1192_v28 = vshll.u32 %v1152_v10, 8  ;;  %v394_v32 = vrot.slane %v253_v12, %v3570_v27 }
 0x135   :  { %v1106_v33 = vsub.s32 0, %v4397_v54  ;;  %v1180_v29 = vsel %vm1176_vm13, %v1160_v5, %v1163_v36  ;;  %v1182_v41 = vsel %vm1178_vm0, %v1166_v18, %v1181_v51  ;;  %vm924_vm1 = vweird.f32 %v3623_v23  ;;  %v89_v36 = vld [vmem:[#allocation4 + $0xa0] sm:$0xff]  ;;  %v90_v5 = vld [vmem:[#allocation4 + $0xa8] sm:$0xff] }
 0x136   :  { %v4412_v60 = vmul.u32.u64.low %v1192_v28, %v1191_v9  ;;  %v4413_v25 = vmul.u32.u64.high %v1192_v28, %v1191_v9, %v4412_v60  ;;  %v4415_v49 = vmul.u32.u64.low %v1192_v28, %v1187_v16  ;;  %v4416_v20 = vmul.u32.u64.high %v1192_v28, %v1187_v16, %v4415_v49 }
 0x137   :  { %v1512_v12 = vadd.f32 %v4332_v42, %v4104_v19  ;;  %v4424_v30 = vadd.f32 %v4210_v46, %v4062_v26  ;;  %v262_v18 = vcombine.high %v4377_v56, %v4377_v56  ;;  %v3136_v10 = vmin.u32 %v1106_v33, %v4397_v54 }
 0x138   :  { %v926_v3 = vand.u32 3, %v925_v47  ;;  %v1544_v34 = vadd.f32 %v4340_v44, %v4157_v17  ;;  %vm1042_vm2 = vcmp.lt.s32.totalorder %v5500_v15, 0  ;;  %v1183_v7 = vsel %vm1177_vm15, %v1180_v29, %v1182_v41 }
 0x139   :  { %v398_v42 = vrot.slane %v4377_v56, %v3570_v27  ;;  %v5512_v26 = vand.u32 2147483647, %v5500_v15  ;;  %v1108_v51 = vclz %v3136_v10  ;;  %v1126_v6 = vsub.s32 4, %v4384_v61  ;;  %v3303_v8 = vpop.eup %3302 }
 0x13a   :  { %v402_v17 = vrot.slane %v261_v22, %v3570_v27  ;;  %v4444_v44 = vmul.f32 %v394_v32, %v89_v36  ;;  %vm1201_vm5 = vc.u32 %v4413_v25, %v4415_v49  ;;  %v1202_v62 = vadd.s32 1, %v4416_v20  ;;  %v3305_v56 = vpop.eup %3304  ;;  %v91_v32 = vld [vmem:[#allocation4 + $0xb0] sm:$0xff] }
 0x13b   :  { %vm4438_vm4 = vcmp.le.f32.partialorder %v5512_v26, 0.7853982  ;;  %v932_v45 = vxor.u32 2147483648, %v3303_v8  ;;  %v406_v16 = vrot.slane %v262_v18, %v3570_v27  ;;  %v3137_v1 = vadd.s32 4294967294, %v1108_v51  ;;  %v92_v51 = vld [vmem:[#allocation4 + $0xb8] sm:$0xff] }
 0x13c   :  { %5515 = vst [vmem:[#allocation31_spill] sm:$0xff] %v4444_v44  ;;  %v1199_v47 = vmul.u32 %v1192_v28, %v1183_v7  ;;  %vm928_vm6 = vcmp.eq.s32.totalorder %v926_v3, 0  ;;  %v929_v9 = vxor.u32 2147483648, %v3305_v56  ;;  %vm931_vm7 = vcmp.eq.s32.totalorder %v926_v3, 2 }
 0x13d   :  { %v1203_v33 = vsel %vm1201_vm5, %v1202_v62, %v4416_v20  ;;  %v933_v22 = vsel %vm931_vm7, %v932_v45, %v3305_v56  ;;  %vm3138_vm8 = vcmp.lt.s32.totalorder %v3137_v1, 0  ;;  %v1127_v29 = vsel %vm1042_vm2, %v1126_v6, %v4384_v61 }
 0x13e   :  { %v1204_v41 = vadd.s32 %v1203_v33, %v1199_v47  ;;  %vm927_vm9 = vcmp.lt.s32.totalorder %v926_v3, 2  ;;  %v930_v60 = vsel %vm928_vm6, %v3303_v8, %v929_v9  ;;  %v4454_v36 = vmul.f32 %v398_v42, %v90_v5  ;;  %v3376_v42 = vld.sshfl [vmem:[%s5368_s1 + $0x1c] sm:$0x33 pattern:$0x75316420] }
 0x13f   :  { %v1111_v18 = vsel %vm3138_vm8, 0, %v3137_v1  ;;  %v934_v10 = vsel %vm927_vm9, %v930_v60, %v933_v22  ;;  %v1096_v28 = vadd.s32 %v4314_v39, %v4335_v50  ;;  %v4460_v62 = vmul.f32 %v402_v17, %v91_v32 }
 0x140   :  { %5516 = vst [vmem:[#allocation23_spill] sm:$0xff] %v4454_v36  ;;  %v1112_v7 = vsub.s32 32, %v1111_v18  ;;  %v1116_v26 = vsub.s32 4294967266, %v1111_v18  ;;  %v935_v20 = vsel %vm924_vm1, nan, %v934_v10  ;;  %v1129_v61 = vsel %vm4438_vm4, 0, %v1127_v29 }
 0x141   :  { %v1205_v3 = vadd.s32 536870912, %v1204_v41  ;;  %v1458_v39 = vsel %vm623_vm12, %v3623_v23, %v935_v20  ;;  %v1113_v50 = vshll.u32 %v4397_v54, %v1111_v18  ;;  %v4472_v1 = vmul.f32 %v406_v16, %v92_v51 }
 0x142   :  { %v1114_v6 = vshrl.u32 %v1096_v28, %v1112_v7  ;;  %v1117_v8 = vadd.s32 127, %v1116_v26  ;;  %v1498_v56 = vmul.f32 %v1458_v39, %v1458_v39  ;;  %v1530_v45 = vadd.f32 %v1512_v12, %v1458_v39 }
 0x143   :  { %v1661_v17 = vadd.f32 %v4275_v55, %v1458_v39  ;;  %v1206_v5 = vshrl.u32 %v1205_v3, 30  ;;  %v1133_v54 = vadd.s32 3, %v1129_v61  ;;  %vm1146_vm10 = vcmp.lt.s32.totalorder %v5511_v0, 0  ;;  %v5519_v3 = vld [vmem:[#allocation21_spill] sm:$0xff] }
 0x144   :  { %v1115_v47 = vor.u32 %v1114_v6, %v1113_v50  ;;  %v1118_v9 = vshll.u32 %v1117_v8, 23  ;;  %v1562_v33 = vadd.f32 %v1544_v34, %v1498_v56  ;;  %v1570_v22 = vmul.f32 %v1530_v45, %v1530_v45  ;;  %v4507_v39 = vld [vmem:[%s5374_s7 + $0x8] sm:$0xff] }
 0x145   :  { %v4475_v32 = vadd.f32 %v1661_v17, %v4111_v31  ;;  %v1668_v23 = vadd.f32 %v4280_v21, %v1498_v56  ;;  %v1207_v60 = vshll.u32 %v1206_v5, 30  ;;  %v4484_v16 = vmul.f32 %v4444_v44, %v4444_v44  ;;  %3152 = vmatmul.mubr.msk.f32.gmra.mrb[2].mxu0 %vm1728_vm3, %v4507_v39 }
 0x146   :  { %v1119_v29 = vor.u32 4788187, %v1118_v9  ;;  %v1578_v12 = vsub.f32 %v1570_v22, %v1562_v33  ;;  %v4488_v34 = vmul.f32 %v4454_v36, %v4454_v36  ;;  %v1122_v18 = vcvt.s32.f32 %v1115_v47  ;;  %1814 = vmatprep.mubr.f32.mxu0 %v5510_v59  ;;  %v4532_v9 = vld [vmem:[%s5374_s7 + $0x10] sm:$0xff] }
 0x147   :  { %v4480_v55 = vadd.f32 %v1668_v23, %v4120_v2  ;;  %5517 = vst [vmem:[#allocation14_spill] sm:$0xff] %v4484_v16  ;;  %v4490_v21 = vsub.s32 %v1204_v41, %v1207_v60  ;;  %v1519_v10 = vadd.f32 %v4454_v36, %v4444_v44  ;;  %v4496_v2 = vmul.f32 %v4460_v62, %v4460_v62 }
 0x148   :  { %5518 = vst [vmem:[#allocation19_spill] sm:$0xff] %v4488_v34  ;;  %v1120_v31 = vand.u32 2147483647, %v1119_v29  ;;  %v1586_v28 = vmul.f32 0.5, %v1578_v12  ;;  %v4500_v7 = vmul.f32 %v4472_v1, %v4472_v1  ;;  %v294_v26 = vcombine.high %v3376_v42, %v3376_v42 }
 0x149   :  { %v1210_v51 = vsub.s32 0, %v4490_v21  ;;  %v1230_v61 = vsub.s32 4, %v1206_v5  ;;  %v5435_v41 = vand.u32 2147483647, %v5519_v3  ;;  %v4512_v8 = vand.u32 3, %v1133_v54  ;;  %3153 = vmatmul.mubr.msk.f32.gmra.mrb[4].mxu0 %vm1728_vm3, %v4532_v9 }
 0x14a   :  { %v1123_v20 = vmul.f32 %v1122_v18, %v1120_v31  ;;  %v4510_v50 = vadd.f32 %v4306_v57, %v1586_v28  ;;  %v1685_v6 = vmul.f32 %v1586_v28, %v1586_v28  ;;  %1822 = vmatpush1.msra.mxu1 %v1586_v28  ;;  %v4516_v56 = vadd.f32 %v4488_v34, %v4484_v16 }
 0x14b   :  { %3154 = vmatmul.mubr.msk.f32.vlgmr.msra.gmra.mrb[0].mxu1 %vm1728_vm3, %v4296_v14  ;;  %v1200_v17 = vadd.s32 %v4415_v49, %v4413_v25  ;;  %v3140_v57 = vmin.u32 %v1210_v51, %v4490_v21  ;;  %v4526_v47 = vadd.f32 %v1519_v10, %v4460_v62  ;;  %v4538_v22 = vrot.slane %v3376_v42, %v3555_v13 }
 0x14c   :  { %5520 = vst [vmem:[#allocation21_spill] sm:$0xff] %v4510_v50  ;;  %v1124_v45 = vxor.u32 2147483648, %v1123_v20  ;;  %v4535_v33 = vadd.f32 %v4319_v35, %v1685_v6  ;;  %v4541_v25 = vrot.slane %v294_v26, %v3555_v13  ;;  %v1367_v49 = vsub.s32 32, %v4197_v24  ;;  %1891 = vmatprep.mubr.f32.mxu1 %v5510_v59  ;;  %1968 = vmatprep.mubr.f32.mxu0 %v5510_v59 }
 0x14d   :  { %v1212_v29 = vclz %v3140_v57  ;;  %v4549_v54 = vsel %vm1146_vm10, %v1230_v61, %v1206_v5  ;;  %v1359_v35 = vand.u32 8388607, %v5435_v41  ;;  %v4557_v60 = vshrl.u32 %v4175_v52, 5 }
 0x14e   :  { %5521 = vst [vmem:[#allocation36_spill] sm:$0xff] %v4535_v33  ;;  %v1125_v23 = vsel %vm1042_vm2, %v1124_v45, %v1123_v20  ;;  %v1369_v12 = vshll.u32 %v5470_v48, %v4197_v24  ;;  %v1370_v31 = vshrl.u32 %v5471_v63, %v1367_v49  ;;  %v1372_v18 = vshll.u32 %v5471_v63, %v4197_v24 }
 0x14f   :  { %v1128_v42 = vsel %vm4438_vm4, %v5500_v15, %v1125_v23  ;;  %v3141_v5 = vadd.s32 4294967294, %v1212_v29  ;;  %v1373_v10 = vshrl.u32 %v5472_v43, %v1367_v49  ;;  %3155 = vmatmul.mubr.msk.f32.gmra.mrb[2].mxu1 %vm1728_vm3, %v4507_v39  ;;  %v1375_v46 = vshll.u32 %v5472_v43, %v4197_v24 }
 0x150   :  { %3306 = vcosq.f32 %v1128_v42  ;;  %v1371_v52 = vor.u32 %v1370_v31, %v1369_v12  ;;  %v1376_v28 = vshrl.u32 %v5473_v53, %v1367_v49  ;;  %1897 = vmatprep.mubr.f32.mxu1 %v5510_v59  ;;  %v1378_v20 = vshll.u32 %v5473_v53, %v4197_v24 }
 0x151   :  { %3308 = vsinq.f32 %v1128_v42  ;;  %vm3142_vm11 = vcmp.lt.s32.totalorder %v3141_v5, 0  ;;  %v1374_v26 = vor.u32 %v1373_v10, %v1372_v18  ;;  %v1379_v51 = vshrl.u32 %v5506_v58, %v1367_v49 }
 0x152   :  { %v1215_v61 = vsel %vm3142_vm11, 0, %v3141_v5  ;;  %v1377_v6 = vor.u32 %v1376_v28, %v1375_v46  ;;  %v1381_v45 = vshll.u32 %v5506_v58, %v4197_v24  ;;  %v1382_v57 = vshrl.u32 %v5482_v4, %v1367_v49 }
 0x153   :  { %vm1139_vm13 = vcmp.eq.s32.totalorder %v4512_v8, 2  ;;  %v1216_v23 = vsub.s32 32, %v1215_v61  ;;  %v1220_v29 = vsub.s32 4294967266, %v1215_v61  ;;  %v1360_v42 = vor.u32 8388608, %v1359_v35  ;;  %3156 = vmatmul.mubr.msk.f32.gmra.mrb[4].mxu1 %vm1728_vm3, %v4532_v9 }
 0x154   :  { %v1380_v12 = vor.u32 %v1379_v51, %v1378_v20  ;;  %vm1136_vm14 = vcmp.eq.s32.totalorder %v4512_v8, 0  ;;  %vm4586_vm15 = vcmp.le.f32.partialorder %v1144_v38, 0.7853982  ;;  %v1217_v24 = vshll.u32 %v4490_v21, %v1215_v61  ;;  %2051 = vmatprep.mubr.f32.mxu1 %v5510_v59 }
 0x155   :  { %v1368_v5 = vshrl.u32 %v5470_v48, %v1367_v49  ;;  %v1383_v18 = vor.u32 %v1382_v57, %v1381_v45  ;;  %vm1384_vm0 = vcmp.lt.s32.totalorder %v4557_v60, 1  ;;  %vm1135_vm1 = vcmp.lt.s32.totalorder %v4512_v8, 2  ;;  %v3377_v8 = vld.sshfl [vmem:[%s5368_s1 + $0x10] sm:$0x33 pattern:$0x75316420] }
 0x156   :  { %v1218_v35 = vshrl.u32 %v1200_v17, %v1216_v23  ;;  %v1221_v10 = vadd.s32 127, %v1220_v29  ;;  %vm1385_vm2 = vcmp.lt.s32.totalorder %v4557_v60, 2  ;;  %vm1387_vm4 = vcmp.lt.s32.totalorder %v4557_v60, 4 }
 0x157   :  { %vm1132_vm5 = vweird.f32 %v5500_v15  ;;  %vm1386_vm6 = vcmp.lt.s32.totalorder %v4557_v60, 3  ;;  %v1389_v38 = vsel %vm1387_vm4, %v1377_v6, 2102212464  ;;  %v1392_v21 = vsel %vm1384_vm0, %v1371_v52, %v1374_v26 }
 0x158   :  { %v1393_v49 = vsel %vm1387_vm4, %v1380_v12, 920167782  ;;  %v1219_v46 = vor.u32 %v1218_v35, %v1217_v24  ;;  %v1222_v28 = vshll.u32 %v1221_v10, 23  ;;  %v1396_v17 = vsel %vm1384_vm0, %v1374_v26, %v1377_v6 }
 0x159   :  { %v1394_v20 = vsel %vm1386_vm6, %v1377_v6, %v1393_v49  ;;  %v1388_v51 = vsel %vm1384_vm0, %v1368_v5, %v1371_v52  ;;  %v1397_v45 = vsel %vm1387_vm4, %v1383_v18, 1326507024  ;;  %v1400_v57 = vshll.u32 %v1360_v42, 8 }
 0x15a   :  { %v1395_v61 = vsel %vm1385_vm2, %v1392_v21, %v1394_v20  ;;  %v3307_v23 = vpop.eup %3306  ;;  %v1223_v29 = vor.u32 4788187, %v1222_v28  ;;  %v1226_v41 = vcvt.s32.f32 %v1219_v46  ;;  %v1390_v24 = vsel %vm1386_vm6, %v1374_v26, %v1389_v38 }
 0x15b   :  { %v1398_v35 = vsel %vm1386_vm6, %v1380_v12, %v1397_v45  ;;  %v3309_v10 = vpop.eup %3308  ;;  %v1140_v49 = vxor.u32 2147483648, %v3307_v23  ;;  %v4615_v52 = vmul.u32.u64.low %v1400_v57, %v1395_v61  ;;  %v4616_v5 = vmul.u32.u64.high %v1400_v57, %v1395_v61, %v4615_v52 }
 0x15c   :  { %v1399_v6 = vsel %vm1385_vm2, %v1396_v17, %v1398_v35  ;;  %v1137_v18 = vxor.u32 2147483648, %v3309_v10  ;;  %v1224_v42 = vand.u32 2147483647, %v1223_v29  ;;  %v1552_v12 = vadd.f32 %v4516_v56, %v4496_v2 }
 0x15d   :  { %v4619_v21 = vmul.u32.u64.low %v1400_v57, %v1399_v6  ;;  %v4620_v28 = vmul.u32.u64.high %v1400_v57, %v1399_v6, %v4619_v21  ;;  %v1141_v26 = vsel %vm1139_vm13, %v1140_v49, %v3309_v10  ;;  %v309_v38 = vcombine.high %v4538_v22, %v4538_v22 }
 0x15e   :  { %v1391_v46 = vsel %vm1385_vm2, %v1388_v51, %v1390_v24  ;;  %v1138_v20 = vsel %vm1136_vm14, %v3307_v23, %v1137_v18  ;;  %v1227_v17 = vmul.f32 %v1226_v41, %v1224_v42  ;;  %v1233_v61 = vsel %vm4586_vm15, 0, %v4549_v54  ;;  %v97_v24 = vld [vmem:[#allocation4 + $0xe0] sm:$0xff] }
 0x15f   :  { %v310_v45 = vcombine.high %v4541_v25, %v4541_v25  ;;  %v1142_v56 = vsel %vm1135_vm1, %v1138_v20, %v1141_v26  ;;  %v426_v29 = vrot.slane %v4538_v22, %v3570_v27  ;;  %v430_v60 = vrot.slane %v4541_v25, %v3570_v27  ;;  %v98_v25 = vld [vmem:[#allocation4 + $0xe8] sm:$0xff] }
 0x160   :  { %v1410_v51 = vadd.s32 1, %v4616_v5  ;;  %v1143_v41 = vsel %vm1132_vm5, nan, %v1142_v56  ;;  %v1228_v23 = vxor.u32 2147483648, %v1227_v17  ;;  %v1407_v54 = vmul.u32 %v1400_v57, %v1391_v46  ;;  %v5526_v56 = vld [vmem:[#allocation25_spill] sm:$0xff] }
 0x161   :  { %vm1409_vm7 = vc.u32 %v4620_v28, %v4615_v52  ;;  %v1237_v35 = vadd.s32 3, %v1233_v61  ;;  %v4654_v22 = vsel %vm623_vm12, %v5500_v15, %v1143_v41  ;;  %v434_v10 = vrot.slane %v309_v38, %v3570_v27  ;;  %v99_v38 = vld [vmem:[#allocation4 + $0xf0] sm:$0xff] }
 0x162   :  { %v1411_v49 = vsel %vm1409_vm7, %v1410_v51, %v4616_v5  ;;  %v1229_v57 = vsel %vm1146_vm10, %v1228_v23, %v1227_v17  ;;  %v4662_v6 = vmul.f32 %v4654_v22, %v4654_v22  ;;  %v4666_v18 = vadd.f32 %v4475_v32, %v4654_v22  ;;  %v100_v17 = vld [vmem:[#allocation4 + $0xf8] sm:$0xff]  ;;  %v85_v51 = vld [vmem:[#allocation4 + $0x80] sm:$0xff] }
 0x163   :  { %v1412_v42 = vadd.s32 %v1411_v49, %v1407_v54  ;;  %v1232_v15 = vsel %vm4586_vm15, %v5511_v0, %v1229_v57  ;;  %v438_v21 = vrot.slane %v310_v45, %v3570_v27  ;;  %v4672_v26 = vmul.f32 %v426_v29, %v97_v24 }
 0x164   :  { %3310 = vcosq.f32 %v1232_v15  ;;  %v4676_v5 = vadd.f32 %v4480_v55, %v4662_v6  ;;  %v4678_v46 = vmul.f32 %v430_v60, %v98_v25  ;;  %v4680_v32 = vand.u32 3, %v1237_v35  ;;  %v86_v25 = vld [vmem:[#allocation4 + $0x88] sm:$0xff] }
 0x165   :  { %5524 = vst [vmem:[#allocation37_spill] sm:$0xff] %v4672_v26  ;;  %v1413_v20 = vadd.s32 536870912, %v1412_v42  ;;  %3312 = vsinq.f32 %v1232_v15  ;;  %v222_v61 = vcombine.high %v3377_v8, %v3377_v8  ;;  %v229_v31 = vrot.slane %v3377_v8, %v3555_v13 }
 0x166   :  { %5525 = vst [vmem:[#allocation38_spill] sm:$0xff] %v4678_v46  ;;  %v4685_v45 = vadd.f32 %v4167_v37, %v5526_v56  ;;  %v4689_v29 = vadd.f32 %v4526_v47, %v4472_v1  ;;  %v4692_v55 = vadd.f32 %v1552_v12, %v4500_v7  ;;  %v4696_v41 = vmul.f32 %v434_v10, %v99_v38  ;;  %v3378_v37 = vld.sshfl [vmem:[%s5368_s1 + $0x18] sm:$0x33 pattern:$0x75316420] }
 0x167   :  { %v4694_v60 = vshrl.u32 %v1413_v20, 30  ;;  %v236_v23 = vrot.slane %v222_v61, %v3555_v13  ;;  %v237_v24 = vcombine.high %v229_v31, %v229_v31  ;;  %v378_v54 = vrot.slane %v229_v31, %v3570_v27  ;;  %v87_v10 = vld [vmem:[#allocation4 + $0x90] sm:$0xff] }
 0x168   :  { %v4703_v8 = vmul.f32 %v438_v21, %v100_v17  ;;  %v4708_v12 = vmul.f32 %v4672_v26, %v4672_v26  ;;  %v4712_v35 = vmul.f32 %v4678_v46, %v4678_v46  ;;  %vm1240_vm8 = vcmp.eq.s32.totalorder %v4680_v32, 0  ;;  %v88_v17 = vld [vmem:[#allocation4 + $0x98] sm:$0xff] }
 0x169   :  { %v1415_v47 = vshll.u32 %v4694_v60, 30  ;;  %v238_v49 = vcombine.high %v236_v23, %v236_v23  ;;  %v382_v57 = vrot.slane %v236_v23, %v3570_v27  ;;  %v386_v15 = vrot.slane %v237_v24, %v3570_v27 }
 0x16a   :  { %5527 = vst [vmem:[#allocation25_spill] sm:$0xff] %v4708_v12  ;;  %5528 = vst [vmem:[#allocation39_spill] sm:$0xff] %v4712_v35  ;;  %v4717_v21 = vmul.f32 %v378_v54, %v85_v51  ;;  %vm1239_vm9 = vcmp.lt.s32.totalorder %v4680_v32, 2  ;;  %vm1243_vm10 = vcmp.eq.s32.totalorder %v4680_v32, 2  ;;  %v1525_v20 = vadd.f32 %v4678_v46, %v4672_v26 }
 0x16b   :  { %v4721_v38 = vsub.s32 %v1412_v42, %v1415_v47  ;;  %vm1236_vm11 = vweird.f32 %v5511_v0  ;;  %vm1354_vm13 = vcmp.lt.s32.totalorder %v5519_v3, 0  ;;  %v4729_v61 = vmul.f32 %v4696_v41, %v4696_v41 }
 0x16c   :  { %5529 = vst [vmem:[#allocation40_spill] sm:$0xff] %v4717_v21  ;;  %v390_v31 = vrot.slane %v238_v49, %v3570_v27  ;;  %v4732_v56 = vmul.f32 %v382_v57, %v86_v25  ;;  %v4734_v51 = vmul.f32 %v386_v15, %v87_v10  ;;  %v4739_v23 = vmul.f32 %v4703_v8, %v4703_v8 }
 0x16d   :  { %v1418_v42 = vsub.s32 0, %v4721_v38  ;;  %v1557_v24 = vadd.f32 %v4712_v35, %v4708_v12  ;;  %v4745_v54 = vmul.f32 %v4717_v21, %v4717_v21  ;;  %v1408_v15 = vadd.s32 %v4615_v52, %v4620_v28 }
 0x16e   :  { %5530 = vst [vmem:[#allocation41_spill] sm:$0xff] %v4732_v56  ;;  %v4747_v47 = vmul.f32 %v390_v31, %v88_v17  ;;  %v4751_v25 = vmul.f32 %v4732_v56, %v4732_v56  ;;  %v4755_v10 = vmul.f32 %v4734_v51, %v4734_v51  ;;  %v1516_v49 = vadd.f32 %v4732_v56, %v4717_v21  ;;  %v3311_v57 = vpop.eup %3310  ;;  %v5536_v56 = vld [vmem:[#allocation20_spill] sm:$0xff] }
 0x16f   :  { %5531 = vst [vmem:[#allocation42_spill] sm:$0xff] %v4745_v54  ;;  %v3148_v12 = vmin.u32 %v1418_v42, %v4721_v38  ;;  %v1526_v17 = vadd.f32 %v1525_v20, %v4696_v41  ;;  %v270_v31 = vcombine.high %v3378_v37, %v3378_v37  ;;  %v3313_v26 = vpop.eup %3312  ;;  %v1244_v16 = vxor.u32 2147483648, %v3311_v57 }
 0x170   :  { %5532 = vst [vmem:[#allocation43_spill] sm:$0xff] %v4751_v25  ;;  %v4765_v44 = vmul.f32 %v4747_v47, %v4747_v47  ;;  %v1517_v33 = vadd.f32 %v1516_v49, %v4734_v51  ;;  %v1548_v21 = vadd.f32 %v4751_v25, %v4745_v54  ;;  %v1241_v50 = vxor.u32 2147483648, %v3313_v26 }
 0x171   :  { %v5533_v35 = vand.u32 2147483647, %v5519_v3  ;;  %v1420_v28 = vclz %v3148_v12  ;;  %v1438_v20 = vsub.s32 4, %v4694_v60  ;;  %v4778_v42 = vrot.slane %v3378_v37, %v3555_v13 }
 0x172   :  { %v1245_v46 = vsel %vm1243_vm10, %v1244_v16, %v3313_v26  ;;  %v4783_v49 = vadd.f32 %v1557_v24, %v4729_v61  ;;  %v1518_v54 = vadd.f32 %v1517_v33, %v4747_v47  ;;  %v1549_v34 = vadd.f32 %v1548_v21, %v4755_v10 }
 0x173   :  { %vm4772_vm14 = vcmp.le.f32.partialorder %v5533_v35, 0.7853982  ;;  %v1242_v35 = vsel %vm1240_vm8, %v3311_v57, %v1241_v50  ;;  %v3149_v36 = vadd.s32 4294967294, %v1420_v28  ;;  %v4790_v12 = vadd.f32 %v1526_v17, %v4703_v8 }
 0x174   :  { %v1248_v37 = vand.u32 2147483647, %v5536_v56  ;;  %v1246_v25 = vsel %vm1239_vm9, %v1242_v35, %v1245_v46  ;;  %v1532_v16 = vadd.f32 %v1518_v54, %v4654_v22  ;;  %v1550_v26 = vadd.f32 %v1549_v34, %v4765_v44 }
 0x175   :  { %v4798_v33 = vrot.slane %v270_v31, %v3555_v13  ;;  %v1247_v21 = vsel %vm1236_vm11, nan, %v1246_v25  ;;  %vm3150_vm15 = vcmp.lt.s32.totalorder %v3149_v36, 0  ;;  %v4805_v50 = vsel %vm1354_vm13, %v1438_v20, %v4694_v60 }
 0x176   :  { %v285_v32 = vcombine.high %v4778_v42, %v4778_v42  ;;  %v1461_v22 = vsel %vm623_vm12, %v5511_v0, %v1247_v21  ;;  %v1423_v34 = vsel %vm3150_vm15, 0, %v3149_v36  ;;  %v1564_v13 = vadd.f32 %v1550_v26, %v4662_v6 }
 0x177   :  { %v1572_v46 = vmul.f32 %v1532_v16, %v1532_v16  ;;  %v1501_v24 = vmul.f32 %v1461_v22, %v1461_v22  ;;  %v1533_v54 = vadd.f32 %v4689_v29, %v1461_v22  ;;  %v4815_v25 = vadd.f32 %v4666_v18, %v1461_v22 }
 0x178   :  { %v1424_v57 = vsub.s32 32, %v1423_v34  ;;  %v1425_v60 = vshll.u32 %v4721_v38, %v1423_v34  ;;  %v1428_v17 = vsub.s32 4294967266, %v1423_v34  ;;  %v286_v28 = vcombine.high %v4798_v33, %v4798_v33 }
 0x179   :  { %v1580_v31 = vsub.f32 %v1572_v46, %v1564_v13  ;;  %v1565_v0 = vadd.f32 %v4692_v55, %v1501_v24  ;;  %v1573_v36 = vmul.f32 %v1533_v54, %v1533_v54  ;;  %v4822_v6 = vadd.f32 %v4676_v5, %v1501_v24 }
 0x17a   :  { %v1426_v20 = vshrl.u32 %v1408_v15, %v1424_v57  ;;  %v1429_v35 = vadd.s32 127, %v1428_v17  ;;  %v1441_v18 = vsel %vm4772_vm14, 0, %v4805_v50  ;;  %v418_v29 = vrot.slane %v285_v32, %v3570_v27 }
 0x17b   :  { %v1263_v38 = vsub.s32 32, %v4193_v40  ;;  %v1581_v16 = vsub.f32 %v1573_v36, %v1565_v0  ;;  %v4829_v21 = vmul.f32 0.5, %v1580_v31  ;;  %v1255_v55 = vand.u32 8388607, %v1248_v37 }
 0x17c   :  { %v1427_v26 = vor.u32 %v1426_v20, %v1425_v60  ;;  %v1430_v22 = vshll.u32 %v1429_v35, 23  ;;  %v1265_v5 = vshll.u32 %v5470_v48, %v4193_v40  ;;  %v1268_v50 = vshll.u32 %v5471_v63, %v4193_v40 }
 0x17d   :  { %v1266_v15 = vshrl.u32 %v5471_v63, %v1263_v38  ;;  %v4838_v34 = vmul.f32 0.5, %v1581_v16  ;;  %v1269_v32 = vshrl.u32 %v5472_v43, %v1263_v38  ;;  %v1271_v13 = vshll.u32 %v5472_v43, %v4193_v40 }
 0x17e   :  { %v1272_v46 = vshrl.u32 %v5473_v53, %v1263_v38  ;;  %v1431_v24 = vor.u32 4788187, %v1430_v22  ;;  %v1274_v57 = vshll.u32 %v5473_v53, %v4193_v40  ;;  %v1275_v60 = vshrl.u32 %v5506_v58, %v1263_v38  ;;  %v5537_v22 = vld [vmem:[#allocation30_spill] sm:$0xff] }
 0x17f   :  { %v1267_v54 = vor.u32 %v1266_v15, %v1265_v5  ;;  %1904 = vmatprep.subr.mxu0 %v4838_v34  ;;  %v1434_v17 = vcvt.s32.f32 %v1427_v26  ;;  %v1256_v63 = vor.u32 8388608, %v1255_v55  ;;  %v1270_v31 = vor.u32 %v1269_v32, %v1268_v50 }
 0x180   :  { %v1273_v0 = vor.u32 %v1272_v46, %v1271_v13  ;;  %v1432_v36 = vand.u32 2147483647, %v1431_v24  ;;  %1905 = vmatpush1.msra.mxu0 %v4829_v21  ;;  %v1276_v20 = vor.u32 %v1275_v60, %v1274_v57  ;;  %v1277_v43 = vshll.u32 %v5506_v58, %v4193_v40  ;;  %v96_v57 = vld [vmem:[#allocation4 + $0xd8] sm:$0xff] }
 0x181   :  { %v1278_v35 = vshrl.u32 %v5482_v4, %v1263_v38  ;;  %v422_v16 = vrot.slane %v286_v28, %v3570_v27  ;;  %v1264_v53 = vshrl.u32 %v5470_v48, %v1263_v38  ;;  %vm1280_vm0 = vcmp.lt.s32.totalorder %v5537_v22, 1  ;;  %3157 = vmatmul.mubr.msk.f32.vlgmr.msra.gmra.mrb[6].mxu0 %vm1728_vm3, %v4296_v14  ;;  %v95_v38 = vld [vmem:[#allocation4 + $0xd0] sm:$0xff] }
 0x182   :  { %vm1283_vm1 = vcmp.lt.s32.totalorder %v5537_v22, 4  ;;  %v1435_v26 = vmul.f32 %v1434_v17, %v1432_v36  ;;  %v1288_v15 = vsel %vm1280_vm0, %v1267_v54, %v1270_v31  ;;  %1974 = vmatprep.mubr.f32.mxu0 %v5510_v59  ;;  %vm1281_vm2 = vcmp.lt.s32.totalorder %v5537_v22, 2 }
 0x183   :  { %v1279_v55 = vor.u32 %v1278_v35, %v1277_v43  ;;  %v1285_v5 = vsel %vm1283_vm1, %v1273_v0, 2102212464  ;;  %vm1282_vm4 = vcmp.lt.s32.totalorder %v5537_v22, 3  ;;  %v1289_v48 = vsel %vm1283_vm1, %v1276_v20, 920167782 }
 0x184   :  { %v1292_v4 = vsel %vm1280_vm0, %v1270_v31, %v1273_v0  ;;  %v1436_v40 = vxor.u32 2147483648, %v1435_v26  ;;  %v1290_v58 = vsel %vm1282_vm4, %v1273_v0, %v1289_v48  ;;  %v1296_v14 = vshll.u32 %v1256_v63, 8 }
 0x185   :  { %v1293_v28 = vsel %vm1283_vm1, %v1279_v55, 1326507024  ;;  %v1284_v50 = vsel %vm1280_vm0, %v1264_v53, %v1267_v54  ;;  %v1286_v32 = vsel %vm1282_vm4, %v1270_v31, %v1285_v5  ;;  %v1291_v13 = vsel %vm1281_vm2, %v1288_v15, %v1290_v58  ;;  %3158 = vmatmul.mubr.msk.f32.gmra.mrb[8].mxu0 %vm1728_vm3, %v4507_v39  ;;  %v5539_v55 = vld [vmem:[#allocation27_spill] sm:$0xff]  ;;  %v5541_v15 = vld [vmem:[#allocation16_spill] sm:$0xff] }
 0x186   :  { %v1294_v46 = vsel %vm1282_vm4, %v1276_v20, %v1293_v28  ;;  %v1437_v24 = vsel %vm1354_vm13, %v1436_v40, %v1435_v26  ;;  %v4875_v17 = vmul.u32.u64.low %v1296_v14, %v1291_v13  ;;  %v4876_v63 = vmul.u32.u64.high %v1296_v14, %v1291_v13, %v4875_v17  ;;  %1980 = vmatprep.mubr.f32.mxu0 %v5510_v59  ;;  %v5538_v26 = vld [vmem:[#allocation13_spill] sm:$0xff] }
 0x187   :  { %v1295_v60 = vsel %vm1281_vm2, %v1292_v4, %v1294_v46  ;;  %v1440_v54 = vsel %vm4772_vm14, %v5519_v3, %v1437_v24  ;;  %v1445_v31 = vadd.s32 3, %v1441_v18  ;;  %v414_v20 = vrot.slane %v4798_v33, %v3570_v27  ;;  %v5540_v18 = vld [vmem:[#allocation34_spill] sm:$0xff]  ;;  %v5542_v4 = vld [vmem:[#allocation24_spill] sm:$0xff] }
 0x188   :  { %v4883_v0 = vmul.u32.u64.low %v1296_v14, %v1295_v60  ;;  %v4884_v36 = vmul.u32.u64.high %v1296_v14, %v1295_v60, %v4883_v0  ;;  %3314 = vcosq.f32 %v1440_v54  ;;  %v4888_v43 = vmul.f32 %v418_v29, %v95_v38 }
 0x189   :  { %v1287_v35 = vsel %vm1281_vm2, %v1284_v50, %v1286_v32  ;;  %3316 = vsinq.f32 %v1440_v54  ;;  %v4892_v53 = vmul.f32 %v422_v16, %v96_v57  ;;  %v1614_v52 = vadd.f32 %v5538_v26, %v4104_v19  ;;  %3159 = vmatmul.mubr.msk.f32.gmra.mrb[10].mxu0 %vm1728_vm3, %v4532_v9  ;;  %v94_v32 = vld [vmem:[#allocation4 + $0xc8] sm:$0xff]  ;;  %v5544_v54 = vld [vmem:[#allocation11_spill] sm:$0xff] }
 0x18a   :  { %v1643_v5 = vadd.f32 %v5540_v18, %v5539_v55  ;;  %v1687_v33 = vmul.f32 %v4829_v21, %v4829_v21  ;;  %v1306_v29 = vadd.s32 1, %v4876_v63  ;;  %v1608_v22 = vadd.f32 %v4424_v30, %v5541_v15  ;;  %2387 = vmatprep.mubr.f32.mxu0 %v5510_v59  ;;  %v5546_v0 = vld [vmem:[#allocation18_spill] sm:$0xff] }
 0x18b   :  { %v1637_v16 = vadd.f32 %v4685_v45, %v4755_v10  ;;  %v1688_v19 = vmul.f32 %v4838_v34, %v4838_v34  ;;  %v1303_v48 = vmul.u32 %v1296_v14, %v1287_v35  ;;  %vm1305_vm5 = vc.u32 %v4884_v36, %v4875_v17  ;;  %v5547_v18 = vld [vmem:[#allocation26_spill] sm:$0xff] }
 0x18c   :  { %v1615_v40 = vadd.f32 %v1614_v52, %v5542_v4  ;;  %v1446_v58 = vand.u32 3, %v1445_v31  ;;  %v1307_v28 = vsel %vm1305_vm5, %v1306_v29, %v4876_v63  ;;  %v1644_v38 = vadd.f32 %v1643_v5, %v4765_v44  ;;  %v5545_v31 = vld [vmem:[#allocation35_spill] sm:$0xff] }
 0x18d   :  { %v1609_v30 = vadd.f32 %v1608_v22, %v4734_v51  ;;  %v1308_v50 = vadd.s32 %v1307_v28, %v1303_v48  ;;  %v4918_v45 = vmul.f32 %v4888_v43, %v4888_v43  ;;  %v1638_v14 = vadd.f32 %v1637_v16, %v4496_v2 }
 0x18e   :  { %v1616_v10 = vadd.f32 %v1615_v40, %v4747_v47  ;;  %v4924_v13 = vmul.f32 %v4892_v53, %v4892_v53  ;;  %v1645_v46 = vadd.f32 %v1644_v38, %v4500_v7  ;;  %v4930_v51 = vadd.f32 %v4838_v34, %v4829_v21  ;;  %v5543_v7 = vld [vmem:[#allocation29_spill] sm:$0xff] }
 0x18f   :  { %v1610_v44 = vadd.f32 %v1609_v30, %v4460_v62  ;;  %vm1444_vm6 = vweird.f32 %v5519_v3  ;;  %v1309_v24 = vadd.s32 536870912, %v1308_v50  ;;  %v1639_v2 = vadd.f32 %v1638_v14, %v4918_v45 }
 0x190   :  { %v1617_v47 = vadd.f32 %v1616_v10, %v4472_v1  ;;  %v4935_v57 = vadd.f32 %v1688_v19, %v1687_v33  ;;  %v1646_v60 = vadd.f32 %v1645_v46, %v4924_v13  ;;  %v1599_v62 = vadd.f32 %v5544_v54, %v5543_v7  ;;  %v5548_v33 = vld [vmem:[#allocation22_spill] sm:$0xff]  ;;  %v5553_v7 = vld [vmem:[#allocation19_spill] sm:$0xff] }
 0x191   :  { %v1611_v63 = vadd.f32 %v1610_v44, %v4888_v43  ;;  %v1628_v21 = vadd.f32 %v5546_v0, %v5545_v31  ;;  %vm1451_vm7 = vcmp.eq.s32.totalorder %v1446_v58, 2  ;;  %v4943_v34 = vmul.f32 %v414_v20, %v94_v32  ;;  %v5551_v32 = vld [vmem:[#allocation41_spill] sm:$0xff]  ;;  %v5554_v31 = vld [vmem:[#allocation32_spill] sm:$0xff]  ;;  %v5555_v0 = vld [vmem:[#allocation10_spill] sm:$0xff] }
 0x192   :  { %v4945_v35 = vshrl.u32 %v1309_v24, 30  ;;  %v1618_v1 = vadd.f32 %v1617_v47, %v4892_v53  ;;  %v3315_v26 = vpop.eup %3314  ;;  %v4950_v55 = vadd.f32 %v1639_v2, %v4729_v61  ;;  %v1600_v5 = vadd.f32 %v1599_v62, %v5547_v18  ;;  %v5550_v61 = vld [vmem:[#allocation43_spill] sm:$0xff] }
 0x193   :  { %v1612_v52 = vadd.f32 %v1611_v63, %v4696_v41  ;;  %v1629_v29 = vadd.f32 %v1628_v21, %v5548_v33  ;;  %v3317_v15 = vpop.eup %3316  ;;  %v1452_v22 = vxor.u32 2147483648, %v3315_v26  ;;  %v4957_v19 = vadd.f32 %v1646_v60, %v4739_v23  ;;  %v5549_v41 = vld [vmem:[#allocation15_spill] sm:$0xff]  ;;  %v93_v33 = vld [vmem:[#allocation4 + $0xc0] sm:$0xff] }
 0x194   :  { %v1311_v16 = vshll.u32 %v4945_v35, 30  ;;  %v1619_v20 = vadd.f32 %v1618_v1, %v4703_v8  ;;  %v1449_v48 = vxor.u32 2147483648, %v3317_v15  ;;  %v1601_v40 = vadd.f32 %v1600_v5, %v5549_v41  ;;  %v5552_v60 = vld [vmem:[#allocation23_spill] sm:$0xff] }
 0x195   :  { %v4959_v4 = vmul.f32 %v1612_v52, %v1612_v52  ;;  %v1630_v28 = vadd.f32 %v1629_v29, %v5550_v61  ;;  %vm1448_vm8 = vcmp.eq.s32.totalorder %v1446_v58, 0  ;;  %v1453_v38 = vsel %vm1451_vm7, %v1452_v22, %v3317_v15  ;;  %v5557_v22 = vld [vmem:[#allocation38_spill] sm:$0xff] }
 0x196   :  { %v1312_v30 = vsub.s32 %v1308_v50, %v1311_v16  ;;  %v4964_v10 = vmul.f32 %v1619_v20, %v1619_v20  ;;  %vm1447_vm9 = vcmp.lt.s32.totalorder %v1446_v58, 2  ;;  %v1450_v14 = vsel %vm1448_vm8, %v3315_v26, %v1449_v48  ;;  %v5558_v20 = vld [vmem:[#allocation39_spill] sm:$0xff] }
 0x197   :  { %v1654_v8 = vsub.f32 %v4959_v4, %v4950_v55  ;;  %v1602_v46 = vadd.f32 %v1601_v40, %v5551_v32  ;;  %v1454_v44 = vsel %vm1447_vm9, %v1450_v14, %v1453_v38  ;;  %v1559_v24 = vadd.f32 %v4783_v49, %v4739_v23  ;;  %v5559_v40 = vld [vmem:[#allocation12_spill] sm:$0xff]  ;;  %v5562_v14 = vld [vmem:[#allocation21_spill] sm:$0xff] }
 0x198   :  { %v1314_v47 = vsub.s32 0, %v1312_v30  ;;  %v1655_v2 = vsub.f32 %v4964_v10, %v4957_v19  ;;  %v1455_v50 = vsel %vm1444_vm6, nan, %v1454_v44  ;;  %v4977_v58 = vmul.f32 %v4943_v34, %v4943_v34 }
 0x199   :  { %v1603_v63 = vadd.f32 %v1602_v46, %v5552_v60  ;;  %v1631_v54 = vadd.f32 %v1630_v28, %v5553_v7  ;;  %v4984_v62 = vsel %vm623_vm12, %v5519_v3, %v1455_v50  ;;  %v410_v23 = vrot.slane %v4778_v42, %v3570_v27  ;;  %v5556_v3 = vld [vmem:[#allocation33_spill] sm:$0xff]  ;;  %v5561_v28 = vld [vmem:[#allocation28_spill] sm:$0xff]  ;;  %v5565_v7 = vld [vmem:[#allocation42_spill] sm:$0xff] }
 0x19a   :  { %v3144_v49 = vmin.u32 %v1314_v47, %v1312_v30  ;;  %v1593_v21 = vadd.f32 %v5555_v0, %v5554_v31  ;;  %v4992_v1 = vmul.f32 %v4984_v62, %v4984_v62  ;;  %v1535_v26 = vadd.f32 %v4790_v12, %v4984_v62  ;;  %v5560_v12 = vld [vmem:[#allocation17_spill] sm:$0xff]  ;;  %v5563_v50 = vld [vmem:[#allocation36_spill] sm:$0xff] }
 0x19b   :  { %v1604_v52 = vadd.f32 %v1603_v63, %v4943_v34  ;;  %v1632_v18 = vadd.f32 %v1631_v54, %v4977_v58  ;;  %v1686_v5 = vmul.f32 %v5556_v3, %v5556_v3  ;;  %v1622_v38 = vadd.f32 %v5561_v28, %v5560_v12  ;;  %v5569_v12 = vld [vmem:[#allocation25_spill] sm:$0xff] }
 0x19c   :  { %v1316_v42 = vclz %v3144_v49  ;;  %v1567_v29 = vadd.f32 %v1559_v24, %v4992_v1  ;;  %v1575_v15 = vmul.f32 %v1535_v26, %v1535_v26  ;;  %v1594_v61 = vadd.f32 %v1593_v21, %v5559_v40  ;;  %v5564_v24 = vld [vmem:[#allocation40_spill] sm:$0xff]  ;;  %v5568_v40 = vld [vmem:[#allocation37_spill] sm:$0xff] }
 0x19d   :  { %v1605_v16 = vadd.f32 %v1604_v52, %v5557_v22  ;;  %v1633_v48 = vadd.f32 %v1632_v18, %v5558_v20  ;;  %v1679_v32 = vadd.f32 %v5562_v14, %v5556_v3  ;;  %v495_v44 = vmul.f32 %v410_v23, %v93_v33  ;;  %v5566_v18 = vld [vmem:[#allocation31_spill] sm:$0xff] }
 0x19e   :  { %v3145_v41 = vadd.s32 4294967294, %v1316_v42  ;;  %v1583_v46 = vsub.f32 %v1575_v15, %v1567_v29  ;;  %v5009_v60 = vadd.f32 %v5563_v50, %v1686_v5  ;;  %v1595_v63 = vadd.f32 %v1594_v61, %v5564_v24  ;;  %v5567_v42 = vld [vmem:[#allocation14_spill] sm:$0xff] }
 0x19f   :  { %v1649_v47 = vmul.f32 %v1605_v16, %v1605_v16  ;;  %v1623_v54 = vadd.f32 %v1622_v38, %v5565_v7  ;;  %v5013_v49 = vmul.f32 %v1679_v32, %v1679_v32  ;;  %v1304_v26 = vadd.s32 %v4875_v17, %v4884_v36 }
 0x1a0   :  { %vm3146_vm10 = vcmp.lt.s32.totalorder %v3145_v41, 0  ;;  %v5015_v31 = vmul.f32 0.5, %v1583_v46  ;;  %v1596_v3 = vadd.f32 %v1595_v63, %v5566_v18  ;;  %v1488_v5 = vmul.f32 %v495_v44, %v495_v44  ;;  %v5030_v63 = vld [vmem:[%s5374_s7 + $0x18] sm:$0xff] }
 0x1a1   :  { %v1319_v0 = vsel %vm3146_vm10, 0, %v3145_v41  ;;  %v1653_v21 = vsub.f32 %v1649_v47, %v1633_v48  ;;  %v1624_v29 = vadd.f32 %v1623_v54, %v5567_v42  ;;  %v1699_v15 = vsub.f32 %v5013_v49, %v5009_v60  ;;  %v3177_v60 = vld [vmem:[%s5374_s7 + $0x40] sm:$0xff] }
 0x1a2   :  { %v1320_v52 = vsub.s32 32, %v1319_v0  ;;  %v1324_v23 = vsub.s32 4294967266, %v1319_v0  ;;  %1987 = vmatprep.subr.mxu1 %v5015_v31  ;;  %v1321_v22 = vshll.u32 %v1312_v30, %v1319_v0  ;;  %v1597_v48 = vadd.f32 %v1596_v3, %v495_v44 }
 0x1a3   :  { %v1657_v33 = vmul.f32 0.5, %v1653_v21  ;;  %v1625_v41 = vadd.f32 %v1624_v29, %v1488_v5  ;;  %v1334_v24 = vsub.s32 4, %v4945_v35  ;;  %vm1250_vm11 = vcmp.lt.s32.totalorder %v5536_v56, 0  ;;  %v5043_v21 = vld [vmem:[%s5374_s7 + $0x20] sm:$0xff] }
 0x1a4   :  { %v1322_v16 = vshrl.u32 %v1304_v26, %v1320_v52  ;;  %v1325_v20 = vadd.s32 127, %v1324_v23  ;;  %v1598_v61 = vadd.f32 %v1597_v48, %v5568_v40  ;;  %vm1249_vm13 = vcmp.le.f32.partialorder %v1248_v37, 0.7853982  ;;  %v5052_v37 = vld [vmem:[%s5374_s7 + $0x28] sm:$0xff] }
 0x1a5   :  { %2323 = vmatprep.subr.mxu0 %v1657_v33  ;;  %v1626_v28 = vadd.f32 %v1625_v41, %v5569_v12  ;;  %v1335_v0 = vsel %vm1250_vm11, %v1334_v24, %v4945_v35  ;;  %v1522_v23 = vadd.f32 %v4943_v34, %v495_v44  ;;  %vm3439_vm14 = vmmov 0  }
 0x1a6   :  { %v1323_v17 = vor.u32 %v1322_v16, %v1321_v22  ;;  %v1326_v36 = vshll.u32 %v1325_v20, 23  ;;  %v1648_v14 = vmul.f32 %v1598_v61, %v1598_v61  ;;  %v1337_v52 = vsel %vm1249_vm13, 0, %v1335_v0 }
 0x1a7   :  { %v1341_v35 = vadd.s32 3, %v1337_v52  ;;  %v1554_v3 = vadd.f32 %v4977_v58, %v1488_v5  ;;  %v1523_v42 = vadd.f32 %v1522_v23, %v4888_v43  ;;  %vm1340_vm2 = vweird.f32 %v5536_v56 }
 0x1a8   :  { %v1327_v38 = vor.u32 4788187, %v1326_v36  ;;  %v1330_v46 = vcvt.s32.f32 %v1323_v17  ;;  %v1652_v47 = vsub.f32 %v1648_v14, %v1626_v28  ;;  %v1690_v55 = vmul.f32 %v5015_v31, %v5015_v31 }
 0x1a9   :  { %v1342_v18 = vand.u32 3, %v1341_v35  ;;  %v1555_v20 = vadd.f32 %v1554_v3, %v4918_v45  ;;  %v1524_v44 = vadd.f32 %v1523_v42, %v4892_v53  ;;  %vm1706_vm4 = vcmask 1043456  }
 0x1aa   :  { %v1328_v32 = vand.u32 2147483647, %v1327_v38  ;;  %v1656_v30 = vmul.f32 0.5, %v1652_v47  ;;  %vm2884_vm7 = vcmask 130048  }
 0x1ab   :  { %vm1347_vm15 = vcmp.eq.s32.totalorder %v1342_v18, 2  ;;  %vm1344_vm0 = vcmp.eq.s32.totalorder %v1342_v18, 0  ;;  %vm1343_vm1 = vcmp.lt.s32.totalorder %v1342_v18, 2  ;;  %v1556_v58 = vadd.f32 %v1555_v20, %v4924_v13  ;;  %v5139_v18 = vld [vmem:[%s5369_s2] sm:$0xff] }
 0x1ac   :  { %v1331_v50 = vmul.f32 %v1330_v46, %v1328_v32  ;;  %2324 = vmatpush1.msra.mxu0 %v1656_v30  ;;  %v1659_v13 = vmul.f32 0.5, %v1655_v2 }
 0x1ad   :  { %3200 = vmatprep.subr.mxu0 %v5510_v59  ;;  %3166 = vmatmul.mubr.msk.f32.vlgmr.msra.gmra.mrb[12].mxu0 %vm1728_vm3, %v5030_v63 }
 0x1ae   :  { %v1332_v7 = vxor.u32 2147483648, %v1331_v50  ;;  %2393 = vmatprep.mubr.f32.mxu0 %v5510_v59 }
 0x1b0   :  { %v1333_v54 = vsel %vm1250_vm11, %v1332_v7, %v1331_v50 }
 0x1b1   :  { %v1336_v26 = vsel %vm1249_vm13, %v5536_v56, %v1333_v54  ;;  %3167 = vmatmul.mubr.msk.f32.gmra.mrb[14].mxu0 %vm1728_vm3, %v5043_v21 }
 0x1b2   :  { %3318 = vcosq.f32 %v1336_v26  ;;  %2399 = vmatprep.mubr.f32.mxu0 %v5510_v59 }
 0x1b3   :  { %3320 = vsinq.f32 %v1336_v26 }
 0x1b5   :  { %3168 = vmatmul.mubr.msk.f32.gmra.mrb[16].mxu0 %vm1728_vm3, %v5052_v37 }
 0x1b6   :  { %3202 = vmatprep.mubr.msk.f32.mxu0 %vm3439_vm14, %v5510_v59 }
 0x1bc   :  { %v3319_v33 = vpop.eup %3318 }
 0x1bd   :  { %v3321_v29 = vpop.eup %3320  ;;  %v1348_v22 = vxor.u32 2147483648, %v3319_v33 }
 0x1be   :  { %v1345_v16 = vxor.u32 2147483648, %v3321_v29 }
 0x1bf   :  { %v1349_v48 = vsel %vm1347_vm15, %v1348_v22, %v3321_v29 }
 0x1c0   :  { %v1346_v34 = vsel %vm1344_vm0, %v3319_v33, %v1345_v16 }
 0x1c1   :  { %v1350_v41 = vsel %vm1343_vm1, %v1346_v34, %v1349_v48  ;;  %v2134_v48 = vsub.f32 1.0, %v5139_v18 }
 0x1c2   :  { %v1351_v17 = vsel %vm1340_vm2, nan, %v1350_v41 }
 0x1c3   :  { %v1462_v43 = vsel %vm623_vm12, %v5536_v56, %v1351_v17  ;;  %v1658_v56 = vmul.f32 0.5, %v1654_v8  ;;  %vm2793_vm12 = vcmask 195584  }
 0x1c4   :  { %v1502_v5 = vmul.f32 %v1462_v43, %v1462_v43  ;;  %v1534_v36 = vadd.f32 %v1524_v44, %v1462_v43  ;;  %v1665_v45 = vadd.f32 %v4815_v25, %v1462_v43 }
 0x1c6   :  { %v1566_v40 = vadd.f32 %v1556_v58, %v1502_v5  ;;  %v1574_v61 = vmul.f32 %v1534_v36, %v1534_v36  ;;  %v1666_v12 = vadd.f32 %v1665_v45, %v4984_v62  ;;  %v1672_v53 = vadd.f32 %v4822_v6, %v1502_v5  ;;  %v3362_v6 = vld [vmem:[%s5374_s7] sm:$0xff] }
 0x1c8   :  { %v1582_v28 = vsub.f32 %v1574_v61, %v1566_v40  ;;  %v1673_v38 = vadd.f32 %v1672_v53, %v4992_v1  ;;  %v1674_v14 = vmul.f32 %v1666_v12, %v1666_v12  ;;  %v5146_v40 = vmul.f32 1e+12, %v2134_v48 }
 0x1ca   :  { %v1590_v32 = vmul.f32 0.5, %v1582_v28  ;;  %v1675_v25 = vsub.f32 %v1674_v14, %v1673_v38 }
 0x1cc   :  { %1988 = vmatpush1.msra.mxu1 %v1590_v32  ;;  %v1681_v46 = vadd.f32 %v4930_v51, %v1590_v32  ;;  %v1689_v62 = vmul.f32 %v1590_v32, %v1590_v32  ;;  %v1676_v1 = vmul.f32 0.5, %v1675_v25 }
 0x1cd   :  { %2406 = vmatprep.subr.mxu1 %v1659_v13  ;;  %3160 = vmatmul.mubr.msk.f32.vlgmr.msra.gmra.mrb[6].mxu1 %vm1728_vm3, %v3362_v6 }
 0x1ce   :  { %2407 = vmatpush1.msra.mxu1 %v1658_v56  ;;  %v1682_v19 = vadd.f32 %v1681_v46, %v5015_v31  ;;  %v1695_v4 = vadd.f32 %v4935_v57, %v1689_v62  ;;  %2057 = vmatprep.mubr.f32.mxu1 %v5510_v59  ;;  %v3176_v57 = vld [vmem:[%s5374_s7 + $0x38] sm:$0xff] }
 0x1cf   :  { %3201 = vmatpush3.msra.mxu0 %v1676_v1 }
 0x1d0   :  { %v1696_v51 = vadd.f32 %v1695_v4, %v1690_v55  ;;  %v1698_v10 = vmul.f32 %v1682_v19, %v1682_v19  ;;  %3203 = vmatmul.mubr.msk.f32.vlgmr.msra.gmra.mrb[18].mxu0 %vm1728_vm3, %v5030_v63 }
 0x1d1   :  { %3161 = vmatmul.mubr.msk.f32.gmra.mrb[8].mxu1 %vm1728_vm3, %v4507_v39  ;;  %3205 = vmatprep.mubr.msk.f32.mxu0 %vm3439_vm14, %v5510_v59  ;;  %v1701_v39 = vmul.f32 0.5, %v1699_v15 }
 0x1d2   :  { %v1700_v8 = vsub.f32 %v1698_v10, %v1696_v51  ;;  %2063 = vmatprep.mubr.f32.mxu1 %v5510_v59 }
 0x1d4   :  { %v1702_v2 = vmul.f32 0.5, %v1700_v8  ;;  %3206 = vmatmul.mubr.msk.f32.gmra.mrb[20].mxu0 %vm1728_vm3, %v5043_v21 }
 0x1d5   :  { %3162 = vmatmul.mubr.msk.f32.gmra.mrb[10].mxu1 %vm1728_vm3, %v4532_v9  ;;  %3208 = vmatprep.mubr.msk.f32.mxu0 %vm3439_vm14, %v5510_v59  ;;  %v3175_v9 = vld [vmem:[%s5374_s7 + $0x30] sm:$0xff] }
 0x1d6   :  { %2660 = vmatprep.subr.mxu1 %v1702_v2  ;;  %2470 = vmatprep.mubr.f32.mxu1 %v5510_v59 }
 0x1d8   :  { %3209 = vmatmul.mubr.msk.f32.gmra.mrb[22].mxu0 %vm1728_vm3, %v5052_v37 }
 0x1d9   :  { %3169 = vmatmul.mubr.msk.f32.vlgmr.msra.gmra.mrb[12].mxu1 %vm1728_vm3, %v5030_v63 }
 0x1da   :  { %2661 = vmatpush1.msra.mxu1 %v1701_v39  ;;  %2476 = vmatprep.mubr.f32.mxu1 %v5510_v59 }
 0x1dd   :  { %3170 = vmatmul.mubr.msk.f32.gmra.mrb[14].mxu1 %vm1728_vm3, %v5043_v21 }
 0x1de   :  { %2482 = vmatprep.mubr.f32.mxu1 %v5510_v59 }
 0x1e1   :  { %3171 = vmatmul.mubr.msk.f32.gmra.mrb[16].mxu1 %vm1728_vm3, %v5052_v37 }
 0x1e2   :  { %2724 = vmatprep.mubr.f32.mxu1 %v5510_v59 }
 0x1e5   :  { %3178 = vmatmul.mubr.msk.f32.vlgmr.msra.gmra.mrb[18].mxu1 %vm1728_vm3, %v3175_v9 }
 0x1e6   :  { %2730 = vmatprep.mubr.f32.mxu1 %v5510_v59 }
 0x1e9   :  { %3179 = vmatmul.mubr.msk.f32.gmra.mrb[20].mxu1 %vm1728_vm3, %v3176_v57 }
 0x1ea   :  { %2736 = vmatprep.mubr.f32.mxu1 %v5510_v59 }
 0x1ed   :  { %3180 = vmatmul.mubr.msk.f32.gmra.mrb[22].mxu1 %vm1728_vm3, %v3177_v60 }
 0x1ee   :  { %3224 = vmatprep.mubr.msk.f32.mxu1 %vm3439_vm14, %v5510_v59 }
 0x1f5   :  { %v1804_v49 = vpop.f32.mrb[0].mxu0 }
 0x1f6   :  { %v1806_v31 = vpop.f32.mrb[1].mxu0 }
 0x218   :  { %v1810_v15 = vpop.f32.mrb[2].mxu0 }
 0x219   :  { %v2070_v50 = vmul.f32 %v1810_v15, %v1804_v49  ;;  %v1812_v24 = vpop.f32.mrb[3].mxu0 }
 0x21a   :  { %v2071_v63 = vmul.f32 %v1812_v24, %v1806_v31 }
 0x21b   :  { %v2078_v7 = vrot.slane %v2070_v50, 4 }
 0x21c   :  { %v2084_v54 = vrot.slane %v2071_v63, 4  ;;  %v5132_v0 = vpop.f32.mrb[4].mxu0 }
 0x21d   :  { %v2079_v21 = vadd.f32 %v2078_v7, %v2070_v50  ;;  %v5134_v52 = vpop.f32.mrb[5].mxu0 }
 0x21e   :  { %v1887_v47 = vpop.f32.mrb[0].mxu1  ;;  %v2085_v35 = vadd.f32 %v2084_v54, %v2071_v63 }
 0x21f   :  { %v1889_v30 = vpop.f32.mrb[1].mxu1  ;;  %v2080_v3 = vrot.slane %v2079_v21, 2 }
 0x220   :  { %v2086_v29 = vrot.slane %v2085_v35, 2 }
 0x221   :  { %v2081_v22 = vadd.f32 %v2080_v3, %v2079_v21 }
 0x222   :  { %v1893_v26 = vpop.f32.mrb[2].mxu1  ;;  %v2087_v44 = vadd.f32 %v2086_v29, %v2085_v35 }
 0x223   :  { %v2072_v37 = vmul.f32 %v1893_v26, %v1887_v47  ;;  %v1895_v23 = vpop.f32.mrb[3].mxu1  ;;  %v2082_v17 = vrot.slane %v2081_v22, 1 }
 0x224   :  { %v2073_v33 = vmul.f32 %v1895_v23, %v1889_v30  ;;  %v2088_v5 = vrot.slane %v2087_v44, 1 }
 0x225   :  { %v2090_v42 = vrot.slane %v2072_v37, 4  ;;  %v2083_v36 = vadd.f32 %v2082_v17, %v2081_v22 }
 0x226   :  { %v2096_v16 = vrot.slane %v2073_v33, 4  ;;  %v5141_v20 = vpop.f32.mrb[4].mxu1  ;;  %v2089_v12 = vadd.f32 %v2088_v5, %v2087_v44 }
 0x227   :  { %v2091_v34 = vadd.f32 %v2090_v42, %v2072_v37  ;;  %v5144_v41 = vpop.f32.mrb[5].mxu1  ;;  %v2126_v28 = vmul.f32 0.35355338, %v2083_v36 }
 0x228   :  { %v2097_v58 = vadd.f32 %v2096_v16, %v2073_v33  ;;  %v2127_v14 = vmul.f32 0.35355338, %v2089_v12  ;;  %v2779_v12 = vld [vmem:[%s5375_s8] sm:$0xff] }
 0x229   :  { %v2092_v43 = vrot.slane %v2091_v34, 2  ;;  %v5152_v46 = vsub.f32 %v2126_v28, %v5146_v40  ;;  %3217 = vmatprep.mubr.msk.f32.mxu0 %vm2793_vm12, %v2779_v12 }
 0x22a   :  { %v2098_v45 = vrot.slane %v2097_v58, 2  ;;  %v5149_v56 = vsub.f32 %v2127_v14, %v5146_v40 }
 0x22b   :  { %v2093_v61 = vadd.f32 %v2092_v43, %v2091_v34 }
 0x22c   :  { %v2099_v53 = vadd.f32 %v2098_v45, %v2097_v58  ;;  %v2145_v6 = vrot.slane %v5149_v56, 1 }
 0x22d   :  { %v2094_v38 = vrot.slane %v2093_v61, 1 }
 0x22e   :  { %v2100_v13 = vrot.slane %v2099_v53, 1  ;;  %v2147_v55 = vmax.f32 %v5152_v46, %v2145_v6 }
 0x22f   :  { %v2095_v32 = vadd.f32 %v2094_v38, %v2093_v61  ;;  %v2781_v38 = vld [vmem:[%s5376_s9] sm:$0xff] }
 0x230   :  { %v2101_v25 = vadd.f32 %v2100_v13, %v2099_v53  ;;  %2785 = vperm.xlu1 %3287, %v2781_v38  }
 0x231   :  { %v2128_v62 = vmul.f32 0.35355338, %v2095_v32 }
 0x232   :  { %v2129_v1 = vmul.f32 0.35355338, %v2101_v25  ;;  %v2782_v25 = vld [vmem:[%s5376_s9 + $0x8] sm:$0xff] }
 0x233   :  { %v5156_v19 = vsub.f32 %v2128_v62, %v5146_v40 }
 0x234   :  { %v5160_v4 = vsub.f32 %v2129_v1, %v5146_v40  ;;  %2790 = vperm.xlu1 %3287, %v2782_v25  }
 0x235   :  { %v2149_v51 = vrot.slane %v5156_v19, 2 }
 0x236   :  { %v2153_v8 = vrot.slane %v5160_v4, 3 }
 0x237   :  { %v2151_v10 = vmax.f32 %v2147_v55, %v2149_v51  ;;  %v2960_v51 = vld [vmem:[#allocation2] sm:$0x1] }
 0x238   :  { %2963 = vperm.xlu1 %3287, %v2960_v51  }
 0x239   :  { %v2155_v2 = vmax.f32 %v2151_v10, %v2153_v8 }
 0x254   :  { %v1970_v39 = vpop.f32.mrb[6].mxu0 }
 0x255   :  { %v1972_v9 = vpop.f32.mrb[7].mxu0 }
 0x258   :  { %v1976_v57 = vpop.f32.mrb[8].mxu0 }
 0x259   :  { %v2074_v60 = vmul.f32 %v1976_v57, %v1970_v39  ;;  %v1978_v49 = vpop.f32.mrb[9].mxu0 }
 0x25a   :  { %v2075_v31 = vmul.f32 %v1978_v49, %v1972_v9 }
 0x25b   :  { %v2102_v15 = vrot.slane %v2074_v60, 4 }
 0x25c   :  { %v2108_v47 = vrot.slane %v2075_v31, 4  ;;  %v5164_v50 = vpop.f32.mrb[10].mxu0 }
 0x25d   :  { %v2103_v24 = vadd.f32 %v2102_v15, %v2074_v60  ;;  %v5166_v30 = vpop.f32.mrb[11].mxu0  ;;  %v1704_v15 = vcombine.high %v5139_v18, %v5139_v18 }
 0x25e   :  { %v2109_v63 = vadd.f32 %v2108_v47, %v2075_v31 }
 0x25f   :  { %v2104_v7 = vrot.slane %v2103_v24, 2 }
 0x260   :  { %v2110_v54 = vrot.slane %v2109_v63, 2 }
 0x261   :  { %v2105_v21 = vadd.f32 %v2104_v7, %v2103_v24  ;;  %v1707_v7 = vsel %vm1706_vm4, %v5139_v18, 0.0 }
 0x262   :  { %v2111_v26 = vadd.f32 %v2110_v54, %v2109_v63 }
 0x263   :  { %v2106_v37 = vrot.slane %v2105_v21, 1 }
 0x264   :  { %v2112_v35 = vrot.slane %v2111_v26, 1 }
 0x265   :  { %v2107_v23 = vadd.f32 %v2106_v37, %v2105_v21 }
 0x266   :  { %v2113_v3 = vadd.f32 %v2112_v35, %v2111_v26  ;;  %v1714_v26 = vsel %vm1706_vm4, %v1704_v15, 0.0 }
 0x267   :  { %v2130_v33 = vmul.f32 0.35355338, %v2107_v23 }
 0x268   :  { %v2131_v42 = vmul.f32 0.35355338, %v2113_v3  ;;  %v1708_v3 = vrot.slane %v1707_v7, 4 }
 0x269   :  { %v5169_v29 = vsub.f32 %v2130_v33, %v5146_v40 }
 0x26a   :  { %v5172_v22 = vsub.f32 %v2131_v42, %v5146_v40  ;;  %v1709_v18 = vadd.f32 %v1708_v3, %v1707_v7 }
 0x26b   :  { %v2157_v16 = vrot.slane %v5169_v29, 4 }
 0x26c   :  { %v2161_v48 = vrot.slane %v5172_v22, 5 }
 0x26d   :  { %v2159_v34 = vmax.f32 %v2155_v2, %v2157_v16 }
 0x26f   :  { %v5176_v44 = vmax.f32 %v2159_v34, %v2161_v48  ;;  %v1715_v48 = vrot.slane %v1714_v26, 4 }
 0x280   :  { %v2389_v17 = vpop.f32.mrb[12].mxu0 }
 0x281   :  { %v2391_v58 = vpop.f32.mrb[13].mxu0 }
 0x284   :  { %v2395_v43 = vpop.f32.mrb[14].mxu0 }
 0x285   :  { %v2569_v5 = vmul.f32 %v2395_v43, %v2389_v17  ;;  %v2397_v36 = vpop.f32.mrb[15].mxu0 }
 0x286   :  { %v2570_v45 = vmul.f32 %v2397_v36, %v2391_v58 }
 0x287   :  { %v2574_v61 = vrot.slane %v2569_v5, 4 }
 0x288   :  { %v2580_v53 = vrot.slane %v2570_v45, 4  ;;  %v5181_v28 = vpop.f32.mrb[16].mxu0 }
 0x289   :  { %v2575_v14 = vadd.f32 %v2574_v61, %v2569_v5  ;;  %v5187_v13 = vpop.f32.mrb[17].mxu0 }
 0x28a   :  { %v2581_v32 = vadd.f32 %v2580_v53, %v2570_v45  ;;  %v1716_v53 = vadd.f32 %v1715_v48, %v1714_v26 }
 0x28b   :  { %v2576_v62 = vrot.slane %v2575_v14, 2 }
 0x28c   :  { %v2582_v6 = vrot.slane %v2581_v32, 2 }
 0x28d   :  { %v2577_v1 = vadd.f32 %v2576_v62, %v2575_v14 }
 0x28e   :  { %v2583_v55 = vadd.f32 %v2582_v6, %v2581_v32  ;;  %v1710_v6 = vrot.slane %v1709_v18, 2 }
 0x28f   :  { %v2578_v10 = vrot.slane %v2577_v1, 1 }
 0x290   :  { %v2584_v8 = vrot.slane %v2583_v55, 1 }
 0x291   :  { %v2579_v2 = vadd.f32 %v2578_v10, %v2577_v1  ;;  %v1717_v10 = vrot.slane %v1716_v53, 2 }
 0x292   :  { %v2585_v39 = vadd.f32 %v2584_v8, %v2583_v55 }
 0x293   :  { %v5192_v9 = vmul.f32 0.35355338, %v2579_v2  ;;  %v1718_v26 = vadd.f32 %v1717_v10, %v1716_v53 }
 0x294   :  { %v5194_v57 = vmul.f32 0.35355338, %v2585_v39 }
 0x296   :  { %v2609_v60 = vmax.f32 %v5192_v9, %v5194_v57 }
 0x2a0   :  { %v2053_v49 = vpop.f32.mrb[6].mxu1 }
 0x2a1   :  { %v2055_v31 = vpop.f32.mrb[7].mxu1 }
 0x2a3   :  { %v2555_v47 = vpop.f32.mrb[18].mxu0 }
 0x2a4   :  { %v2059_v24 = vpop.f32.mrb[8].mxu1  ;;  %v3204_v63 = vpop.f32.mrb[19].mxu0 }
 0x2a5   :  { %v2076_v54 = vmul.f32 %v2059_v24, %v2053_v49  ;;  %v2061_v21 = vpop.f32.mrb[9].mxu1  ;;  %v1711_v24 = vadd.f32 %v1710_v6, %v1709_v18  ;;  %v1719_v18 = vrot.slane %v1718_v26, 1 }
 0x2a6   :  { %v2077_v37 = vmul.f32 %v2061_v21, %v2055_v31 }
 0x2a7   :  { %v2114_v35 = vrot.slane %v2076_v54, 4  ;;  %v2560_v23 = vpop.f32.mrb[20].mxu0 }
 0x2a8   :  { %v2120_v33 = vrot.slane %v2077_v37, 4  ;;  %v5203_v42 = vpop.f32.mrb[10].mxu1  ;;  %v2573_v16 = vmul.f32 %v2560_v23, %v2555_v47  ;;  %v3207_v34 = vpop.f32.mrb[21].mxu0 }
 0x2a9   :  { %v2115_v17 = vadd.f32 %v2114_v35, %v2076_v54  ;;  %v5205_v58 = vpop.f32.mrb[11].mxu1 }
 0x2aa   :  { %v2121_v43 = vadd.f32 %v2120_v33, %v2077_v37  ;;  %v2598_v12 = vrot.slane %v2573_v16, 4 }
 0x2ab   :  { %v2116_v5 = vrot.slane %v2115_v17, 2  ;;  %v5207_v36 = vpop.f32.mrb[22].mxu0 }
 0x2ac   :  { %v2122_v45 = vrot.slane %v2121_v43, 2  ;;  %v2472_v61 = vpop.f32.mrb[12].mxu1  ;;  %v3210_v38 = vpop.f32.mrb[23].mxu0  ;;  %v2599_v51 = vadd.f32 %v2598_v12, %v2573_v16 }
 0x2ad   :  { %v2117_v14 = vadd.f32 %v2116_v5, %v2115_v17  ;;  %v2474_v32 = vpop.f32.mrb[13].mxu1  ;;  %v1712_v5 = vrot.slane %v1711_v24, 1 }
 0x2ae   :  { %v2123_v25 = vadd.f32 %v2122_v45, %v2121_v43  ;;  %v2600_v21 = vrot.slane %v2599_v51, 2 }
 0x2af   :  { %v2118_v62 = vrot.slane %v2117_v14, 1 }
 0x2b0   :  { %v2124_v1 = vrot.slane %v2123_v25, 1  ;;  %v2478_v55 = vpop.f32.mrb[14].mxu1  ;;  %v2601_v43 = vadd.f32 %v2600_v21, %v2599_v51 }
 0x2b1   :  { %v2119_v8 = vadd.f32 %v2118_v62, %v2117_v14  ;;  %v2571_v2 = vmul.f32 %v2478_v55, %v2472_v61  ;;  %v2480_v39 = vpop.f32.mrb[15].mxu1  ;;  %v1713_v62 = vadd.f32 %v1712_v5, %v1711_v24 }
 0x2b2   :  { %v2125_v49 = vadd.f32 %v2124_v1, %v2123_v25  ;;  %v2572_v31 = vmul.f32 %v2480_v39, %v2474_v32  ;;  %v2602_v25 = vrot.slane %v2601_v43, 1 }
 0x2b3   :  { %v2132_v15 = vmul.f32 0.35355338, %v2119_v8  ;;  %v2586_v47 = vrot.slane %v2571_v2, 4  ;;  %vm1721_vm5 = vcmp.ge.f32.partialorder %v1713_v62, 1.0 }
 0x2b4   :  { %v2133_v63 = vmul.f32 0.35355338, %v2125_v49  ;;  %v2592_v7 = vrot.slane %v2572_v31, 4  ;;  %v5209_v54 = vpop.f32.mrb[16].mxu1 }
 0x2b5   :  { %v2142_v37 = vsub.f32 %v2132_v15, %v5146_v40  ;;  %v2587_v35 = vadd.f32 %v2586_v47, %v2571_v2  ;;  %v5212_v23 = vpop.f32.mrb[17].mxu1 }
 0x2b6   :  { %v2143_v3 = vsub.f32 %v2133_v63, %v5146_v40  ;;  %v2593_v33 = vadd.f32 %v2592_v7, %v2572_v31  ;;  %v1720_v40 = vadd.f32 %v1719_v18, %v1718_v26 }
 0x2b7   :  { %v2165_v16 = vrot.slane %v2142_v37, 6  ;;  %v2588_v48 = vrot.slane %v2587_v35, 2 }
 0x2b8   :  { %v2594_v34 = vrot.slane %v2593_v33, 2  ;;  %v2726_v17 = vpop.f32.mrb[18].mxu1  ;;  %v2169_v61 = vrot.slane %v2143_v3, 7  ;;  %vm1722_vm6 = vcmp.ge.f32.partialorder %v1720_v40, 1.0 }
 0x2b9   :  { %v2167_v45 = vmax.f32 %v5176_v44, %v2165_v16  ;;  %v2589_v12 = vadd.f32 %v2588_v48, %v2587_v35  ;;  %v2728_v53 = vpop.f32.mrb[19].mxu1 }
 0x2ba   :  { %v2595_v14 = vadd.f32 %v2594_v34, %v2593_v33  ;;  %v2603_v33 = vadd.f32 %v2602_v25, %v2601_v43 }
 0x2bb   :  { %v2171_v38 = vmax.f32 %v2167_v45, %v2169_v61  ;;  %v2590_v32 = vrot.slane %v2589_v12, 1 }
 0x2bc   :  { %v2732_v6 = vpop.f32.mrb[20].mxu1  ;;  %v2596_v63 = vrot.slane %v2595_v14, 1  ;;  %v2608_v18 = vmul.f32 0.35355338, %v2603_v33 }
 0x2bd   :  { %v2196_v1 = vrot.slane %v2171_v38, 3  ;;  %v2201_v55 = vrot.slane %v2171_v38, 2  ;;  %v2206_v10 = vrot.slane %v2171_v38, 1  ;;  %v2172_v8 = vsub.f32 %v5152_v46, %v2171_v38  ;;  %v2734_v51 = vpop.f32.mrb[21].mxu1 }
 0x2be   :  { %v2176_v2 = vrot.slane %v2171_v38, 7  ;;  %v2181_v39 = vrot.slane %v2171_v38, 6  ;;  %v2186_v49 = vrot.slane %v2171_v38, 5  ;;  %v2191_v44 = vrot.slane %v2171_v38, 4 }
 0x2bf   :  { %v2198_v31 = vsub.f32 %v5172_v22, %v2196_v1  ;;  %v2203_v15 = vsub.f32 %v2142_v37, %v2201_v55  ;;  %v2208_v47 = vsub.f32 %v2143_v3, %v2206_v10  ;;  %v2173_v46 = vmul.f32 1.442695, %v2172_v8 }
 0x2c0   :  { %v2178_v7 = vsub.f32 %v5149_v56, %v2176_v2  ;;  %v2183_v24 = vsub.f32 %v5156_v19, %v2181_v39  ;;  %v2188_v21 = vsub.f32 %v5160_v4, %v2186_v49  ;;  %v2193_v26 = vsub.f32 %v5169_v29, %v2191_v44  ;;  %v5222_v35 = vpop.f32.mrb[22].mxu1 }
 0x2c1   :  { %v2591_v48 = vadd.f32 %v2590_v32, %v2589_v12  ;;  %v2597_v22 = vadd.f32 %v2596_v63, %v2595_v14  ;;  %v2743_v37 = vmul.f32 %v2732_v6, %v2726_v17  ;;  %v5224_v3 = vpop.f32.mrb[23].mxu1  ;;  %v1723_v19 = vsel %vm1721_vm5, 1.0, %v5510_v59 }
 0x2c2   :  { %v2179_v16 = vmul.f32 1.442695, %v2178_v7  ;;  %v2184_v34 = vmul.f32 1.442695, %v2183_v24  ;;  %v2189_v56 = vmul.f32 1.442695, %v2188_v21  ;;  %v2744_v4 = vmul.f32 %v2734_v51, %v2728_v53 }
 0x2c3   :  { %v2606_v5 = vmul.f32 0.35355338, %v2591_v48  ;;  %3322 = vpow2.f32 %v2173_v46  ;;  %v2607_v29 = vmul.f32 0.35355338, %v2597_v22  ;;  %v2745_v45 = vrot.slane %v2743_v37, 4 }
 0x2c4   :  { %3324 = vpow2.f32 %v2179_v16  ;;  %v2194_v43 = vmul.f32 1.442695, %v2193_v26  ;;  %v2751_v12 = vrot.slane %v2744_v4, 4  ;;  %v2199_v17 = vmul.f32 1.442695, %v2198_v31 }
 0x2c5   :  { %v2610_v61 = vmax.f32 %v2609_v60, %v2606_v5  ;;  %3326 = vpow2.f32 %v2184_v34  ;;  %v2746_v38 = vadd.f32 %v2745_v45, %v2743_v37  ;;  %v1724_v32 = vsel %vm1722_vm6, 1.0, %v5510_v59 }
 0x2c6   :  { %3328 = vpow2.f32 %v2189_v56  ;;  %v2752_v53 = vadd.f32 %v2751_v12, %v2744_v4  ;;  %v2759_v62 = vsub.f32 1.0, %v1723_v19  ;;  %v2204_v6 = vmul.f32 1.442695, %v2203_v15 }
 0x2c7   :  { %v2611_v14 = vmax.f32 %v2610_v61, %v2607_v29  ;;  %v2747_v25 = vrot.slane %v2746_v38, 2  ;;  %3330 = vpow2.f32 %v2194_v43  ;;  %v2209_v10 = vmul.f32 1.442695, %v2208_v47 }
 0x2c8   :  { %v2753_v55 = vrot.slane %v2752_v53, 2  ;;  %3332 = vpow2.f32 %v2199_v17  ;;  %v2762_v60 = vsub.f32 1.0, %v1724_v32  ;;  %v2760_v21 = vmul.f32 1e+12, %v2759_v62 }
 0x2c9   :  { %v2612_v1 = vmax.f32 %v2611_v14, %v2608_v18  ;;  %v2748_v8 = vadd.f32 %v2747_v25, %v2746_v38  ;;  %3334 = vpow2.f32 %v2204_v6 }
 0x2ca   :  { %v2754_v40 = vadd.f32 %v2753_v55, %v2752_v53  ;;  %3336 = vpow2.f32 %v2209_v10 }
 0x2cb   :  { %v2613_v51 = vsub.f32 %v5192_v9, %v2612_v1  ;;  %v2616_v2 = vsub.f32 %v5194_v57, %v2612_v1  ;;  %v2619_v39 = vsub.f32 %v2606_v5, %v2612_v1  ;;  %v2625_v49 = vsub.f32 %v2608_v18, %v2612_v1 }
 0x2cc   :  { %v2749_v44 = vrot.slane %v2748_v8, 1  ;;  %v2622_v31 = vsub.f32 %v2607_v29, %v2612_v1  ;;  %v2755_v47 = vrot.slane %v2754_v40, 1  ;;  %v2763_v9 = vmul.f32 1e+12, %v2762_v60 }
 0x2cd   :  { %v2614_v63 = vmul.f32 1.442695, %v2613_v51  ;;  %v2617_v7 = vmul.f32 1.442695, %v2616_v2  ;;  %v5234_v15 = vpop.eup %3322  ;;  %v2620_v46 = vmul.f32 1.442695, %v2619_v39 }
 0x2ce   :  { %v2750_v24 = vadd.f32 %v2749_v44, %v2748_v8  ;;  %v5236_v26 = vpop.eup %3324  ;;  %v2756_v48 = vadd.f32 %v2755_v47, %v2754_v40  ;;  %v2623_v22 = vmul.f32 1.442695, %v2622_v31  ;;  %v2626_v29 = vmul.f32 1.442695, %v2625_v49 }
 0x2cf   :  { %3338 = vpow2.f32 %v2614_v63  ;;  %v5238_v57 = vpop.eup %3326  ;;  %v2212_v33 = vrot.slane %v5236_v26, 1 }
 0x2d0   :  { %3340 = vpow2.f32 %v2617_v7  ;;  %v2757_v16 = vmul.f32 0.35355338, %v2750_v24  ;;  %v5241_v34 = vpop.eup %3328  ;;  %v2216_v56 = vrot.slane %v5238_v57, 2  ;;  %v2758_v19 = vmul.f32 0.35355338, %v2756_v48 }
 0x2d1   :  { %v2214_v37 = vadd.f32 %v5234_v15, %v2212_v33  ;;  %v5245_v4 = vpop.eup %3330  ;;  %3342 = vpow2.f32 %v2620_v46  ;;  %v2220_v43 = vrot.slane %v5241_v34, 3  ;;  %v2252_v33 = vsub.s32 1, %v3549_v11 }
 0x2d2   :  { %v2761_v5 = vsub.f32 %v2757_v16, %v2760_v21  ;;  %v3333_v18 = vpop.eup %3332  ;;  %v2764_v61 = vsub.f32 %v2758_v19, %v2763_v9  ;;  %3344 = vpow2.f32 %v2623_v22  ;;  %v2224_v17 = vrot.slane %v5245_v4, 4 }
 0x2d3   :  { %v2218_v45 = vadd.f32 %v2216_v56, %v2214_v37  ;;  %v3335_v14 = vpop.eup %3334  ;;  %3346 = vpow2.f32 %v2626_v29  ;;  %v2228_v25 = vrot.slane %v3333_v18, 5  ;;  %v2261_v16 = vsub.s32 2, %v3549_v11 }
 0x2d4   :  { %v2765_v38 = vmax.f32 %v2761_v5, %v2764_v61  ;;  %v3337_v32 = vpop.eup %3336  ;;  %v2232_v8 = vrot.slane %v3335_v14, 6  ;;  %v2270_v48 = vsub.s32 3, %v3549_v11  ;;  %v2279_v22 = vsub.s32 4, %v3549_v11 }
 0x2d5   :  { %v2222_v12 = vadd.f32 %v2220_v43, %v2218_v45  ;;  %v2236_v39 = vrot.slane %v3337_v32, 7  ;;  %v2288_v56 = vsub.s32 5, %v3549_v11  ;;  %v2306_v19 = vsub.s32 7, %v3549_v11 }
 0x2d6   :  { %v2766_v62 = vsub.f32 %v2761_v5, %v2765_v38  ;;  %v2769_v6 = vsub.f32 %v2764_v61, %v2765_v38  ;;  %v2297_v5 = vsub.s32 6, %v3549_v11 }
 0x2d7   :  { %v2226_v53 = vadd.f32 %v2224_v17, %v2222_v12 }
 0x2d8   :  { %v2767_v60 = vmul.f32 1.442695, %v2766_v62  ;;  %v2770_v51 = vmul.f32 1.442695, %v2769_v6 }
 0x2d9   :  { %v3339_v1 = vpop.eup %3338  ;;  %v2230_v10 = vadd.f32 %v2228_v25, %v2226_v53 }
 0x2da   :  { %v5249_v55 = vpop.eup %3340  ;;  %3348 = vpow2.f32 %v2770_v51 }
 0x2db   :  { %v2628_v2 = vadd.f32 %v5249_v55, %v3339_v1  ;;  %v2234_v49 = vadd.f32 %v2232_v8, %v2230_v10  ;;  %v3343_v44 = vpop.eup %3342  ;;  %3350 = vpow2.f32 %v2767_v60 }
 0x2dc   :  { %v3345_v63 = vpop.eup %3344 }
 0x2dd   :  { %v2238_v40 = vadd.f32 %v2236_v39, %v2234_v49  ;;  %v2629_v31 = vadd.f32 %v3343_v44, %v2628_v2  ;;  %v3347_v24 = vpop.eup %3346 }
 0x2df   :  { %3352 = vrcp.f32 %v2238_v40  ;;  %v2630_v7 = vadd.f32 %v3345_v63, %v2629_v31 }
 0x2e1   :  { %v2631_v21 = vadd.f32 %v3347_v24, %v2630_v7 }
 0x2e3   :  { %3354 = vrcp.f32 %v2631_v21 }
 0x2e4   :  { %v3349_v47 = vpop.eup %3348 }
 0x2e5   :  { %v3351_v9 = vpop.eup %3350 }
 0x2e6   :  { %v2772_v46 = vadd.f32 %v3351_v9, %v3349_v47 }
 0x2e8   :  { %3356 = vrcp.f32 %v2772_v46 }
 0x2e9   :  { %v3353_v37 = vpop.eup %3352 }
 0x2ea   :  { %v2240_v29 = vmul.f32 %v3353_v37, %v5234_v15  ;;  %v2247_v45 = vrot.slane %v3353_v37, 7  ;;  %v2256_v43 = vrot.slane %v3353_v37, 6  ;;  %v2265_v61 = vrot.slane %v3353_v37, 5 }
 0x2eb   :  { %v2274_v12 = vrot.slane %v3353_v37, 4  ;;  %v2283_v17 = vrot.slane %v3353_v37, 3  ;;  %v2292_v38 = vrot.slane %v3353_v37, 2  ;;  %v2301_v53 = vrot.slane %v3353_v37, 1 }
 0x2ec   :  { %v2244_v25 = vrot.slane %v2240_v29, %v3570_v27  ;;  %v2249_v62 = vmul.f32 %v5236_v26, %v2247_v45  ;;  %v2258_v6 = vmul.f32 %v5238_v57, %v2256_v43  ;;  %v2267_v10 = vmul.f32 %v5241_v34, %v2265_v61 }
 0x2ed   :  { %v3355_v8 = vpop.eup %3354  ;;  %v2276_v11 = vmul.f32 %v5245_v4, %v2274_v12  ;;  %v2285_v60 = vmul.f32 %v3333_v18, %v2283_v17  ;;  %v2294_v15 = vmul.f32 %v3335_v14, %v2292_v38  ;;  %v2303_v51 = vmul.f32 %v3337_v32, %v2301_v53 }
 0x2ee   :  { %v2245_v2 = vmul.f32 %v2244_v25, %v5132_v0  ;;  %v2253_v39 = vrot.slane %v2249_v62, %v2252_v33  ;;  %v2262_v49 = vrot.slane %v2258_v6, %v2261_v16  ;;  %v2271_v40 = vrot.slane %v2267_v10, %v2270_v48  ;;  %v2877_v62 = vld [vmem:[%s5377_s10] sm:$0xff]  ;;  %v2882_v6 = vpop.permute.xlu0 %2881 }
 0x2ef   :  { %v2280_v31 = vrot.slane %v2276_v11, %v2279_v22  ;;  %v2289_v7 = vrot.slane %v2285_v60, %v2288_v56  ;;  %v2298_v21 = vrot.slane %v2294_v15, %v2297_v5  ;;  %v2307_v46 = vrot.slane %v2303_v51, %v2306_v19  ;;  %v2959_v60 = vld [vmem:[%s5379_s12] sm:$0x1]  ;;  %v3044_v15 = vld [vmem:[%s5371_s4 + $0x4] sm:$0xf] }
 0x2f0   :  { %v2254_v26 = vmul.f32 %v2253_v39, %v5134_v52  ;;  %v2263_v57 = vmul.f32 %v2262_v49, %v5141_v20  ;;  %v2272_v34 = vmul.f32 %v2271_v40, %v5144_v41  ;;  %v2633_v37 = vmul.f32 %v3355_v8, %v3339_v1  ;;  %v3043_v51 = vld [vmem:[%s5371_s4] sm:$0xf] }
 0x2f1   :  { %v2281_v4 = vmul.f32 %v2280_v31, %v5164_v50  ;;  %v2290_v18 = vmul.f32 %v2289_v7, %v5166_v30  ;;  %v2299_v0 = vmul.f32 %v2298_v21, %v5203_v42  ;;  %v2308_v14 = vmul.f32 %v2307_v46, %v5205_v58  ;;  %v3364_v49 = vld [vmem:[%s5368_s1] sm:$0xf]  ;;  %v3045_v31 = vld [vmem:[%s5371_s4 + $0x8] sm:$0xf] }
 0x2f2   :  { %v2255_v32 = vadd.f32 %v2254_v26, %v2245_v2  ;;  %v2634_v33 = vmul.f32 %v2633_v37, %v5181_v28  ;;  %v2635_v16 = vmul.f32 %v3355_v8, %v5249_v55  ;;  %v2638_v48 = vmul.f32 %v3355_v8, %v3343_v44  ;;  %v3357_v52 = vpop.eup %3356  ;;  %v3363_v2 = vld [vmem:[%s5368_s1 + $0x4] sm:$0xf]  ;;  %v3365_v7 = vld [vmem:[%s5368_s1 + $0x8] sm:$0xf]  ;;  %v3366_v37 = vld [vmem:[%s5368_s1 + $0xc] sm:$0xf] }
 0x2f3   :  { %v2641_v22 = vmul.f32 %v3355_v8, %v3345_v63  ;;  %v2644_v20 = vmul.f32 %v3355_v8, %v3347_v24  ;;  %v2774_v41 = vmul.f32 %v3357_v52, %v3351_v9  ;;  %v2776_v1 = vmul.f32 %v3357_v52, %v3349_v47 }
 0x2f4   :  { %v2264_v56 = vadd.f32 %v2263_v57, %v2255_v32  ;;  %v2636_v50 = vmul.f32 %v2635_v16, %v5187_v13  ;;  %v2639_v30 = vmul.f32 %v2638_v48, %v5209_v54  ;;  %v3440_v54 = vmov 0.0|0.0   ;;  %v3046_v57 = vld [vmem:[%s5371_s4 + $0xc] sm:$0xf]  ;;  %v3367_v32 = vld [vmem:[%s5368_s1 + $0x10] sm:$0xf] }
 0x2f5   :  { %v2642_v42 = vmul.f32 %v2641_v22, %v5212_v23  ;;  %v2645_v58 = vmul.f32 %v2644_v20, %v5207_v36  ;;  %v2775_v28 = vmul.f32 %v2774_v41, %v5222_v35  ;;  %v2777_v55 = vmul.f32 %v2776_v1, %v5224_v3  ;;  %v2780_v36 = vld [vmem:[%s5375_s8 + $0x8] sm:$0xff]  ;;  %3236 = vmatprep.subr.bf16.mxu1 %v3440_v54  ;;  %v2786_v23 = vpop.permute.xlu1 %2785  ;;  %v3048_v48 = vld [vmem:[%s5371_s4 + $0x14] sm:$0xf]  ;;  %v3049_v41 = vld [vmem:[%s5371_s4 + $0x18] sm:$0xf] }
 0x2f6   :  { %v2273_v5 = vadd.f32 %v2272_v34, %v2264_v56  ;;  %v2637_v44 = vadd.f32 %v2636_v50, %v2634_v33  ;;  %v3052_v39 = vmul.f32 %v3363_v2, %v3044_v15  ;;  %v3051_v40 = vmul.f32 %v3364_v49, %v3043_v51  ;;  %v3368_v22 = vld [vmem:[%s5368_s1 + $0x14] sm:$0xf]  ;;  %v3369_v50 = vld [vmem:[%s5368_s1 + $0x18] sm:$0xf] }
 0x2f7   :  { %v2778_v63 = vadd.f32 %v2777_v55, %v2775_v28  ;;  %v3053_v21 = vmul.f32 %v3365_v7, %v3045_v31  ;;  %v3056_v20 = vmul.f32 %v3368_v22, %v3048_v48  ;;  %v3370_v28 = vld [vmem:[%s5368_s1 + $0x1c] sm:$0xf]  ;;  %s3441_s1 = smov [#allocation7]  }
 0x2f8   :  { %v2282_v19 = vadd.f32 %v2281_v4, %v2273_v5  ;;  %v2640_v24 = vadd.f32 %v2639_v30, %v2637_v44  ;;  %v3059_v46 = vsel %vm1706_vm4, %v3051_v40, 0.0  ;;  %v3060_v26 = vsel %vm1706_vm4, %v3052_v39, 0.0 }
 0x2f9   :  { %v2791_v35 = vpop.permute.xlu1 %2790  ;;  %v3061_v34 = vadd.f32 %v3060_v26, %v3059_v46  ;;  %v3054_v4 = vmul.f32 %v3366_v37, %v3046_v57  ;;  %v3057_v30 = vmul.f32 %v3369_v50, %v3049_v41 }
 0x2fa   :  { %v2291_v29 = vadd.f32 %v2290_v18, %v2282_v19  ;;  %v2643_v9 = vadd.f32 %v2642_v42, %v2640_v24  ;;  %v3062_v18 = vsel %vm1706_vm4, %v3053_v21, 0.0  ;;  %v3068_v42 = vsel %vm1706_vm4, %v3056_v20, 0.0 }
 0x2fb   :  { %v3064_v16 = vsel %vm1706_vm4, %v3054_v4, 0.0  ;;  %v3070_v44 = vsel %vm1706_vm4, %v3057_v30, 0.0 }
 0x2fc   :  { %v2300_v47 = vadd.f32 %v2299_v0, %v2291_v29  ;;  %v2646_v45 = vadd.f32 %v2645_v58, %v2643_v9  ;;  %v3047_v0 = vld [vmem:[%s5371_s4 + $0x10] sm:$0xf]  ;;  %v3050_v58 = vld [vmem:[%s5371_s4 + $0x1c] sm:$0xf]  ;;  %s3110_s4 = sshll.u32 %s3441_s1, 4  ;;  %s3111_s4 = int_to_ptr.vmem [resolvable:$true] %s3110_s4 }
 0x2fd   :  { %v3055_v33 = vmul.f32 %v3367_v32, %v3047_v0  ;;  %v3058_v55 = vmul.f32 %v3370_v28, %v3050_v58  ;;  %s3401_s27 = scalar_lea.vmem %s3111_s4, 128  ;;  %p3406_p9 = scmp.lt.s32.totalorder %s3111_s4, %s3111_s4 }
 0x2fe   :  { %v2309_v13 = vadd.f32 %v2308_v14, %v2300_v47  ;;  %v3063_v14 = vadd.f32 %v3062_v18, %v3061_v34  ;;  %p3402_p8 = scmp.ne.s32.totalorder %s3111_s4, %s3401_s27  ;;  %p3407_p10 = scmp.lt.s32.totalorder %s3401_s27, %s3401_s27 }
 0x2ff   :  { %v3066_v56 = vsel %vm1706_vm4, %v3055_v33, 0.0 }
 0x300   :  { %v3232_v43 = vpack.c.bf16 %v2646_v45, %v2309_v13  ;;  %v3065_v52 = vadd.f32 %v3064_v16, %v3063_v14  ;;  %p3408_p11 = por %p3407_p10, %p3406_p9 }
 0x302   :  { %3233 = vmatprep.subr.bf16.mxu0 %v3232_v43  ;;  %v3067_v1 = vadd.f32 %v3066_v56, %v3065_v52  ;;  %p3409_p12 = pnand %p3408_p11, %p3402_p8 }
 0x303   :  { %3235 = vmatpush3.bf16.msra.mxu0 %v3232_v43 }
 0x304   :  { %3215 = vmatprep.subr.mxu0 %v2778_v63  ;;  %v3069_v5 = vadd.f32 %v3068_v42, %v3067_v1 }
 0x306   :  { %v3071_v19 = vadd.f32 %v3070_v44, %v3069_v5 }
 0x307   :  { %3216 = vmatpush3.msra.mxu0 %v2778_v63  ;;  %v3072_v63 = vsel %vm1706_vm4, %v3058_v55, 0.0 }
 0x308   :  { %3218 = vmatmul.mubr.msk.f32.vlgmr.msra.gmra.mrb[24].mxu0 %vm2793_vm12, %v2780_v36  ;;  %3227 = vmatprep.subr.mxu0 %v5510_v59  ;;  %v3073_v24 = vadd.f32 %v3072_v63, %v3071_v19  ;;  %v2964_v36 = vpop.permute.xlu1 %2963 }
 0x309   :  { %3229 = vmatprep.mubr.msk.f32.mxu0 %vm3439_vm14, %v5510_v59  ;;  %v2969_v54 = vrot.slane %v2964_v36, %v3570_v27 }
 0x30a   :  { %v3074_v29 = vsel %vm1706_vm4, %v3073_v24, 0.0 }
 0x30b   :  { %v3075_v9 = vrot.slane %v3074_v29, 4 }
 0x30d   :  { %v3076_v47 = vadd.f32 %v3075_v9, %v3074_v29 }
 0x30f   :  { %v3077_v45 = vrot.slane %v3076_v47, 2 }
 0x311   :  { %v3078_v13 = vadd.f32 %v3077_v45, %v3076_v47 }
 0x313   :  { %v3079_v43 = vrot.slane %v3078_v13, 1 }
 0x3db   :  { %v3219_v3 = vpop.f32.mrb[24].mxu0 }
 0x3dc   :  { %v2872_v61 = vadd.f32 %v3219_v3, %v2791_v35  ;;  %v2866_v12 = vpop.f32.mrb[25].mxu0  ;;  %v3086_v35 = vpop.permute.xlu0 %3085 }
 0x3dd   :  { %v2867_v17 = vadd.f32 %v2866_v12, %v2786_v23  ;;  %v3080_v23 = vadd.f32 %v3079_v43, %v3078_v13 }
 0x3de   :  { %v2876_v38 = vmax.f32 %v2872_v61, 0.0 }
 0x3df   :  { %v2875_v53 = vmax.f32 %v2867_v17, 0.0  ;;  %v3091_v17 = vrot.slane %v3086_v35, %v3570_v27 }
 0x3e1   :  { %v3237_v25 = vpack.c.bf16 %v2876_v38, %v2875_v53 }
 0x3e3   :  { %3238 = vmatpush3.bf16.msra.mxu1 %v3237_v25 }
 0x3e6   :  { %3225 = vmatmul.mubr.msk.f32.vlgmr.msra.gmra.mrb[24].mxu1 %vm2884_vm7, %v2877_v62 }
 0x4b9   :  { %v2954_v59 = vpop.f32.mrb[24].mxu1 }
 0x4ba   :  { %v2955_v10 = vadd.f32 %v2954_v59, %v2882_v6  ;;  %v3226_v8 = vpop.f32.mrb[25].mxu1 }
 0x4bc   :  { %v2958_v11 = vmax.f32 %v2955_v10, 0.0 }
 0x4be   :  { %3228 = vmatpush3.msra.mxu0 %v2958_v11 }
 0x4bf   :  { %3230 = vmatmul.mubr.msk.f32.vlgmr.msra.gmra.mrb[26].mxu0 %vm1728_vm3, %v2959_v60 }
 0x592   :  { %v3039_v3 = vpop.f32.mrb[26].mxu0 }
 0x593   :  { %v3040_v61 = vadd.f32 %v3039_v3, %v2969_v54  ;;  %v3231_v12 = vpop.f32.mrb[27].mxu0 }
 0x595   :  { %v3081_v38 = vadd.f32 %v3080_v23, %v3040_v61 }
 0x597   :  { %v3092_v53 = vadd.f32 %v3091_v17, %v3081_v38 }
 0x599   :  { %v3185_v25 = vmul.f32 -1.442695, %v3092_v53 }
 0x59b   :  { %3358 = vpow2.f32 %v3185_v25 }
 0x5a5   :  { %v3359_v62 = vpop.eup %3358 }
 0x5a6   :  { %v3096_v6 = vadd.f32 1.0, %v3359_v62 }
 0x5a8   :  { %3360 = vrcp.f32 %v3096_v6 }
 0x5b2   :  { %v3361_v59 = vpop.eup %3360 }
 0x5b3   :  { %v3102_v10 = vrot.slane %v3361_v59, %v3570_v27 }
 0x5b5   :  { %3103 = vst [vmem:[#allocation7] sm:$0xff] %v3102_v10 }
 0x5b6   :  { %3412 = shalt.err (!%p3409_p12)
}
 0x5b7   :  { %s3413_s29 = scalar_lea.hbm %s5381_s15, 128 }
 0x5b8   :  { %p3414_p13 = scmp.ne.s32.totalorder %s5381_s15, %s3413_s29  ;;  %p3417_p0 = scmp.lt.u32.totalorder %s3413_s29, %s5381_s15 }
 0x5ba   :  { %p3419_p1 = pnand %p3417_p0, %p3414_p13 }
 0x5bc   :  { %3422 = shalt.err (!%p3419_p1)
}
 0x5bd   :  { %3113 = dma.vmem_to_hbm [thread:$0]  %s3111_s4, 128, %s5381_s15, [#allocation6]  }
 0x5be   :  { %3425 = dma.done.wait [#allocation6], 128  }
 0x5bf   :  { %3426 = vsyncadd [#allocation6], 4294967168 }
 0x5c0   :  { %3117 = vsyncpa [#allocation5], 1 }
 0x5c1   :  { %3118 = vsyncpa [#allocation6], 1 }

</bundles_post_ra>
